<compile_context>
chip_gen: v5e
topology: v5e:2x2
jax: 0.10.0
libtpu: 0.0.40
codegen_flags: <defaults>
</compile_context>

<pallas_src>
import functools
import math

import jax
import jax.numpy as jnp
from jax.experimental import pallas as pl
from jax.experimental.pallas import tpu as pltpu

_FF_CHUNK = 512  # d_ff chunk size: bounds the (rows, d_ff) f32 intermediate


# ----------------------------- in-kernel helpers -----------------------------

def _layer_norm(x2, alpha, bias, eps=1e-6):
    """Reference `Norm`: alpha*(x-mean)/(std+eps)+bias; torch std is unbiased (ddof=1).

    x2: (M, d) f32; alpha/bias: (1, d) f32.  Exact divide (result feeds the
    residual stream 3N+1 times, so no approx reciprocal here).
    """
    d = x2.shape[-1]
    mean = jnp.mean(x2, axis=-1, keepdims=True)
    var = jnp.sum((x2 - mean) ** 2, axis=-1, keepdims=True) * (1.0 / (d - 1))
    return alpha * (x2 - mean) / (jnp.sqrt(var) + eps) + bias


def _split_heads(t, n, heads, B, S):
    """(B*S, n*d) f32 -> (n, heads*B, S, dk) head-batched tensors.

    Layout-friendly decomposition: one 2-D transpose, order-preserving reshapes,
    one batched minor-two-dims swap (leading dims untouched).  No per-head
    dk-wide lane slices.
    """
    d = t.shape[-1] // n
    dk = d // heads
    t = t.T                                   # (n*d, B*S)     2-D transpose
    t = t.reshape(n * heads, dk, B * S)       # order-preserving sublane split
    t = jnp.swapaxes(t, 1, 2)                 # (n*H, B*S, dk) minor-two swap
    return t.reshape(n, heads * B, S, dk)     # order-preserving (g = h*B + b)


def _merge_heads(ctx, heads, B, S):
    """(heads*B, S, dk) f32 -> (B*S, heads*dk) in concat-over-heads column order."""
    dk = ctx.shape[-1]
    t = ctx.reshape(heads, B * S, dk)         # order-preserving
    t = jnp.swapaxes(t, 1, 2)                 # (H, dk, B*S)   minor-two swap
    t = t.reshape(heads * dk, B * S)          # order-preserving
    return t.T                                # (B*S, d)       2-D transpose


def _attention_core(qh, kh, vh, wo, bo, bias, heads, B, Sq, Skv):
    """Scaled dot-product attention on head-batched tensors + output projection.

    qh: (H*B, Sq, dk), kh/vh: (H*B, Skv, dk) f32; wo: (d, d) bf16; bo: (1, d) f32;
    bias: additive f32 mask bias, (B, Sq, Skv) or (B, 1, Skv).  -> (B*Sq, d) f32.
    """
    # TODO(synk): for long sequences, tile over KV blocks with online softmax
    # (flash-style) instead of materializing the full (H*B, Sq, Skv) scores.
    dk = qh.shape[-1]
    s = jnp.einsum('gqd,gkd->gqk', qh.astype(jnp.bfloat16), kh.astype(jnp.bfloat16),
                   preferred_element_type=jnp.float32) * (1.0 / math.sqrt(dk))
    s = s.reshape(heads, B, Sq, Skv) + bias[None]          # precomputed additive mask
    s = s - jnp.max(s, axis=-1, keepdims=True)
    p = jnp.exp(s)
    p = p * pl.reciprocal(jnp.sum(p, axis=-1, keepdims=True), approx=True)  # EUP
    p = p.reshape(heads * B, Sq, Skv).astype(jnp.bfloat16)
    ctx = jnp.einsum('gqk,gkd->gqd', p, vh.astype(jnp.bfloat16),
                     preferred_element_type=jnp.float32)   # (H*B, Sq, dk)
    ctx2 = _merge_heads(ctx, heads, B, Sq).astype(jnp.bfloat16)   # (B*Sq, d)
    return jnp.dot(ctx2, wo, preferred_element_type=jnp.float32) + bo


# ---------------------------------- kernel ------------------------------------

def fused_decoder_kernel(x0_ref, e_ref, tbias_ref, sbias_ref,
                         na_ref, nb_ref,
                         a1_wqkv_ref, a1_wo_ref, a1_bqkv_ref, a1_bo_ref,
                         a2_wq_ref, a2_wkv_ref, a2_wo_ref,
                         a2_bq_ref, a2_bkv_ref, a2_bo_ref,
                         ff_w1_ref, ff_b1_ref, ff_w2_ref, ff_b2_ref,
                         fa_ref, fb_ref,
                         out_ref, *, heads):
    layer = pl.program_id(0)
    n_layers = pl.num_programs(0)
    B, S_t, d = out_ref.shape
    S_s = e_ref.shape[1]

    @pl.when(layer == 0)
    def _():
        out_ref[...] = x0_ref[...]           # seed the layer-resident activation

    x = out_ref[...].reshape(B * S_t, d)     # (M, d) f32, carried across layers
    e = e_ref[...].reshape(B * S_s, d)       # bf16 encoder outputs (shipped as bf16)
    tbias = tbias_ref[...]                   # (B, S_t, S_t) additive f32 (hoisted)
    sbias = sbias_ref[...]                   # (B, 1, S_s)  additive f32 (hoisted)
    na = na_ref[0]                           # (3, d)
    nb = nb_ref[0]

    # ---- self-attention sublayer: x += attn(norm1(x)) ----
    x2 = _layer_norm(x, na[0:1], nb[0:1]).astype(jnp.bfloat16)
    qkv = jnp.dot(x2, a1_wqkv_ref[0],
                  preferred_element_type=jnp.float32) + a1_bqkv_ref[0]    # (M, 3d)
    qkvh = _split_heads(qkv, 3, heads, B, S_t)
    x = x + _attention_core(qkvh[0], qkvh[1], qkvh[2],
                            a1_wo_ref[0], a1_bo_ref[0], tbias, heads, B, S_t, S_t)

    # ---- cross-attention sublayer: x += attn(norm2(x), e, e) ----
    x2 = _layer_norm(x, na[1:2], nb[1:2]).astype(jnp.bfloat16)
    q = jnp.dot(x2, a2_wq_ref[0],
                preferred_element_type=jnp.float32) + a2_bq_ref[0]        # (M, d)
    kv = jnp.dot(e, a2_wkv_ref[0],
                 preferred_element_type=jnp.float32) + a2_bkv_ref[0]      # (Mk, 2d)
    qh = _split_heads(q, 1, heads, B, S_t)[0]
    kvh = _split_heads(kv, 2, heads, B, S_s)
    x = x + _attention_core(qh, kvh[0], kvh[1],
                            a2_wo_ref[0], a2_bo_ref[0], sbias, heads, B, S_t, S_s)

    # ---- feed-forward sublayer: x += W2 @ relu(W1 @ norm3(x)) ----
    x2 = _layer_norm(x, na[2:3], nb[2:3]).astype(jnp.bfloat16)
    w1 = ff_w1_ref[0]
    b1 = ff_b1_ref[0]
    w2 = ff_w2_ref[0]
    b2 = ff_b2_ref[0]
    dff = w1.shape[-1]
    if dff <= _FF_CHUNK:
        h = jnp.maximum(jnp.dot(x2, w1, preferred_element_type=jnp.float32) + b1, 0.0)
        ffo = jnp.dot(h.astype(jnp.bfloat16), w2, preferred_element_type=jnp.float32)
    else:
        # Chunk over d_ff so the (M, d_ff) f32 intermediate never lives whole.
        # TODO(synk): at production d_ff also stream W1/W2 chunks on a grid axis to
        # bound the double-buffered weight block on v7x's 64 MiB VMEM.
        ffo = jnp.zeros_like(x)
        for c0 in range(0, dff, _FF_CHUNK):
            c1 = min(c0 + _FF_CHUNK, dff)
            h = jnp.maximum(jnp.dot(x2, w1[:, c0:c1],
                                    preferred_element_type=jnp.float32) + b1[:, c0:c1],
                            0.0)
            ffo = ffo + jnp.dot(h.astype(jnp.bfloat16), w2[c0:c1, :],
                                preferred_element_type=jnp.float32)
    x = x + ffo + b2

    @pl.when(layer < n_layers - 1)
    def _():
        out_ref[...] = x.reshape(B, S_t, d)           # carry to the next layer step

    @pl.when(layer == n_layers - 1)
    def _():                                          # fused final Norm
        y = _layer_norm(x, fa_ref[...], fb_ref[...])
        out_ref[...] = y.reshape(B, S_t, d)


# --------------------------------- wrappers ----------------------------------

def stack_layer_params(layers):
    """Stack per-layer params on a leading (N,...) axis; fuse QKV / KV; bf16 weights."""
    st = lambda key: jnp.stack([lp[key] for lp in layers], axis=0)
    a1_w, a1_b = st("a1_w"), st("a1_b")     # (N,4,d,d), (N,4,d): rows Wq,Wk,Wv,Wo
    a2_w, a2_b = st("a2_w"), st("a2_b")
    cat_w = lambda w, idx: jnp.concatenate([w[:, i] for i in idx], axis=-1)
    cat_b = lambda b, idx: jnp.concatenate([b[:, i] for i in idx], axis=-1)[:, None, :]
    return {
        "norm_a": st("norm_a"), "norm_b": st("norm_b"),                    # (N,3,d)
        "a1_wqkv": cat_w(a1_w, (0, 1, 2)).astype(jnp.bfloat16),            # (N,d,3d)
        "a1_wo": a1_w[:, 3].astype(jnp.bfloat16),                          # (N,d,d)
        "a1_bqkv": cat_b(a1_b, (0, 1, 2)),                                 # (N,1,3d)
        "a1_bo": a1_b[:, 3][:, None, :],                                   # (N,1,d)
        "a2_wq": a2_w[:, 0].astype(jnp.bfloat16),                          # (N,d,d)
        "a2_wkv": cat_w(a2_w, (1, 2)).astype(jnp.bfloat16),                # (N,d,2d)
        "a2_wo": a2_w[:, 3].astype(jnp.bfloat16),                          # (N,d,d)
        "a2_bq": a2_b[:, 0][:, None, :],                                   # (N,1,d)
        "a2_bkv": cat_b(a2_b, (1, 2)),                                     # (N,1,2d)
        "a2_bo": a2_b[:, 3][:, None, :],                                   # (N,1,d)
        "ff_w1": st("ff_w1").astype(jnp.bfloat16),                         # (N,d,dff)
        "ff_b1": st("ff_b1"),                                              # (N,1,dff)
        "ff_w2": st("ff_w2").astype(jnp.bfloat16),                         # (N,dff,d)
        "ff_b2": st("ff_b2"),                                              # (N,1,d)
    }


def run_fused_decoder(x0, e_bf16, tbias, sbias, sp, fnorm_a, fnorm_b, *, heads):
    B, S_t, d = x0.shape
    S_s = e_bf16.shape[1]
    n_layers = sp["norm_a"].shape[0]
    dff = sp["ff_w1"].shape[-1]

    def full(shape):
        n = len(shape)
        return pl.BlockSpec(shape, lambda l: (0,) * n)

    def per_layer(shape):
        n = len(shape)
        return pl.BlockSpec((1,) + shape, lambda l: (l,) + (0,) * n)

    in_specs = [
        full((B, S_t, d)),          # x0 (embedded + PE), f32
        full((B, S_s, d)),          # e_outputs, bf16
        full((B, S_t, S_t)),        # trg additive mask bias
        full((B, 1, S_s)),          # src additive mask bias
        per_layer((3, d)),          # norm alphas (3 per layer)
        per_layer((3, d)),          # norm betas
        per_layer((d, 3 * d)),      # self-attn fused W_qkv
        per_layer((d, d)),          # self-attn W_o
        per_layer((1, 3 * d)),      # self-attn fused b_qkv
        per_layer((1, d)),          # self-attn b_o
        per_layer((d, d)),          # cross-attn W_q
        per_layer((d, 2 * d)),      # cross-attn fused W_kv
        per_layer((d, d)),          # cross-attn W_o
        per_layer((1, d)),          # cross-attn b_q
        per_layer((1, 2 * d)),      # cross-attn fused b_kv
        per_layer((1, d)),          # cross-attn b_o
        per_layer((d, dff)),        # ff W1
        per_layer((1, dff)),        # ff b1
        per_layer((dff, d)),        # ff W2
        per_layer((1, d)),          # ff b2
        full((1, d)),               # final norm alpha
        full((1, d)),               # final norm beta
    ]
    return pl.pallas_call(
        functools.partial(fused_decoder_kernel, heads=heads),
        grid=(n_layers,),
        in_specs=in_specs,
        out_specs=pl.BlockSpec((B, S_t, d), lambda l: (0, 0, 0)),  # resident over l
        out_shape=jax.ShapeDtypeStruct((B, S_t, d), jnp.float32),
        compiler_params=pltpu.CompilerParams(
            dimension_semantics=("arbitrary",),
            vmem_limit_bytes=64 * 1024 * 1024),
    )(x0, e_bf16, tbias, sbias,
      sp["norm_a"], sp["norm_b"],
      sp["a1_wqkv"], sp["a1_wo"], sp["a1_bqkv"], sp["a1_bo"],
      sp["a2_wq"], sp["a2_wkv"], sp["a2_wo"],
      sp["a2_bq"], sp["a2_bkv"], sp["a2_bo"],
      sp["ff_w1"], sp["ff_b1"], sp["ff_w2"], sp["ff_b2"],
      fnorm_a, fnorm_b)


def decoder_forward(trg, e_outputs, src_mask, trg_mask, params, *, heads):
    """Full Decoder forward: embed -> PE -> N x DecoderLayer -> Norm (one pallas_call)."""
    d = params["embed"].shape[1]
    S_t = trg.shape[1]

    # Embedder + PositionalEncoder (glue: gather + table add; dropout = identity).
    x = params["embed"][trg] * jnp.float32(math.sqrt(d))        # (B, S_t, d)
    x = x + params["pe"][None, :S_t, :]

    # Masks -> additive f32 biases, built ONCE and reused by every layer in-kernel.
    tbias = jnp.where(trg_mask > 0, 0.0, -1e9).astype(jnp.float32)   # (B, S_t, S_t)
    sbias = jnp.where(src_mask > 0, 0.0, -1e9).astype(jnp.float32)   # (B, 1, S_s)

    sp = stack_layer_params(params["layers"])
    return run_fused_decoder(x.astype(jnp.float32), e_outputs.astype(jnp.bfloat16),
                             tbias, sbias, sp,
                             params["norm_a"], params["norm_b"], heads=heads)


# ------------------------------ parameter init --------------------------------

def make_pe_table(max_len, d):
    # Replicates the reference PositionalEncoder table exactly.
    pos = jnp.arange(max_len, dtype=jnp.float32)[:, None]
    i = jnp.arange(0, d, 2, dtype=jnp.float32)[None, :]
    sin = jnp.sin(pos / (10000.0 ** ((2.0 * i) / d)))
    cos = jnp.cos(pos / (10000.0 ** ((2.0 * (i + 1.0)) / d)))
    pe = jnp.zeros((max_len, d), jnp.float32)
    pe = pe.at[:, 0::2].set(sin).at[:, 1::2].set(cos)
    return pe


def init_params(key, vocab_size, d_model, N, heads, d_ff, max_len):
    def nrm(k, shape, scale=0.02):
        return scale * jax.random.normal(k, shape, jnp.float32)

    keys = jax.random.split(key, 2 + 6 * N)
    params = {
        "embed": jax.random.normal(keys[0], (vocab_size, d_model), jnp.float32),
        "pe": make_pe_table(max_len, d_model),
        "norm_a": jnp.ones((1, d_model), jnp.float32),
        "norm_b": jnp.zeros((1, d_model), jnp.float32),
        "layers": [],
    }
    for n in range(N):
        k = keys[2 + 6 * n: 2 + 6 * (n + 1)]
        params["layers"].append({
            "norm_a": jnp.ones((3, d_model), jnp.float32),
            "norm_b": jnp.zeros((3, d_model), jnp.float32),
            "a1_w": nrm(k[0], (4, d_model, d_model)),   # rows: Wq, Wk, Wv, Wo (x @ W)
            "a1_b": nrm(k[1], (4, d_model)),
            "a2_w": nrm(k[2], (4, d_model, d_model)),
            "a2_b": nrm(k[3], (4, d_model)),
            "ff_w1": nrm(k[4], (d_model, d_ff)),
            "ff_b1": jnp.zeros((1, d_ff), jnp.float32),
            "ff_w2": nrm(k[5], (d_ff, d_model)),
            "ff_b2": jnp.zeros((1, d_model), jnp.float32),
        })
    return params


# ----------------------------------- main -------------------------------------

if __name__ == "__main__":
    # small config: vocab=50, d_model=32, N=2 layers, heads=4
    # TODO(synk): FeedForward default d_ff is 2048 in the reference; kept at 64 here.
    VOCAB, D_MODEL, N_LAYERS, HEADS, D_FF = 50, 32, 2, 4, 64
    B, S_T, S_S, MAX_LEN = 2, 8, 16, 64
    PAD = 0

    root = jax.random.PRNGKey(0)
    k_par, k_trg, k_enc = jax.random.split(root, 3)

    params = init_params(k_par, VOCAB, D_MODEL, N_LAYERS, HEADS, D_FF, MAX_LEN)

    # Target tokens (with trailing pads on the second sequence) and encoder outputs.
    trg = jax.random.randint(k_trg, (B, S_T), 1, VOCAB).astype(jnp.int32)
    trg = trg.at[1, -2:].set(PAD)
    e_outputs = jax.random.normal(k_enc, (B, S_S, D_MODEL), jnp.float32)

    # src_mask: (B, 1, S_s); mask out the last 3 encoder positions of batch 1.
    src_mask = jnp.ones((B, 1, S_S), jnp.float32)
    src_mask = src_mask.at[1, 0, -3:].set(0.0)

    # trg_mask: pad mask & causal (no-peek) mask -> (B, S_t, S_t)
    pad_mask = (trg != PAD).astype(jnp.float32)[:, None, :]          # (B,1,S_t)
    nopeak = jnp.tril(jnp.ones((S_T, S_T), jnp.float32))[None]       # (1,S_t,S_t)
    trg_mask = pad_mask * nopeak                                     # (B,S_t,S_t)

    out = decoder_forward(trg, e_outputs, src_mask, trg_mask, params, heads=HEADS)
    out = jax.block_until_ready(out)
    assert out.shape == (B, S_T, D_MODEL) and bool(jnp.all(jnp.isfinite(out)))
    print("KERNEL_OK")
</pallas_src>

<mosaic_0001>
module attributes {stable_mosaic.version = 11 : i64} {
  func.func @fused_decoder_kernel(%arg0: i32, %arg1: memref<2x8x32xf32, #tpu.memory_space<vmem>>, %arg2: memref<2x16x32xbf16, #tpu.memory_space<vmem>>, %arg3: memref<2x8x8xf32, #tpu.memory_space<vmem>>, %arg4: memref<2x1x16xf32, #tpu.memory_space<vmem>>, %arg5: memref<1x3x32xf32, #tpu.memory_space<vmem>>, %arg6: memref<1x3x32xf32, #tpu.memory_space<vmem>>, %arg7: memref<1x32x96xbf16, #tpu.memory_space<vmem>>, %arg8: memref<1x32x32xbf16, #tpu.memory_space<vmem>>, %arg9: memref<1x1x96xf32, #tpu.memory_space<vmem>>, %arg10: memref<1x1x32xf32, #tpu.memory_space<vmem>>, %arg11: memref<1x32x32xbf16, #tpu.memory_space<vmem>>, %arg12: memref<1x32x64xbf16, #tpu.memory_space<vmem>>, %arg13: memref<1x32x32xbf16, #tpu.memory_space<vmem>>, %arg14: memref<1x1x32xf32, #tpu.memory_space<vmem>>, %arg15: memref<1x1x64xf32, #tpu.memory_space<vmem>>, %arg16: memref<1x1x32xf32, #tpu.memory_space<vmem>>, %arg17: memref<1x32x64xbf16, #tpu.memory_space<vmem>>, %arg18: memref<1x1x64xf32, #tpu.memory_space<vmem>>, %arg19: memref<1x64x32xbf16, #tpu.memory_space<vmem>>, %arg20: memref<1x1x32xf32, #tpu.memory_space<vmem>>, %arg21: memref<1x32xf32, #tpu.memory_space<vmem>>, %arg22: memref<1x32xf32, #tpu.memory_space<vmem>>, %arg23: memref<2x8x32xf32, #tpu.memory_space<vmem>>) attributes {dimension_semantics = [#tpu.dimension_semantics<arbitrary>], iteration_bounds = array<i64: 2>, scalar_prefetch = 0 : i64, scratch_operands = 0 : i64, tpu.core_type = #tpu.core_type<tc>, window_params = [{pipeline_mode = #tpu.pipeline_mode<synchronous>, transform_indices = @transform_0, window_bounds = array<i64: 2, 8, 32>}, {pipeline_mode = #tpu.pipeline_mode<synchronous>, transform_indices = @transform_1, window_bounds = array<i64: 2, 16, 32>}, {pipeline_mode = #tpu.pipeline_mode<synchronous>, transform_indices = @transform_2, window_bounds = array<i64: 2, 8, 8>}, {pipeline_mode = #tpu.pipeline_mode<synchronous>, transform_indices = @transform_3, window_bounds = array<i64: 2, 1, 16>}, {transform_indices = @transform_4, window_bounds = array<i64: 1, 3, 32>}, {transform_indices = @transform_5, window_bounds = array<i64: 1, 3, 32>}, {transform_indices = @transform_6, window_bounds = array<i64: 1, 32, 96>}, {transform_indices = @transform_7, window_bounds = array<i64: 1, 32, 32>}, {transform_indices = @transform_8, window_bounds = array<i64: 1, 1, 96>}, {transform_indices = @transform_9, window_bounds = array<i64: 1, 1, 32>}, {transform_indices = @transform_10, window_bounds = array<i64: 1, 32, 32>}, {transform_indices = @transform_11, window_bounds = array<i64: 1, 32, 64>}, {transform_indices = @transform_12, window_bounds = array<i64: 1, 32, 32>}, {transform_indices = @transform_13, window_bounds = array<i64: 1, 1, 32>}, {transform_indices = @transform_14, window_bounds = array<i64: 1, 1, 64>}, {transform_indices = @transform_15, window_bounds = array<i64: 1, 1, 32>}, {transform_indices = @transform_16, window_bounds = array<i64: 1, 32, 64>}, {transform_indices = @transform_17, window_bounds = array<i64: 1, 1, 64>}, {transform_indices = @transform_18, window_bounds = array<i64: 1, 64, 32>}, {transform_indices = @transform_19, window_bounds = array<i64: 1, 1, 32>}, {pipeline_mode = #tpu.pipeline_mode<synchronous>, transform_indices = @transform_20, window_bounds = array<i64: 1, 32>}, {pipeline_mode = #tpu.pipeline_mode<synchronous>, transform_indices = @transform_21, window_bounds = array<i64: 1, 32>}, {pipeline_mode = #tpu.pipeline_mode<synchronous>, transform_indices = @transform_22, window_bounds = array<i64: 2, 8, 32>}]} {
    %c0_i32 = arith.constant 0 : i32
    %0 = arith.cmpi eq, %arg0, %c0_i32 : i32
    %1 = arith.extui %0 : i1 to i32
    %c0_i32_0 = arith.constant 0 : i32
    %2 = arith.cmpi ne, %1, %c0_i32_0 : i32
    scf.if %2 {
      %c0_95 = arith.constant 0 : index
      %c0_96 = arith.constant 0 : index
      %c0_97 = arith.constant 0 : index
      %228 = vector.load %arg1[%c0_95, %c0_96, %c0_97] : memref<2x8x32xf32, #tpu.memory_space<vmem>>, vector<2x8x32xf32>
      %c0_98 = arith.constant 0 : index
      %c0_99 = arith.constant 0 : index
      %c0_100 = arith.constant 0 : index
      %229 = vector.load %arg23[%c0_98, %c0_99, %c0_100] : memref<2x8x32xf32, #tpu.memory_space<vmem>>, vector<2x8x32xf32>
      tpu.vector_store %arg23[%c0_98, %c0_99, %c0_100], %228 {strides = array<i32>} : memref<2x8x32xf32, #tpu.memory_space<vmem>>, vector<2x8x32xf32>,
    } else {
    }
    %c0 = arith.constant 0 : index
    %c0_1 = arith.constant 0 : index
    %c0_2 = arith.constant 0 : index
    %3 = vector.load %arg23[%c0, %c0_1, %c0_2] : memref<2x8x32xf32, #tpu.memory_space<vmem>>, vector<2x8x32xf32>
    %4 = vector.shape_cast %3 : vector<2x8x32xf32> to vector<16x32xf32>
    %c0_3 = arith.constant 0 : index
    %c0_4 = arith.constant 0 : index
    %c0_5 = arith.constant 0 : index
    %5 = vector.load %arg2[%c0_3, %c0_4, %c0_5] : memref<2x16x32xbf16, #tpu.memory_space<vmem>>, vector<2x16x32xbf16>
    %6 = vector.shape_cast %5 : vector<2x16x32xbf16> to vector<32x32xbf16>
    %c0_6 = arith.constant 0 : index
    %c0_7 = arith.constant 0 : index
    %c0_8 = arith.constant 0 : index
    %7 = vector.load %arg3[%c0_6, %c0_7, %c0_8] : memref<2x8x8xf32, #tpu.memory_space<vmem>>, vector<2x8x8xf32>
    %c0_9 = arith.constant 0 : index
    %c0_10 = arith.constant 0 : index
    %c0_11 = arith.constant 0 : index
    %8 = vector.load %arg4[%c0_9, %c0_10, %c0_11] : memref<2x1x16xf32, #tpu.memory_space<vmem>>, vector<2x1x16xf32>
    %c0_12 = arith.constant 0 : index
    %c0_13 = arith.constant 0 : index
    %c0_14 = arith.constant 0 : index
    %9 = vector.load %arg5[%c0_12, %c0_13, %c0_14] : memref<1x3x32xf32, #tpu.memory_space<vmem>>, vector<1x3x32xf32>
    %10 = vector.shape_cast %9 : vector<1x3x32xf32> to vector<3x32xf32>
    %c0_15 = arith.constant 0 : index
    %c0_16 = arith.constant 0 : index
    %c0_17 = arith.constant 0 : index
    %11 = vector.load %arg6[%c0_15, %c0_16, %c0_17] : memref<1x3x32xf32, #tpu.memory_space<vmem>>, vector<1x3x32xf32>
    %12 = vector.shape_cast %11 : vector<1x3x32xf32> to vector<3x32xf32>
    %13 = vector.extract_strided_slice %10 {offsets = [0, 0], sizes = [1, 32], strides = [1, 1]} : vector<3x32xf32> to vector<1x32xf32>
    %14 = vector.extract_strided_slice %12 {offsets = [0, 0], sizes = [1, 32], strides = [1, 1]} : vector<3x32xf32> to vector<1x32xf32>
    %cst = arith.constant dense<0.000000e+00> : vector<16xf32>
    %15 = vector.multi_reduction <add>, %4, %cst [1] : vector<16x32xf32> to vector<16xf32>
    %16 = vector.shape_cast %15 : vector<16xf32> to vector<16x1xf32>
    %cst_18 = arith.constant 3.200000e+01 : f32
    %17 = vector.broadcast %cst_18 : f32 to vector<16x1xf32>
    %18 = arith.divf %16, %17 : vector<16x1xf32>
    %19 = vector.broadcast %18 : vector<16x1xf32> to vector<16x32xf32>
    %20 = arith.subf %4, %19 : vector<16x32xf32>
    %21 = arith.mulf %20, %20 : vector<16x32xf32>
    %cst_19 = arith.constant dense<0.000000e+00> : vector<16xf32>
    %22 = vector.multi_reduction <add>, %21, %cst_19 [1] : vector<16x32xf32> to vector<16xf32>
    %23 = vector.shape_cast %22 : vector<16xf32> to vector<16x1xf32>
    %cst_20 = arith.constant 0.0322580636 : f32
    %24 = vector.broadcast %cst_20 : f32 to vector<16x1xf32>
    %25 = arith.mulf %23, %24 : vector<16x1xf32>
    %26 = vector.broadcast %18 : vector<16x1xf32> to vector<16x32xf32>
    %27 = arith.subf %4, %26 : vector<16x32xf32>
    %28 = vector.broadcast %13 : vector<1x32xf32> to vector<16x32xf32>
    %29 = arith.mulf %28, %27 : vector<16x32xf32>
    %30 = math.sqrt %25 : vector<16x1xf32>
    %cst_21 = arith.constant 9.99999997E-7 : f32
    %31 = vector.broadcast %cst_21 : f32 to vector<16x1xf32>
    %32 = arith.addf %30, %31 : vector<16x1xf32>
    %33 = vector.broadcast %32 : vector<16x1xf32> to vector<16x32xf32>
    %34 = arith.divf %29, %33 : vector<16x32xf32>
    %35 = vector.broadcast %14 : vector<1x32xf32> to vector<16x32xf32>
    %36 = arith.addf %34, %35 : vector<16x32xf32>
    %37 = arith.truncf %36 : vector<16x32xf32> to vector<16x32xbf16>
    %c0_22 = arith.constant 0 : index
    %c0_23 = arith.constant 0 : index
    %c0_24 = arith.constant 0 : index
    %38 = vector.load %arg7[%c0_22, %c0_23, %c0_24] : memref<1x32x96xbf16, #tpu.memory_space<vmem>>, vector<1x32x96xbf16>
    %39 = vector.shape_cast %38 : vector<1x32x96xbf16> to vector<32x96xbf16>
    %cst_25 = arith.constant dense<0.000000e+00> : vector<16x96xf32>
    %40 = tpu.matmul %37, %39, %cst_25 {dimension_numbers = #tpu.dot_dimension_numbers<[1], [0], [0], [1], [0, 0, 1, 1], [], []>} : vector<16x32xbf16>, vector<32x96xbf16>, vector<16x96xf32> -> vector<16x96xf32>
    %c0_26 = arith.constant 0 : index
    %c0_27 = arith.constant 0 : index
    %c0_28 = arith.constant 0 : index
    %41 = vector.load %arg9[%c0_26, %c0_27, %c0_28] : memref<1x1x96xf32, #tpu.memory_space<vmem>>, vector<1x1x96xf32>
    %42 = vector.shape_cast %41 : vector<1x1x96xf32> to vector<1x96xf32>
    %43 = vector.broadcast %42 : vector<1x96xf32> to vector<16x96xf32>
    %44 = arith.addf %40, %43 : vector<16x96xf32>
    %45 = tpu.transpose %44, [1, 0] : vector<16x96xf32> -> vector<96x16xf32>
    %46 = vector.shape_cast %45 : vector<96x16xf32> to vector<12x8x16xf32>
    %47 = tpu.transpose %46, [0, 2, 1] : vector<12x8x16xf32> -> vector<12x16x8xf32>
    %48 = vector.shape_cast %47 : vector<12x16x8xf32> to vector<3x8x8x8xf32>
    %49 = vector.extract_strided_slice %48 {offsets = [0, 0, 0, 0], sizes = [1, 8, 8, 8], strides = [1, 1, 1, 1]} : vector<3x8x8x8xf32> to vector<1x8x8x8xf32>
    %50 = vector.shape_cast %49 : vector<1x8x8x8xf32> to vector<8x8x8xf32>
    %51 = vector.extract_strided_slice %48 {offsets = [1, 0, 0, 0], sizes = [1, 8, 8, 8], strides = [1, 1, 1, 1]} : vector<3x8x8x8xf32> to vector<1x8x8x8xf32>
    %52 = vector.shape_cast %51 : vector<1x8x8x8xf32> to vector<8x8x8xf32>
    %53 = vector.extract_strided_slice %48 {offsets = [2, 0, 0, 0], sizes = [1, 8, 8, 8], strides = [1, 1, 1, 1]} : vector<3x8x8x8xf32> to vector<1x8x8x8xf32>
    %54 = vector.shape_cast %53 : vector<1x8x8x8xf32> to vector<8x8x8xf32>
    %c0_29 = arith.constant 0 : index
    %c0_30 = arith.constant 0 : index
    %c0_31 = arith.constant 0 : index
    %55 = vector.load %arg8[%c0_29, %c0_30, %c0_31] : memref<1x32x32xbf16, #tpu.memory_space<vmem>>, vector<1x32x32xbf16>
    %56 = vector.shape_cast %55 : vector<1x32x32xbf16> to vector<32x32xbf16>
    %c0_32 = arith.constant 0 : index
    %c0_33 = arith.constant 0 : index
    %c0_34 = arith.constant 0 : index
    %57 = vector.load %arg10[%c0_32, %c0_33, %c0_34] : memref<1x1x32xf32, #tpu.memory_space<vmem>>, vector<1x1x32xf32>
    %58 = vector.shape_cast %57 : vector<1x1x32xf32> to vector<1x32xf32>
    %59 = arith.truncf %50 : vector<8x8x8xf32> to vector<8x8x8xbf16>
    %60 = arith.truncf %52 : vector<8x8x8xf32> to vector<8x8x8xbf16>
    "tpu.trace_start"() <{level = 10 : i32, message = "gqd,gkd->gqk"}> : () -> ()
    %cst_35 = arith.constant dense<0.000000e+00> : vector<8x8x8xf32>
    %61 = tpu.matmul %59, %60, %cst_35 {dimension_numbers = #tpu.dot_dimension_numbers<[2], [2], [1], [1], [0, 0, 0, 1, 1, 1], [0], [0]>} : vector<8x8x8xbf16>, vector<8x8x8xbf16>, vector<8x8x8xf32> -> vector<8x8x8xf32>
    "tpu.trace_stop"() : () -> ()
    %cst_36 = arith.constant 0.353553385 : f32
    %62 = vector.broadcast %cst_36 : f32 to vector<8x8x8xf32>
    %63 = arith.mulf %61, %62 : vector<8x8x8xf32>
    %64 = vector.shape_cast %63 : vector<8x8x8xf32> to vector<4x2x8x8xf32>
    %65 = vector.shape_cast %7 : vector<2x8x8xf32> to vector<1x2x8x8xf32>
    %66 = vector.broadcast %65 : vector<1x2x8x8xf32> to vector<4x2x8x8xf32>
    %67 = arith.addf %64, %66 : vector<4x2x8x8xf32>
    %cst_37 = arith.constant dense<0xFF800000> : vector<4x2x8xf32>
    %68 = vector.multi_reduction <maximumf>, %67, %cst_37 [3] : vector<4x2x8x8xf32> to vector<4x2x8xf32>
    %69 = vector.shape_cast %68 : vector<4x2x8xf32> to vector<4x2x8x1xf32>
    %70 = vector.broadcast %69 : vector<4x2x8x1xf32> to vector<4x2x8x8xf32>
    %71 = arith.subf %67, %70 : vector<4x2x8x8xf32>
    %72 = math.exp %71 : vector<4x2x8x8xf32>
    %cst_38 = arith.constant dense<0.000000e+00> : vector<4x2x8xf32>
    %73 = vector.multi_reduction <add>, %72, %cst_38 [3] : vector<4x2x8x8xf32> to vector<4x2x8xf32>
    %74 = vector.shape_cast %73 : vector<4x2x8xf32> to vector<4x2x8x1xf32>
    %75 = tpu.reciprocal %74 {approx = true} : vector<4x2x8x1xf32> -> vector<4x2x8x1xf32>
    %76 = vector.broadcast %75 : vector<4x2x8x1xf32> to vector<4x2x8x8xf32>
    %77 = arith.mulf %72, %76 : vector<4x2x8x8xf32>
    %78 = vector.shape_cast %77 : vector<4x2x8x8xf32> to vector<8x8x8xf32>
    %79 = arith.truncf %78 : vector<8x8x8xf32> to vector<8x8x8xbf16>
    %80 = arith.truncf %54 : vector<8x8x8xf32> to vector<8x8x8xbf16>
    "tpu.trace_start"() <{level = 10 : i32, message = "gqk,gkd->gqd"}> : () -> ()
    %cst_39 = arith.constant dense<0.000000e+00> : vector<8x8x8xf32>
    %81 = tpu.matmul %79, %80, %cst_39 {dimension_numbers = #tpu.dot_dimension_numbers<[2], [1], [1], [2], [0, 0, 0, 1, 1, 2], [0], [0]>} : vector<8x8x8xbf16>, vector<8x8x8xbf16>, vector<8x8x8xf32> -> vector<8x8x8xf32>
    "tpu.trace_stop"() : () -> ()
    %82 = vector.shape_cast %81 : vector<8x8x8xf32> to vector<4x16x8xf32>
    %83 = tpu.transpose %82, [0, 2, 1] : vector<4x16x8xf32> -> vector<4x8x16xf32>
    %84 = vector.shape_cast %83 : vector<4x8x16xf32> to vector<32x16xf32>
    %85 = tpu.transpose %84, [1, 0] : vector<32x16xf32> -> vector<16x32xf32>
    %86 = arith.truncf %85 : vector<16x32xf32> to vector<16x32xbf16>
    %cst_40 = arith.constant dense<0.000000e+00> : vector<16x32xf32>
    %87 = tpu.matmul %86, %56, %cst_40 {dimension_numbers = #tpu.dot_dimension_numbers<[1], [0], [0], [1], [0, 0, 1, 1], [], []>} : vector<16x32xbf16>, vector<32x32xbf16>, vector<16x32xf32> -> vector<16x32xf32>
    %88 = vector.broadcast %58 : vector<1x32xf32> to vector<16x32xf32>
    %89 = arith.addf %87, %88 : vector<16x32xf32>
    %90 = arith.addf %4, %89 : vector<16x32xf32>
    %91 = vector.extract_strided_slice %10 {offsets = [1, 0], sizes = [1, 32], strides = [1, 1]} : vector<3x32xf32> to vector<1x32xf32>
    %92 = vector.extract_strided_slice %12 {offsets = [1, 0], sizes = [1, 32], strides = [1, 1]} : vector<3x32xf32> to vector<1x32xf32>
    %cst_41 = arith.constant dense<0.000000e+00> : vector<16xf32>
    %93 = vector.multi_reduction <add>, %90, %cst_41 [1] : vector<16x32xf32> to vector<16xf32>
    %94 = vector.shape_cast %93 : vector<16xf32> to vector<16x1xf32>
    %cst_42 = arith.constant 3.200000e+01 : f32
    %95 = vector.broadcast %cst_42 : f32 to vector<16x1xf32>
    %96 = arith.divf %94, %95 : vector<16x1xf32>
    %97 = vector.broadcast %96 : vector<16x1xf32> to vector<16x32xf32>
    %98 = arith.subf %90, %97 : vector<16x32xf32>
    %99 = arith.mulf %98, %98 : vector<16x32xf32>
    %cst_43 = arith.constant dense<0.000000e+00> : vector<16xf32>
    %100 = vector.multi_reduction <add>, %99, %cst_43 [1] : vector<16x32xf32> to vector<16xf32>
    %101 = vector.shape_cast %100 : vector<16xf32> to vector<16x1xf32>
    %cst_44 = arith.constant 0.0322580636 : f32
    %102 = vector.broadcast %cst_44 : f32 to vector<16x1xf32>
    %103 = arith.mulf %101, %102 : vector<16x1xf32>
    %104 = vector.broadcast %96 : vector<16x1xf32> to vector<16x32xf32>
    %105 = arith.subf %90, %104 : vector<16x32xf32>
    %106 = vector.broadcast %91 : vector<1x32xf32> to vector<16x32xf32>
    %107 = arith.mulf %106, %105 : vector<16x32xf32>
    %108 = math.sqrt %103 : vector<16x1xf32>
    %cst_45 = arith.constant 9.99999997E-7 : f32
    %109 = vector.broadcast %cst_45 : f32 to vector<16x1xf32>
    %110 = arith.addf %108, %109 : vector<16x1xf32>
    %111 = vector.broadcast %110 : vector<16x1xf32> to vector<16x32xf32>
    %112 = arith.divf %107, %111 : vector<16x32xf32>
    %113 = vector.broadcast %92 : vector<1x32xf32> to vector<16x32xf32>
    %114 = arith.addf %112, %113 : vector<16x32xf32>
    %115 = arith.truncf %114 : vector<16x32xf32> to vector<16x32xbf16>
    %c0_46 = arith.constant 0 : index
    %c0_47 = arith.constant 0 : index
    %c0_48 = arith.constant 0 : index
    %116 = vector.load %arg11[%c0_46, %c0_47, %c0_48] : memref<1x32x32xbf16, #tpu.memory_space<vmem>>, vector<1x32x32xbf16>
    %117 = vector.shape_cast %116 : vector<1x32x32xbf16> to vector<32x32xbf16>
    %cst_49 = arith.constant dense<0.000000e+00> : vector<16x32xf32>
    %118 = tpu.matmul %115, %117, %cst_49 {dimension_numbers = #tpu.dot_dimension_numbers<[1], [0], [0], [1], [0, 0, 1, 1], [], []>} : vector<16x32xbf16>, vector<32x32xbf16>, vector<16x32xf32> -> vector<16x32xf32>
    %c0_50 = arith.constant 0 : index
    %c0_51 = arith.constant 0 : index
    %c0_52 = arith.constant 0 : index
    %119 = vector.load %arg14[%c0_50, %c0_51, %c0_52] : memref<1x1x32xf32, #tpu.memory_space<vmem>>, vector<1x1x32xf32>
    %120 = vector.shape_cast %119 : vector<1x1x32xf32> to vector<1x32xf32>
    %121 = vector.broadcast %120 : vector<1x32xf32> to vector<16x32xf32>
    %122 = arith.addf %118, %121 : vector<16x32xf32>
    %c0_53 = arith.constant 0 : index
    %c0_54 = arith.constant 0 : index
    %c0_55 = arith.constant 0 : index
    %123 = vector.load %arg12[%c0_53, %c0_54, %c0_55] : memref<1x32x64xbf16, #tpu.memory_space<vmem>>, vector<1x32x64xbf16>
    %124 = vector.shape_cast %123 : vector<1x32x64xbf16> to vector<32x64xbf16>
    %cst_56 = arith.constant dense<0.000000e+00> : vector<32x64xf32>
    %125 = tpu.matmul %6, %124, %cst_56 {dimension_numbers = #tpu.dot_dimension_numbers<[1], [0], [0], [1], [0, 0, 1, 1], [], []>} : vector<32x32xbf16>, vector<32x64xbf16>, vector<32x64xf32> -> vector<32x64xf32>
    %c0_57 = arith.constant 0 : index
    %c0_58 = arith.constant 0 : index
    %c0_59 = arith.constant 0 : index
    %126 = vector.load %arg15[%c0_57, %c0_58, %c0_59] : memref<1x1x64xf32, #tpu.memory_space<vmem>>, vector<1x1x64xf32>
    %127 = vector.shape_cast %126 : vector<1x1x64xf32> to vector<1x64xf32>
    %128 = vector.broadcast %127 : vector<1x64xf32> to vector<32x64xf32>
    %129 = arith.addf %125, %128 : vector<32x64xf32>
    %130 = tpu.transpose %122, [1, 0] : vector<16x32xf32> -> vector<32x16xf32>
    %131 = vector.shape_cast %130 : vector<32x16xf32> to vector<4x8x16xf32>
    %132 = tpu.transpose %131, [0, 2, 1] : vector<4x8x16xf32> -> vector<4x16x8xf32>
    %133 = vector.shape_cast %132 : vector<4x16x8xf32> to vector<1x8x8x8xf32>
    %134 = vector.shape_cast %133 : vector<1x8x8x8xf32> to vector<8x8x8xf32>
    %135 = tpu.transpose %129, [1, 0] : vector<32x64xf32> -> vector<64x32xf32>
    %136 = vector.shape_cast %135 : vector<64x32xf32> to vector<8x8x32xf32>
    %137 = tpu.transpose %136, [0, 2, 1] : vector<8x8x32xf32> -> vector<8x32x8xf32>
    %138 = vector.shape_cast %137 : vector<8x32x8xf32> to vector<2x8x16x8xf32>
    %139 = vector.extract_strided_slice %138 {offsets = [0, 0, 0, 0], sizes = [1, 8, 16, 8], strides = [1, 1, 1, 1]} : vector<2x8x16x8xf32> to vector<1x8x16x8xf32>
    %140 = vector.shape_cast %139 : vector<1x8x16x8xf32> to vector<8x16x8xf32>
    %141 = vector.extract_strided_slice %138 {offsets = [1, 0, 0, 0], sizes = [1, 8, 16, 8], strides = [1, 1, 1, 1]} : vector<2x8x16x8xf32> to vector<1x8x16x8xf32>
    %142 = vector.shape_cast %141 : vector<1x8x16x8xf32> to vector<8x16x8xf32>
    %c0_60 = arith.constant 0 : index
    %c0_61 = arith.constant 0 : index
    %c0_62 = arith.constant 0 : index
    %143 = vector.load %arg13[%c0_60, %c0_61, %c0_62] : memref<1x32x32xbf16, #tpu.memory_space<vmem>>, vector<1x32x32xbf16>
    %144 = vector.shape_cast %143 : vector<1x32x32xbf16> to vector<32x32xbf16>
    %c0_63 = arith.constant 0 : index
    %c0_64 = arith.constant 0 : index
    %c0_65 = arith.constant 0 : index
    %145 = vector.load %arg16[%c0_63, %c0_64, %c0_65] : memref<1x1x32xf32, #tpu.memory_space<vmem>>, vector<1x1x32xf32>
    %146 = vector.shape_cast %145 : vector<1x1x32xf32> to vector<1x32xf32>
    %147 = arith.truncf %134 : vector<8x8x8xf32> to vector<8x8x8xbf16>
    %148 = arith.truncf %140 : vector<8x16x8xf32> to vector<8x16x8xbf16>
    "tpu.trace_start"() <{level = 10 : i32, message = "gqd,gkd->gqk"}> : () -> ()
    %cst_66 = arith.constant dense<0.000000e+00> : vector<8x8x16xf32>
    %149 = tpu.matmul %147, %148, %cst_66 {dimension_numbers = #tpu.dot_dimension_numbers<[2], [2], [1], [1], [0, 0, 0, 1, 1, 1], [0], [0]>} : vector<8x8x8xbf16>, vector<8x16x8xbf16>, vector<8x8x16xf32> -> vector<8x8x16xf32>
    "tpu.trace_stop"() : () -> ()
    %cst_67 = arith.constant 0.353553385 : f32
    %150 = vector.broadcast %cst_67 : f32 to vector<8x8x16xf32>
    %151 = arith.mulf %149, %150 : vector<8x8x16xf32>
    %152 = vector.shape_cast %151 : vector<8x8x16xf32> to vector<4x2x8x16xf32>
    %153 = vector.shape_cast %8 : vector<2x1x16xf32> to vector<1x2x1x16xf32>
    %154 = vector.broadcast %153 : vector<1x2x1x16xf32> to vector<4x2x8x16xf32>
    %155 = arith.addf %152, %154 : vector<4x2x8x16xf32>
    %cst_68 = arith.constant dense<0xFF800000> : vector<4x2x8xf32>
    %156 = vector.multi_reduction <maximumf>, %155, %cst_68 [3] : vector<4x2x8x16xf32> to vector<4x2x8xf32>
    %157 = vector.shape_cast %156 : vector<4x2x8xf32> to vector<4x2x8x1xf32>
    %158 = vector.broadcast %157 : vector<4x2x8x1xf32> to vector<4x2x8x16xf32>
    %159 = arith.subf %155, %158 : vector<4x2x8x16xf32>
    %160 = math.exp %159 : vector<4x2x8x16xf32>
    %cst_69 = arith.constant dense<0.000000e+00> : vector<4x2x8xf32>
    %161 = vector.multi_reduction <add>, %160, %cst_69 [3] : vector<4x2x8x16xf32> to vector<4x2x8xf32>
    %162 = vector.shape_cast %161 : vector<4x2x8xf32> to vector<4x2x8x1xf32>
    %163 = tpu.reciprocal %162 {approx = true} : vector<4x2x8x1xf32> -> vector<4x2x8x1xf32>
    %164 = vector.broadcast %163 : vector<4x2x8x1xf32> to vector<4x2x8x16xf32>
    %165 = arith.mulf %160, %164 : vector<4x2x8x16xf32>
    %166 = vector.shape_cast %165 : vector<4x2x8x16xf32> to vector<8x8x16xf32>
    %167 = arith.truncf %166 : vector<8x8x16xf32> to vector<8x8x16xbf16>
    %168 = arith.truncf %142 : vector<8x16x8xf32> to vector<8x16x8xbf16>
    "tpu.trace_start"() <{level = 10 : i32, message = "gqk,gkd->gqd"}> : () -> ()
    %cst_70 = arith.constant dense<0.000000e+00> : vector<8x8x8xf32>
    %169 = tpu.matmul %167, %168, %cst_70 {dimension_numbers = #tpu.dot_dimension_numbers<[2], [1], [1], [2], [0, 0, 0, 1, 1, 2], [0], [0]>} : vector<8x8x16xbf16>, vector<8x16x8xbf16>, vector<8x8x8xf32> -> vector<8x8x8xf32>
    "tpu.trace_stop"() : () -> ()
    %170 = vector.shape_cast %169 : vector<8x8x8xf32> to vector<4x16x8xf32>
    %171 = tpu.transpose %170, [0, 2, 1] : vector<4x16x8xf32> -> vector<4x8x16xf32>
    %172 = vector.shape_cast %171 : vector<4x8x16xf32> to vector<32x16xf32>
    %173 = tpu.transpose %172, [1, 0] : vector<32x16xf32> -> vector<16x32xf32>
    %174 = arith.truncf %173 : vector<16x32xf32> to vector<16x32xbf16>
    %cst_71 = arith.constant dense<0.000000e+00> : vector<16x32xf32>
    %175 = tpu.matmul %174, %144, %cst_71 {dimension_numbers = #tpu.dot_dimension_numbers<[1], [0], [0], [1], [0, 0, 1, 1], [], []>} : vector<16x32xbf16>, vector<32x32xbf16>, vector<16x32xf32> -> vector<16x32xf32>
    %176 = vector.broadcast %146 : vector<1x32xf32> to vector<16x32xf32>
    %177 = arith.addf %175, %176 : vector<16x32xf32>
    %178 = arith.addf %90, %177 : vector<16x32xf32>
    %179 = vector.extract_strided_slice %10 {offsets = [2, 0], sizes = [1, 32], strides = [1, 1]} : vector<3x32xf32> to vector<1x32xf32>
    %180 = vector.extract_strided_slice %12 {offsets = [2, 0], sizes = [1, 32], strides = [1, 1]} : vector<3x32xf32> to vector<1x32xf32>
    %cst_72 = arith.constant dense<0.000000e+00> : vector<16xf32>
    %181 = vector.multi_reduction <add>, %178, %cst_72 [1] : vector<16x32xf32> to vector<16xf32>
    %182 = vector.shape_cast %181 : vector<16xf32> to vector<16x1xf32>
    %cst_73 = arith.constant 3.200000e+01 : f32
    %183 = vector.broadcast %cst_73 : f32 to vector<16x1xf32>
    %184 = arith.divf %182, %183 : vector<16x1xf32>
    %185 = vector.broadcast %184 : vector<16x1xf32> to vector<16x32xf32>
    %186 = arith.subf %178, %185 : vector<16x32xf32>
    %187 = arith.mulf %186, %186 : vector<16x32xf32>
    %cst_74 = arith.constant dense<0.000000e+00> : vector<16xf32>
    %188 = vector.multi_reduction <add>, %187, %cst_74 [1] : vector<16x32xf32> to vector<16xf32>
    %189 = vector.shape_cast %188 : vector<16xf32> to vector<16x1xf32>
    %cst_75 = arith.constant 0.0322580636 : f32
    %190 = vector.broadcast %cst_75 : f32 to vector<16x1xf32>
    %191 = arith.mulf %189, %190 : vector<16x1xf32>
    %192 = vector.broadcast %184 : vector<16x1xf32> to vector<16x32xf32>
    %193 = arith.subf %178, %192 : vector<16x32xf32>
    %194 = vector.broadcast %179 : vector<1x32xf32> to vector<16x32xf32>
    %195 = arith.mulf %194, %193 : vector<16x32xf32>
    %196 = math.sqrt %191 : vector<16x1xf32>
    %cst_76 = arith.constant 9.99999997E-7 : f32
    %197 = vector.broadcast %cst_76 : f32 to vector<16x1xf32>
    %198 = arith.addf %196, %197 : vector<16x1xf32>
    %199 = vector.broadcast %198 : vector<16x1xf32> to vector<16x32xf32>
    %200 = arith.divf %195, %199 : vector<16x32xf32>
    %201 = vector.broadcast %180 : vector<1x32xf32> to vector<16x32xf32>
    %202 = arith.addf %200, %201 : vector<16x32xf32>
    %203 = arith.truncf %202 : vector<16x32xf32> to vector<16x32xbf16>
    %c0_77 = arith.constant 0 : index
    %c0_78 = arith.constant 0 : index
    %c0_79 = arith.constant 0 : index
    %204 = vector.load %arg17[%c0_77, %c0_78, %c0_79] : memref<1x32x64xbf16, #tpu.memory_space<vmem>>, vector<1x32x64xbf16>
    %205 = vector.shape_cast %204 : vector<1x32x64xbf16> to vector<32x64xbf16>
    %c0_80 = arith.constant 0 : index
    %c0_81 = arith.constant 0 : index
    %c0_82 = arith.constant 0 : index
    %206 = vector.load %arg18[%c0_80, %c0_81, %c0_82] : memref<1x1x64xf32, #tpu.memory_space<vmem>>, vector<1x1x64xf32>
    %207 = vector.shape_cast %206 : vector<1x1x64xf32> to vector<1x64xf32>
    %c0_83 = arith.constant 0 : index
    %c0_84 = arith.constant 0 : index
    %c0_85 = arith.constant 0 : index
    %208 = vector.load %arg19[%c0_83, %c0_84, %c0_85] : memref<1x64x32xbf16, #tpu.memory_space<vmem>>, vector<1x64x32xbf16>
    %209 = vector.shape_cast %208 : vector<1x64x32xbf16> to vector<64x32xbf16>
    %c0_86 = arith.constant 0 : index
    %c0_87 = arith.constant 0 : index
    %c0_88 = arith.constant 0 : index
    %210 = vector.load %arg20[%c0_86, %c0_87, %c0_88] : memref<1x1x32xf32, #tpu.memory_space<vmem>>, vector<1x1x32xf32>
    %211 = vector.shape_cast %210 : vector<1x1x32xf32> to vector<1x32xf32>
    %cst_89 = arith.constant dense<0.000000e+00> : vector<16x64xf32>
    %212 = tpu.matmul %203, %205, %cst_89 {dimension_numbers = #tpu.dot_dimension_numbers<[1], [0], [0], [1], [0, 0, 1, 1], [], []>} : vector<16x32xbf16>, vector<32x64xbf16>, vector<16x64xf32> -> vector<16x64xf32>
    %213 = vector.broadcast %207 : vector<1x64xf32> to vector<16x64xf32>
    %214 = arith.addf %212, %213 : vector<16x64xf32>
    %cst_90 = arith.constant 0.000000e+00 : f32
    %215 = vector.broadcast %cst_90 : f32 to vector<16x64xf32>
    %216 = arith.maximumf %214, %215 : vector<16x64xf32>
    %217 = arith.truncf %216 : vector<16x64xf32> to vector<16x64xbf16>
    %cst_91 = arith.constant dense<0.000000e+00> : vector<16x32xf32>
    %218 = tpu.matmul %217, %209, %cst_91 {dimension_numbers = #tpu.dot_dimension_numbers<[1], [0], [0], [1], [0, 0, 1, 1], [], []>} : vector<16x64xbf16>, vector<64x32xbf16>, vector<16x32xf32> -> vector<16x32xf32>
    %219 = arith.addf %178, %218 : vector<16x32xf32>
    %220 = vector.broadcast %211 : vector<1x32xf32> to vector<16x32xf32>
    %221 = arith.addf %219, %220 : vector<16x32xf32>
    %c1_i32 = arith.constant 1 : i32
    %222 = arith.cmpi slt, %arg0, %c1_i32 : i32
    %223 = arith.extui %222 : i1 to i32
    %c0_i32_92 = arith.constant 0 : i32
    %224 = arith.cmpi ne, %223, %c0_i32_92 : i32
    scf.if %224 {
      %228 = vector.shape_cast %221 : vector<16x32xf32> to vector<2x8x32xf32>
      %c0_95 = arith.constant 0 : index
      %c0_96 = arith.constant 0 : index
      %c0_97 = arith.constant 0 : index
      %229 = vector.load %arg23[%c0_95, %c0_96, %c0_97] : memref<2x8x32xf32, #tpu.memory_space<vmem>>, vector<2x8x32xf32>
      tpu.vector_store %arg23[%c0_95, %c0_96, %c0_97], %228 {strides = array<i32>} : memref<2x8x32xf32, #tpu.memory_space<vmem>>, vector<2x8x32xf32>,
    } else {
    }
    %c1_i32_93 = arith.constant 1 : i32
    %225 = arith.cmpi eq, %arg0, %c1_i32_93 : i32
    %226 = arith.extui %225 : i1 to i32
    %c0_i32_94 = arith.constant 0 : i32
    %227 = arith.cmpi ne, %226, %c0_i32_94 : i32
    scf.if %227 {
      %c0_95 = arith.constant 0 : index
      %c0_96 = arith.constant 0 : index
      %228 = vector.load %arg21[%c0_95, %c0_96] : memref<1x32xf32, #tpu.memory_space<vmem>>, vector<1x32xf32>
      %c0_97 = arith.constant 0 : index
      %c0_98 = arith.constant 0 : index
      %229 = vector.load %arg22[%c0_97, %c0_98] : memref<1x32xf32, #tpu.memory_space<vmem>>, vector<1x32xf32>
      %cst_99 = arith.constant dense<0.000000e+00> : vector<16xf32>
      %230 = vector.multi_reduction <add>, %221, %cst_99 [1] : vector<16x32xf32> to vector<16xf32>
      %231 = vector.shape_cast %230 : vector<16xf32> to vector<16x1xf32>
      %cst_100 = arith.constant 3.200000e+01 : f32
      %232 = vector.broadcast %cst_100 : f32 to vector<16x1xf32>
      %233 = arith.divf %231, %232 : vector<16x1xf32>
      %234 = vector.broadcast %233 : vector<16x1xf32> to vector<16x32xf32>
      %235 = arith.subf %221, %234 : vector<16x32xf32>
      %236 = arith.mulf %235, %235 : vector<16x32xf32>
      %cst_101 = arith.constant dense<0.000000e+00> : vector<16xf32>
      %237 = vector.multi_reduction <add>, %236, %cst_101 [1] : vector<16x32xf32> to vector<16xf32>
      %238 = vector.shape_cast %237 : vector<16xf32> to vector<16x1xf32>
      %cst_102 = arith.constant 0.0322580636 : f32
      %239 = vector.broadcast %cst_102 : f32 to vector<16x1xf32>
      %240 = arith.mulf %238, %239 : vector<16x1xf32>
      %241 = vector.broadcast %233 : vector<16x1xf32> to vector<16x32xf32>
      %242 = arith.subf %221, %241 : vector<16x32xf32>
      %243 = vector.broadcast %228 : vector<1x32xf32> to vector<16x32xf32>
      %244 = arith.mulf %243, %242 : vector<16x32xf32>
      %245 = math.sqrt %240 : vector<16x1xf32>
      %cst_103 = arith.constant 9.99999997E-7 : f32
      %246 = vector.broadcast %cst_103 : f32 to vector<16x1xf32>
      %247 = arith.addf %245, %246 : vector<16x1xf32>
      %248 = vector.broadcast %247 : vector<16x1xf32> to vector<16x32xf32>
      %249 = arith.divf %244, %248 : vector<16x32xf32>
      %250 = vector.broadcast %229 : vector<1x32xf32> to vector<16x32xf32>
      %251 = arith.addf %249, %250 : vector<16x32xf32>
      %252 = vector.shape_cast %251 : vector<16x32xf32> to vector<2x8x32xf32>
      %c0_104 = arith.constant 0 : index
      %c0_105 = arith.constant 0 : index
      %c0_106 = arith.constant 0 : index
      %253 = vector.load %arg23[%c0_104, %c0_105, %c0_106] : memref<2x8x32xf32, #tpu.memory_space<vmem>>, vector<2x8x32xf32>
      tpu.vector_store %arg23[%c0_104, %c0_105, %c0_106], %252 {strides = array<i32>} : memref<2x8x32xf32, #tpu.memory_space<vmem>>, vector<2x8x32xf32>,
    } else {
    }
    return
  }
  func.func @transform_0(%arg0: i32) -> (i32, i32, i32) {
    %c0_i32 = arith.constant 0 : i32
    %c0_i32_0 = arith.constant 0 : i32
    %c0_i32_1 = arith.constant 0 : i32
    %c0_i32_2 = arith.constant 0 : i32
    return %c0_i32, %c0_i32_0, %c0_i32_1 : i32, i32, i32
  }
  func.func @transform_1(%arg0: i32) -> (i32, i32, i32) {
    %c0_i32 = arith.constant 0 : i32
    %c0_i32_0 = arith.constant 0 : i32
    %c0_i32_1 = arith.constant 0 : i32
    %c0_i32_2 = arith.constant 0 : i32
    return %c0_i32, %c0_i32_0, %c0_i32_1 : i32, i32, i32
  }
  func.func @transform_2(%arg0: i32) -> (i32, i32, i32) {
    %c0_i32 = arith.constant 0 : i32
    %c0_i32_0 = arith.constant 0 : i32
    %c0_i32_1 = arith.constant 0 : i32
    %c0_i32_2 = arith.constant 0 : i32
    return %c0_i32, %c0_i32_0, %c0_i32_1 : i32, i32, i32
  }
  func.func @transform_3(%arg0: i32) -> (i32, i32, i32) {
    %c0_i32 = arith.constant 0 : i32
    %c0_i32_0 = arith.constant 0 : i32
    %c0_i32_1 = arith.constant 0 : i32
    %c0_i32_2 = arith.constant 0 : i32
    return %c0_i32, %c0_i32_0, %c0_i32_1 : i32, i32, i32
  }
  func.func @transform_4(%arg0: i32) -> (i32, i32, i32) {
    %c0_i32 = arith.constant 0 : i32
    %c0_i32_0 = arith.constant 0 : i32
    %c0_i32_1 = arith.constant 0 : i32
    return %arg0, %c0_i32, %c0_i32_0 : i32, i32, i32
  }
  func.func @transform_5(%arg0: i32) -> (i32, i32, i32) {
    %c0_i32 = arith.constant 0 : i32
    %c0_i32_0 = arith.constant 0 : i32
    %c0_i32_1 = arith.constant 0 : i32
    return %arg0, %c0_i32, %c0_i32_0 : i32, i32, i32
  }
  func.func @transform_6(%arg0: i32) -> (i32, i32, i32) {
    %c0_i32 = arith.constant 0 : i32
    %c0_i32_0 = arith.constant 0 : i32
    %c0_i32_1 = arith.constant 0 : i32
    return %arg0, %c0_i32, %c0_i32_0 : i32, i32, i32
  }
  func.func @transform_7(%arg0: i32) -> (i32, i32, i32) {
    %c0_i32 = arith.constant 0 : i32
    %c0_i32_0 = arith.constant 0 : i32
    %c0_i32_1 = arith.constant 0 : i32
    return %arg0, %c0_i32, %c0_i32_0 : i32, i32, i32
  }
  func.func @transform_8(%arg0: i32) -> (i32, i32, i32) {
    %c0_i32 = arith.constant 0 : i32
    %c0_i32_0 = arith.constant 0 : i32
    %c0_i32_1 = arith.constant 0 : i32
    return %arg0, %c0_i32, %c0_i32_0 : i32, i32, i32
  }
  func.func @transform_9(%arg0: i32) -> (i32, i32, i32) {
    %c0_i32 = arith.constant 0 : i32
    %c0_i32_0 = arith.constant 0 : i32
    %c0_i32_1 = arith.constant 0 : i32
    return %arg0, %c0_i32, %c0_i32_0 : i32, i32, i32
  }
  func.func @transform_10(%arg0: i32) -> (i32, i32, i32) {
    %c0_i32 = arith.constant 0 : i32
    %c0_i32_0 = arith.constant 0 : i32
    %c0_i32_1 = arith.constant 0 : i32
    return %arg0, %c0_i32, %c0_i32_0 : i32, i32, i32
  }
  func.func @transform_11(%arg0: i32) -> (i32, i32, i32) {
    %c0_i32 = arith.constant 0 : i32
    %c0_i32_0 = arith.constant 0 : i32
    %c0_i32_1 = arith.constant 0 : i32
    return %arg0, %c0_i32, %c0_i32_0 : i32, i32, i32
  }
  func.func @transform_12(%arg0: i32) -> (i32, i32, i32) {
    %c0_i32 = arith.constant 0 : i32
    %c0_i32_0 = arith.constant 0 : i32
    %c0_i32_1 = arith.constant 0 : i32
    return %arg0, %c0_i32, %c0_i32_0 : i32, i32, i32
  }
  func.func @transform_13(%arg0: i32) -> (i32, i32, i32) {
    %c0_i32 = arith.constant 0 : i32
    %c0_i32_0 = arith.constant 0 : i32
    %c0_i32_1 = arith.constant 0 : i32
    return %arg0, %c0_i32, %c0_i32_0 : i32, i32, i32
  }
  func.func @transform_14(%arg0: i32) -> (i32, i32, i32) {
    %c0_i32 = arith.constant 0 : i32
    %c0_i32_0 = arith.constant 0 : i32
    %c0_i32_1 = arith.constant 0 : i32
    return %arg0, %c0_i32, %c0_i32_0 : i32, i32, i32
  }
  func.func @transform_15(%arg0: i32) -> (i32, i32, i32) {
    %c0_i32 = arith.constant 0 : i32
    %c0_i32_0 = arith.constant 0 : i32
    %c0_i32_1 = arith.constant 0 : i32
    return %arg0, %c0_i32, %c0_i32_0 : i32, i32, i32
  }
  func.func @transform_16(%arg0: i32) -> (i32, i32, i32) {
    %c0_i32 = arith.constant 0 : i32
    %c0_i32_0 = arith.constant 0 : i32
    %c0_i32_1 = arith.constant 0 : i32
    return %arg0, %c0_i32, %c0_i32_0 : i32, i32, i32
  }
  func.func @transform_17(%arg0: i32) -> (i32, i32, i32) {
    %c0_i32 = arith.constant 0 : i32
    %c0_i32_0 = arith.constant 0 : i32
    %c0_i32_1 = arith.constant 0 : i32
    return %arg0, %c0_i32, %c0_i32_0 : i32, i32, i32
  }
  func.func @transform_18(%arg0: i32) -> (i32, i32, i32) {
    %c0_i32 = arith.constant 0 : i32
    %c0_i32_0 = arith.constant 0 : i32
    %c0_i32_1 = arith.constant 0 : i32
    return %arg0, %c0_i32, %c0_i32_0 : i32, i32, i32
  }
  func.func @transform_19(%arg0: i32) -> (i32, i32, i32) {
    %c0_i32 = arith.constant 0 : i32
    %c0_i32_0 = arith.constant 0 : i32
    %c0_i32_1 = arith.constant 0 : i32
    return %arg0, %c0_i32, %c0_i32_0 : i32, i32, i32
  }
  func.func @transform_20(%arg0: i32) -> (i32, i32) {
    %c0_i32 = arith.constant 0 : i32
    %c0_i32_0 = arith.constant 0 : i32
    %c0_i32_1 = arith.constant 0 : i32
    return %c0_i32, %c0_i32_0 : i32, i32
  }
  func.func @transform_21(%arg0: i32) -> (i32, i32) {
    %c0_i32 = arith.constant 0 : i32
    %c0_i32_0 = arith.constant 0 : i32
    %c0_i32_1 = arith.constant 0 : i32
    return %c0_i32, %c0_i32_0 : i32, i32
  }
  func.func @transform_22(%arg0: i32) -> (i32, i32, i32) {
    %c0_i32 = arith.constant 0 : i32
    %c0_i32_0 = arith.constant 0 : i32
    %c0_i32_1 = arith.constant 0 : i32
    %c0_i32_2 = arith.constant 0 : i32
    return %c0_i32, %c0_i32_0, %c0_i32_1 : i32, i32, i32
  }
}

</mosaic_0001>

<bundles_post_ra>
// kernel: tpu_custom_call.1
= control target key start
LH: loop header
LB: loop body
LE: loop exit
PB: predicated region body
PF: predicated region fallthrough
CT: control target
= control target key end

     0   :  { %s5931_s0 = inlined_call_operand.hbm [shape: f32[2,8,32], index: 0, kind: input, shape index: {}]   ;;  %s5932_s1 = inlined_call_operand.hbm [shape: bf16[2,16,32], index: 1, kind: input, shape index: {}]   ;;  %s5933_s2 = inlined_call_operand.hbm [shape: f32[2,8,8], index: 2, kind: input, shape index: {}]   ;;  %s5934_s3 = inlined_call_operand.vmem [shape: f32[2,1,16], index: 3, kind: input, shape index: {}]   ;;  %s5935_s4 = inlined_call_operand.vmem [shape: f32[2,3,32], index: 4, kind: input, shape index: {}]   ;;  %s5936_s5 = inlined_call_operand.vmem [shape: f32[2,3,32], index: 5, kind: input, shape index: {}]   ;;  %s5937_s6 = inlined_call_operand.vmem [shape: bf16[2,32,96], index: 6, kind: input, shape index: {}]   ;;  %s5938_s7 = inlined_call_operand.vmem [shape: bf16[2,32,32], index: 7, kind: input, shape index: {}]   ;;  %s5939_s8 = inlined_call_operand.vmem [shape: f32[2,1,96], index: 8, kind: input, shape index: {}]   ;;  %s5940_s9 = inlined_call_operand.vmem [shape: f32[2,1,32], index: 9, kind: input, shape index: {}]   ;;  %s5941_s10 = inlined_call_operand.vmem [shape: bf16[2,32,32], index: 10, kind: input, shape index: {}]   ;;  %s5942_s11 = inlined_call_operand.hbm [shape: bf16[2,32,64], index: 11, kind: input, shape index: {}]   ;;  %s5943_s12 = inlined_call_operand.hbm [shape: bf16[2,32,32], index: 12, kind: input, shape index: {}]   ;;  %s5944_s13 = inlined_call_operand.vmem [shape: f32[2,1,32], index: 13, kind: input, shape index: {}]   ;;  %s5945_s14 = inlined_call_operand.vmem [shape: f32[2,1,64], index: 14, kind: input, shape index: {}]   ;;  %s5946_s15 = inlined_call_operand.vmem [shape: f32[2,1,32], index: 15, kind: input, shape index: {}]   ;;  %s5947_s16 = inlined_call_operand.hbm [shape: bf16[2,32,64], index: 16, kind: input, shape index: {}]   ;;  %s5948_s17 = inlined_call_operand.hbm [shape: f32[2,1,64], index: 17, kind: input, shape index: {}]   ;;  %s5949_s18 = inlined_call_operand.vmem [shape: bf16[2,64,32], index: 18, kind: input, shape index: {}]   ;;  %s5950_s19 = inlined_call_operand.hbm [shape: f32[2,1,32], index: 19, kind: input, shape index: {}]   ;;  %s5951_s20 = inlined_call_operand.vmem [shape: f32[1,32], index: 20, kind: input, shape index: {}]   ;;  %s5952_s21 = inlined_call_operand.vmem [shape: f32[1,32], index: 21, kind: input, shape index: {}]   ;;  %s5953_s22 = inlined_call_operand.hbm [shape: f32[2,8,32], index: 22, kind: output, shape index: {}]  }
   0x1   :  { %5967 = sst [smem:[#allocation29_spill]] %s5931_s0 }
   0x2   :  { %5968 = sst [smem:[#allocation30_spill]] %s5932_s1 }
   0x3   :  { %5969 = sst [smem:[#allocation31_spill]] %s5933_s2 }
   0x4   :  { %5970 = sst [smem:[#allocation32_spill]] %s5934_s3 }
   0x5   :  { %5971 = sst [smem:[#allocation33_spill]] %s5935_s4 }
   0x6   :  { %5972 = sst [smem:[#allocation34_spill]] %s5936_s5 }
   0x7   :  { %5973 = sst [smem:[#allocation35_spill]] %s5937_s6 }
   0x8   :  { %5974 = sst [smem:[#allocation36_spill]] %s5938_s7 }
   0x9   :  { %5975 = sst [smem:[#allocation37_spill]] %s5939_s8 }
   0xa   :  { %5976 = sst [smem:[#allocation38_spill]] %s5940_s9 }
   0xb   :  { %5977 = sst [smem:[#allocation39_spill]] %s5941_s10 }
   0xc   :  { %5978 = sst [smem:[#allocation40_spill]] %s5942_s11 }
   0xd   :  { %5979 = sst [smem:[#allocation41_spill]] %s5943_s12 }
   0xe   :  { %5980 = sst [smem:[#allocation42_spill]] %s5944_s13 }
   0xf   :  { %5981 = sst [smem:[#allocation43_spill]] %s5945_s14 }
  0x10   :  { %5982 = sst [smem:[#allocation44_spill]] %s5946_s15 }
  0x11   :  { %5983 = sst [smem:[#allocation45_spill]] %s5947_s16 }
  0x12   :  { %5984 = sst [smem:[#allocation46_spill]] %s5948_s17 }
  0x13   :  { %5985 = sst [smem:[#allocation47_spill]] %s5949_s18 }
  0x14   :  { %5986 = sst [smem:[#allocation48_spill]] %s5951_s20 }
  0x15   :  { %5987 = sst [smem:[#allocation49_spill]] %s5952_s21 }
  0x16   :  { %5988 = sst [smem:[#allocation50_spill]] %s5953_s22 }
  0x17   :  { %27 = vsyncpa [#allocation3], 0 }
  0x18   :  { %28 = vsyncpa [#allocation6], 0 }
  0x19   :  { %29 = vsyncpa [#allocation9], 0 }
  0x1a   :  { %31 = vsyncpa [#allocation9 + $0x1], 0 }
  0x1b   :  { %32 = vsyncpa [#allocation12], 0 }
  0x1c   :  { %34 = vsyncpa [#allocation12 + $0x1], 0 }
  0x1d   :  { %35 = vsyncpa [#allocation15], 0 }
  0x1e   :  { %37 = vsyncpa [#allocation15 + $0x1], 0 }
  0x1f   :  { %38 = vsyncpa [#allocation4], 0  ;;  %s5262_s3 = smov 0   ;;  %s5264_s28 = smov 0  }
  0x20   :  { %s5266_s29 = smov 0   ;;  %s5268_s30 = smov 0  }
  0x21 LB: > { %5989 = sst [smem:[#allocation23_spill]] %s5126_s28  ;;  %s5281_s4 = sadd.s32 4294967295, %s5134_s30   ;;  %s5134_s30 = sphi %s5268_s30, %s6047_s30   ;;  %s5130_s29 = sphi %s5266_s29, %s6050_s29   ;;  %s5126_s28 = sphi %s5264_s28, %s6049_s28   ;;  %s5122_s3 = sphi %s5262_s3, %s6048_s3  }
  0x22   : > { %5990 = sst [smem:[#allocation24_spill]] %s5130_s29  ;;  %p330_p0 = scmp.ne.s32.totalorder %s5126_s28, %s5122_s3 }
  0x23   : > { %5991 = sst [smem:[#allocation25_spill]] %s5281_s4  ;;  %p331_p1 = scmp.eq.s32.totalorder %s5281_s4, 0 }
  0x24   : > { %p4201_p2 = scmp.ge.s32.totalorder %s5134_s30, 1  ;;  %p612_p3 = scmp.lt.s32.totalorder %s5134_s30, 3 }
  0x25   : > { %p4202_p4 = scmp.ne.s32.totalorder %s5281_s4, 0  ;;  %p5290_p5 = por %p331_p1, %p330_p0 }
  0x26   : > { %s5994_s5 = sld [smem:[#allocation30_spill]]  ;;  %p5297_p6 = pnand %p4201_p2, %p612_p3 }
  0x27   : > { %s5992_s0 = scalar_select %p5290_p5, 1, 0 }
  0x28   : > { %p4402_p7 = pneg %p5297_p6  ;;  %s5136_s25 = smov [#allocation5]  }
  0x29   : > { %5993 = sst [smem:[#allocation26_spill]] %s5992_s0  ;;  %s639_s26 = sshll.u32 %s5136_s25, 4  ;;  %s640_s26 = int_to_ptr.vmem [resolvable:$true] %s639_s26 }
  0x2a   : > { %p5305_p8 = pnand %p4402_p7, %p331_p1  ;;  %s5310_s27 = sadd.s32 1, %s5134_s30  }
  0x2b   : > { %5997 = sst [smem:[#allocation27_spill]] %s5310_s27  ;;  %s5955_s3 = smov 64  }
  0x2c   : > { %s637_s24 = sshll.u32 %s5994_s5, 4  ;;  %s5957_s23 = smov 4   ;;  %s638_s24 = int_to_ptr.hbm [resolvable:$true] %s637_s24 }
  0x2d   : > { %4408 = dma.hbm_to_vmem [thread:$0]  (!%p5305_p8), %s638_s24, 256, %s640_s26, [#allocation6], %s5955_s3, %s5955_s3, %s5957_s23  }
  0x2e   : > { %s314_s1 = ssub.s32 %s5134_s30, %s5310_s27  ;;  %s317_s5 = sadd.s32 1, %s5130_s29 }
  0x2f   : > { %p315_p9 = scmp.eq.s32.totalorder %s314_s1, 0  ;;  %p324_p10 = scmp.ne.s32.totalorder %s5130_s29, %s5126_s28 }
  0x30   : > { %p325_p11 = scmp.eq.s32.totalorder %s5134_s30, 0  ;;  %p4431_p12 = scmp.lt.s32.totalorder %s5134_s30, 2 }
  0x31   : > { %s5325_s25 = scalar_select %p315_p9, %s5130_s29, %s317_s5  }
  0x32   : > { %p326_p13 = por %p325_p11, %p324_p10  ;;  %s5329_s21 = sand.u32 1, %s5130_s29  }
  0x33   : > { %5998 = sst [smem:[#allocation28_spill]] %s5325_s25  ;;  %s5332_s20 = sshll.u32 %s5329_s21, 4 }
  0x34   : > { %s5335_s18 = sshll.u32 %s5134_s30, 4  ;;  %s5999_s11 = sld [smem:[#allocation40_spill]] }
  0x35   : > { %s730_s23 = scalar_lea.vmem [#allocation8], %s5332_s20  ;;  %p5344_p0 = pnand %p4431_p12, %p326_p13 }
  0x36   : > { %s738_s5 = sshll.u32 %s730_s23, 4  ;;  %s6001_s16 = sld [smem:[#allocation45_spill]]  ;;  %s739_s5 = int_to_ptr.vmem [resolvable:$true] %s738_s5 }
  0x37   : > { %s6002_s24 = sand.u32 1, %s5134_s30   ;;  %p5360_p3 = pneg %p5344_p0 }
  0x38   : > { %s5356_s26 = scalar_lea.sflag [#allocation9], %s6002_s24 }
  0x3a   : > { %s735_s1 = scalar_lea.hbm %s5999_s11, %s5335_s18 }
  0x3b   : > { %s736_s3 = sshll.u32 %s735_s1, 4  ;;  %s737_s3 = int_to_ptr.hbm [resolvable:$true] %s736_s3 }
  0x3c   : > { %s797_s27 = scalar_lea.hbm %s6001_s16, %s5335_s18  ;;  %s4842_s1 = sshra.s32 %s737_s3, 4  ;;  %s4843_s1 = int_to_ptr.hbm [resolvable:$true] %s4842_s1 }
  0x3d   : > { %s5352_s15 = sshll.u32 %s797_s27, 4  ;;  %s4844_s23 = scalar_lea.hbm %s4843_s1, 16  ;;  %s799_s15 = int_to_ptr.hbm [resolvable:$true] %s5352_s15 }
  0x3e   : > { %p4845_p2 = scmp.ne.s32.totalorder %s4843_s1, %s4844_s23  ;;  %s4849_s27 = scalar_lea.hbm %s5999_s11, 32 }
  0x3f   : > { %p4850_p10 = scmp.lt.s32.totalorder %s4843_s1, %s5999_s11  ;;  %p4851_p11 = scmp.lt.s32.totalorder %s4849_s27, %s4844_s23 }
  0x40   : > { %p4847_p7 = pnand %p5360_p3, %p4845_p2 }
  0x41   : > { %p4852_p12 = por %p4851_p11, %p4850_p10 }
  0x42   : > { %p4848_p9 = pneg %p4847_p7 }
  0x44   : > { %p4853_p13 = pnand %p4852_p12, %p4848_p9 }
  0x46   : > { %4856 = shalt.err (!%p4853_p13)
}
  0x47   : > { %s6004_s10 = smov 4   ;;  %s6005_s9 = smov 64  }
  0x48   : > { %4415 = dma.hbm_to_vmem [thread:$0]  (!%p5344_p0), %s737_s3, 256, %s739_s5, %s5356_s26, %s6005_s9, %s6005_s9, %s6004_s10  }
  0x49   : > { %s792_s29 = scalar_lea.vmem [#allocation11], %s5332_s20  ;;  %s6006_s23 = sld [smem:[#allocation29_spill]] }
  0x4a   : > { %s800_s25 = sshll.u32 %s792_s29, 4  ;;  %s6007_s24 = sand.u32 1, %s5134_s30   ;;  %s801_s25 = int_to_ptr.vmem [resolvable:$true] %s800_s25 }
  0x4b   : > { %s5385_s11 = scalar_lea.sflag [#allocation12], %s6007_s24  ;;  %s4872_s8 = sshra.s32 %s799_s15, 4  ;;  %s4873_s8 = int_to_ptr.hbm [resolvable:$true] %s4872_s8 }
  0x4c   : > { %s4874_s7 = scalar_lea.hbm %s4873_s8, 16  ;;  %s4879_s5 = scalar_lea.hbm %s6001_s16, 32 }
  0x4d   : > { %p4875_p2 = scmp.ne.s32.totalorder %s4873_s8, %s4874_s7  ;;  %p4880_p10 = scmp.lt.s32.totalorder %s4873_s8, %s6001_s16 }
  0x4e   : > { %p4881_p11 = scmp.lt.s32.totalorder %s4879_s5, %s4874_s7 }
  0x4f   : > { %s623_s27 = sshll.u32 %s6006_s23, 4  ;;  %p4877_p7 = pnand %p4875_p2, %p5360_p3  ;;  %s624_s27 = int_to_ptr.hbm [resolvable:$true] %s623_s27 }
  0x50   : > { %p4882_p12 = por %p4881_p11, %p4880_p10 }
  0x51   : > { %p4878_p9 = pneg %p4877_p7 }
  0x53   : > { %p4883_p13 = pnand %p4882_p12, %p4878_p9 }
  0x55   : > { %4886 = shalt.err (!%p4883_p13)
}
  0x56   : > { %4421 = dma.hbm_to_vmem [thread:$0]  (!%p5344_p0), %s799_s15, 256, %s801_s25, %s5385_s11, %s6005_s9, %s6005_s9, %s6004_s10  }
  0x57   : > { %s5139_s0 = smov [#allocation2]   ;;  %s5140_s8 = smov 128  }
  0x58   : > { %s625_s13 = sshll.u32 %s5139_s0, 4  ;;  %s5141_s7 = smov 8   ;;  %s626_s13 = int_to_ptr.vmem [resolvable:$true] %s625_s13 }
  0x59   : > { %4405 = dma.hbm_to_vmem [thread:$0]  (!%p5305_p8), %s624_s27, 256, %s626_s13, [#allocation3], %s5140_s8, %s5140_s8, %s5141_s7  }
  0x5a   : > { %s6008_s23 = sld [smem:[#allocation31_spill]]  ;;  %s5142_s3 = smov [#allocation7]  }
  0x5b   : > { %s653_s5 = sshll.u32 %s5142_s3, 4  ;;  %s6009_s12 = sld [smem:[#allocation41_spill]]  ;;  %s654_s5 = int_to_ptr.vmem [resolvable:$true] %s653_s5 }
  0x5c   : > { %s752_s0 = scalar_lea.vmem [#allocation10], %s5332_s20 }
  0x5d   : > { %s760_s16 = sshll.u32 %s752_s0, 4  ;;  %s761_s16 = int_to_ptr.vmem [resolvable:$true] %s760_s16 }
  0x60   : > { %s651_s24 = sshll.u32 %s6008_s23, 4  ;;  %s652_s24 = int_to_ptr.hbm [resolvable:$true] %s651_s24 }
  0x61   : > { %4411 = dma.hbm_to_vmem [thread:$0]  (!%p5305_p8), %s652_s24, 256, %s654_s5, [#allocation6], %s5140_s8, %s5140_s8, %s5141_s7  }
  0x62   : > { %s757_s29 = scalar_lea.hbm %s6009_s12, %s5335_s18  ;;  %s4969_s2 = scalar_lea.hbm %s6009_s12, 32 }
  0x63   : > { %s758_s4 = sshll.u32 %s757_s29, 4  ;;  %s759_s4 = int_to_ptr.hbm [resolvable:$true] %s758_s4 }
  0x64   : > { %s4962_s27 = sshra.s32 %s759_s4, 4  ;;  %s4963_s27 = int_to_ptr.hbm [resolvable:$true] %s4962_s27 }
  0x65   : > { %s4964_s13 = scalar_lea.hbm %s4963_s27, 16  ;;  %p4970_p8 = scmp.lt.s32.totalorder %s4963_s27, %s6009_s12 }
  0x66   : > { %p4965_p2 = scmp.ne.s32.totalorder %s4963_s27, %s4964_s13  ;;  %p4971_p10 = scmp.lt.s32.totalorder %s4969_s2, %s4964_s13 }
  0x68   : > { %p4967_p7 = pnand %p4965_p2, %p5360_p3  ;;  %p4972_p11 = por %p4971_p10, %p4970_p8 }
  0x6a   : > { %p4968_p9 = pneg %p4967_p7 }
  0x6c   : > { %p4973_p12 = pnand %p4972_p11, %p4968_p9 }
  0x6e   : > { %4976 = shalt.err (!%p4973_p12)
}
  0x6f   : > { %4418 = dma.hbm_to_vmem [thread:$0]  (!%p5344_p0), %s759_s4, 256, %s761_s16, %s5356_s26, %s6005_s9, %s6005_s9, %s6004_s10  }
  0x70   : > { %s6010_s17 = sld [smem:[#allocation46_spill]]  ;;  %s813_s24 = scalar_lea.vmem [#allocation13], %s5329_s21 }
  0x71   : > { %s820_s3 = sshll.u32 %s813_s24, 4  ;;  %s821_s3 = int_to_ptr.vmem [resolvable:$true] %s820_s3 }
  0x76   : > { %s816_s23 = scalar_lea.hbm %s6010_s17, %s5134_s30  ;;  %s4999_s9 = scalar_lea.hbm %s6010_s17, 2 }
  0x77   : > { %s818_s5 = sshll.u32 %s816_s23, 4  ;;  %s819_s5 = int_to_ptr.hbm [resolvable:$true] %s818_s5 }
  0x78   : > { %s4992_s15 = sshra.s32 %s819_s5, 4  ;;  %s4993_s15 = int_to_ptr.hbm [resolvable:$true] %s4992_s15 }
  0x79   : > { %s4994_s25 = scalar_lea.hbm %s4993_s15, 1  ;;  %p5000_p9 = scmp.lt.s32.totalorder %s4993_s15, %s6010_s17 }
  0x7a   : > { %p4995_p13 = scmp.ne.s32.totalorder %s4993_s15, %s4994_s25  ;;  %p5001_p8 = scmp.lt.s32.totalorder %s4999_s9, %s4994_s25 }
  0x7c   : > { %p4997_p2 = pnand %p4995_p13, %p5360_p3  ;;  %p5002_p10 = por %p5001_p8, %p5000_p9 }
  0x7e   : > { %p4998_p7 = pneg %p4997_p2 }
  0x80   : > { %p5003_p11 = pnand %p5002_p10, %p4998_p7 }
  0x82   : > { %5006 = shalt.err (!%p5003_p11)
}
  0x83   : > { %4424 = dma.hbm_to_vmem [thread:$0]  (!%p5344_p0), %s819_s5, 16, %s821_s3, %s5385_s11  }
  0x84   : > { %s841_s27 = scalar_lea.hbm %s5950_s19, %s5134_s30  ;;  %s838_s28 = scalar_lea.vmem [#allocation14], %s5329_s21 }
  0x85   : > { %s843_s13 = sshll.u32 %s841_s27, 4  ;;  %s845_s1 = sshll.u32 %s838_s28, 4  ;;  %s844_s13 = int_to_ptr.hbm [resolvable:$true] %s843_s13  ;;  %s846_s1 = int_to_ptr.vmem [resolvable:$true] %s845_s1 }
  0x86   : > { %s836_s2 = scalar_lea.sflag [#allocation15], %s5329_s21  ;;  %s5022_s8 = sshra.s32 %s844_s13, 4  ;;  %s5023_s8 = int_to_ptr.hbm [resolvable:$true] %s5022_s8 }
  0x87   : > { %s5024_s7 = scalar_lea.hbm %s5023_s8, 1  ;;  %s5029_s11 = scalar_lea.hbm %s5950_s19, 2 }
  0x88   : > { %p5025_p12 = scmp.ne.s32.totalorder %s5023_s8, %s5024_s7  ;;  %p5030_p7 = scmp.lt.s32.totalorder %s5023_s8, %s5950_s19 }
  0x89   : > { %p5031_p9 = scmp.lt.s32.totalorder %s5029_s11, %s5024_s7 }
  0x8a   : > { %p5027_p13 = pnand %p5025_p12, %p5360_p3 }
  0x8b   : > { %p5032_p8 = por %p5031_p9, %p5030_p7 }
  0x8c   : > { %p5028_p2 = pneg %p5027_p13 }
  0x8e   : > { %p5033_p10 = pnand %p5032_p8, %p5028_p2 }
  0x90   : > { %5036 = shalt.err (!%p5033_p10)
}
  0x91   : > { %4427 = dma.hbm_to_vmem [thread:$0]  (!%p5344_p0), %s844_s13, 16, %s846_s1, %s836_s2  }
  0x92   : > { %854 = sbr.rel (%p5297_p6) target bundleno = 4854 (0x12f6), region = 108  ;;  %s6011_s14 = sld [smem:[#allocation25_spill]] (!%p5297_p6) }
  0x97   : > { %5097 = dma.done.wait (%p331_p1), [#allocation3], 256  }
  0x98   : > { %5099 = vsyncadd (%p331_p1), [#allocation3], 4294967040 }
  0x99   : > { %5101 = dma.done.wait (%p331_p1), [#allocation6], 512  }
  0x9a   : > { %5103 = vsyncadd (%p331_p1), [#allocation6], 4294966784  ;;  %s6012_s21 = sld [smem:[#allocation23_spill]]  ;;  %s871_s22 = sand.u32 1, %s6011_s14  }
  0x9b   : > { %s872_s5 = scalar_lea.sflag [#allocation9], %s871_s22 }
  0xa0   : > { %s5471_s3 = sand.u32 1, %s6012_s21  }
  0xa1   : > { %s5474_s6 = sshll.u32 %s5471_s3, 4 }
  0xa2   : > { %5105 = dma.done.wait (%p5290_p5), %s872_s5, 512  }
  0xa3   : > { %5107 = vsyncadd (%p5290_p5), %s872_s5, 4294966784  ;;  %s892_s29 = scalar_lea.sflag [#allocation12], %s871_s22 }
  0xa4   : > { %5109 = dma.done.wait (%p5290_p5), %s892_s29, 272  }
  0xa5   : > { %5111 = vsyncadd (%p5290_p5), %s892_s29, 4294967024  ;;  %s911_s10 = scalar_lea.sflag [#allocation15], %s5471_s3 }
  0xa6   : > { %5113 = dma.done.wait (%p5290_p5), %s911_s10, 16  }
  0xa7   : > { %5115 = vsyncadd (%p5290_p5), %s911_s10, 4294967280  ;;  %p1031_p1 = scmp.lt.s32.totalorder %s6011_s14, 1  ;;  %s6014_s1 = sld [smem:[#allocation33_spill]] }
  0xa8   : > { %s6015_s18 = sld [smem:[#allocation34_spill]] }
  0xa9   : > { %s5496_s4 = scalar_select %p1031_p1, %s6011_s14, 1 }
  0xaa   : > { %s6016_s24 = sld [smem:[#allocation35_spill]] }
  0xab   : > { %s4222_s26 = sshll.u32 %s5496_s4, 2  ;;  %s4354_s27 = sshll.u32 %s5496_s4, 4 }
  0xac   : > { %s6017_s5 = sld [smem:[#allocation36_spill]]  ;;  %s4357_s28 = sshll.u32 %s5496_s4, 5 }
  0xad   : > { %s5503_s2 = scalar_lea.vmem %s6014_s1, %s4222_s26  ;;  %s6023_s10 = sld [smem:[#allocation44_spill]] }
  0xae   : > { %s5508_s20 = scalar_lea.vmem %s6015_s18, %s4222_s26  ;;  %s6020_s18 = sld [smem:[#allocation39_spill]] }
  0xaf   : > { %s6024_s1 = sld [smem:[#allocation47_spill]] }
  0xb0   : > { %s5513_s21 = scalar_lea.vmem %s6016_s24, %s4354_s27  ;;  %s6021_s24 = sld [smem:[#allocation42_spill]] }
  0xb2   : > { %s5518_s29 = scalar_lea.vmem %s6017_s5, %s4354_s27  ;;  %s6022_s5 = sld [smem:[#allocation43_spill]] }
  0xb3   : > { %s1068_s13 = scalar_lea.vmem %s6023_s10, %s5496_s4 }
  0xb4   : > { %s5531_s25 = scalar_lea.vmem %s6020_s18, %s4354_s27  ;;  %1078 = sbr.rel (%p4202_p4) target bundleno = 188 (0xbc), region = 144 }
  0xb5   : > { %s5549_s8 = scalar_lea.vmem %s6024_s1, %s4357_s28 }
  0xb6   : > { %s1062_s15 = scalar_lea.vmem %s6021_s24, %s5496_s4 }
  0xb8   : > { %s1065_s12 = scalar_lea.vmem %s6022_s5, %s5496_s4 }
  0xb9   : > { %v1079_v0 = vld [vmem:[#allocation2] sm:$0xff]  ;;  %vm1081_vm0 = vcmask 261120   ;;  %v1080_v1 = vld [vmem:[#allocation2 + $0x8] sm:$0xff] }
  0xba   : > { %1082 = vst.msk [vmem:[#allocation16] sm:$0xff] %vm1081_vm0, %v1079_v0 }
  0xbb   : > { %1083 = vst.msk [vmem:[#allocation16 + $0x8] sm:$0xff] %vm1081_vm0, %v1080_v1 }
  0xbc PF: > { %vm1096_vm1 = vcmask 261120   ;;  %v5143_v6 = vmov 32.0   ;;  %v4361_v23 = vld [vmem:[%s5513_s21 + $0x8] sm:$0xff]  ;;  %v4360_v25 = vld [vmem:[%s5513_s21] sm:$0xff]  ;;  %s6025_s27 = sld [smem:[#allocation37_spill]]  ;;  %vm1661_vm15 = vcmask 64512  }
  0xbd   : > { %4710 = vrcp.f32 %v5143_v6  ;;  %1216 = vmatpush.bf16.msra.mxu0 %v4361_v23  ;;  %v5580_v57 = vld [vmem:[%s5503_s2] sm:$0x7]  ;;  %vm1937_vm0 = vcmask 1043456   ;;  %s6027_s7 = sld [smem:[#allocation38_spill]]  ;;  %s6034_s0 = scalar_lea.vmem [#allocation10], %s5474_s6 }
  0xbe   : > { %v1124_v61 = vperm.slane %v5580_v57, 0  ;;  %v5584_v6 = vld [vmem:[%s5508_s20] sm:$0x7]  ;;  %s6033_s16 = sld [smem:[#allocation32_spill]]  ;;  %s6035_s1 = smov %s6034_s0 }
  0xc1   : > { %v5553_v2 = vld [vmem:[#allocation16] sm:$0xff]  ;;  %1217 = vmatpush.bf16.msra.mxu0 %v4360_v25 }
  0xc2   : > { %v1097_v3 = vsel %vm1096_vm1, %v5553_v2, 0.0  ;;  %v5557_v4 = vld [vmem:[#allocation16 + $0x8] sm:$0xff]  ;;  %s6026_s21 = scalar_lea.vmem %s6025_s27, %s5496_s4 }
  0xc3   : > { %1098 = vadd.xlane.f32.xlu0 %v1097_v3  ;;  %v1100_v5 = vsel %vm1096_vm1, %v5557_v4, 0.0  ;;  %v4711_v7 = vpop.eup %4710  ;;  %s6028_s18 = scalar_lea.vmem %s6027_s7, %s5496_s4  ;;  %s6037_s4 = scalar_lea.vmem [#allocation11], %s5474_s6 }
  0xc4   : > { %v1104_v8 = vmul.f32 32.0, %v4711_v7  ;;  %vm1108_vm2 = vweird.f32 %v4711_v7 }
  0xc6   : > { %v1105_v9 = vsub.f32 1.0, %v1104_v8 }
  0xc8   : > { %v1106_v10 = vmul.f32 %v4711_v7, %v1105_v9 }
  0xca   : > { %v1107_v11 = vadd.f32 %v4711_v7, %v1106_v10 }
  0xcb   : > { %1101 = vadd.xlane.f32.xlu0 %v1100_v5 }
  0xcc   : > { %v5561_v12 = vsel %vm1108_vm2, %v4711_v7, %v1107_v11 }
 0x136   : > { %v1099_v13 = vpop.xlane.xlu0 %1098 }
 0x137   : > { %v1110_v14 = vmul.f32 %v5561_v12, %v1099_v13 }
 0x139   : > { %v5565_v15 = vsub.f32 %v5553_v2, %v1110_v14 }
 0x13b   : > { %v1114_v16 = vmul.f32 %v5565_v15, %v5565_v15  ;;  %v1125_v8 = vmul.f32 %v1124_v61, %v5565_v15  ;;  %v4701_v15 = vld [vmem:[%s6026_s21] ss:$0 sm:$0xff] }
 0x13d   : > { %v1116_v17 = vsel %vm1096_vm1, %v1114_v16, 0.0  ;;  %v1183_v16 = vperm.slane %v5584_v6, 0 }
 0x13e   : > { %1117 = vadd.xlane.f32.xlu1 %v1116_v17  ;;  %v1102_v18 = vpop.xlane.xlu0 %1101 }
 0x13f   : > { %v1111_v19 = vmul.f32 %v5561_v12, %v1102_v18 }
 0x141   : > { %v5572_v20 = vsub.f32 %v5557_v4, %v1111_v19 }
 0x143   : > { %v1115_v21 = vmul.f32 %v5572_v20, %v5572_v20  ;;  %v1126_v10 = vmul.f32 %v1124_v61, %v5572_v20 }
 0x145   : > { %v1119_v22 = vsel %vm1096_vm1, %v1115_v21, 0.0 }
 0x146   : > { %1120 = vadd.xlane.f32.xlu1 %v1119_v22 }
 0x1b1   : > { %v1118_v24 = vpop.xlane.xlu1 %1117 }
 0x1b2   : > { %v1122_v26 = vmul.f32 0.032258064, %v1118_v24 }
 0x1b4   : > { %4712 = vrsqrt.f32 %v1122_v26  ;;  %vm1134_vm3 = vcmp.eq.f32.partialorder %v1122_v26, inf  ;;  %v1137_v39 = vand.u32 2147483648, %v1122_v26  ;;  %vm1136_vm4 = vcmp.eq.f32.partialorder %v1122_v26, 0.0 }
 0x1b9   : > { %v1121_v27 = vpop.xlane.xlu1 %1120 }
 0x1ba   : > { %v4713_v28 = vpop.eup %4712  ;;  %v1123_v29 = vmul.f32 0.032258064, %v1121_v27 }
 0x1bb   : > { %v1128_v30 = vmul.f32 %v4713_v28, %v1122_v26 }
 0x1bc   : > { %4714 = vrsqrt.f32 %v1123_v29  ;;  %vm1146_vm5 = vcmp.eq.f32.partialorder %v1123_v29, inf  ;;  %v1149_v47 = vand.u32 2147483648, %v1123_v29  ;;  %vm1148_vm6 = vcmp.eq.f32.partialorder %v1123_v29, 0.0 }
 0x1bd   : > { %v1129_v31 = vmul.f32 %v4713_v28, %v1128_v30 }
 0x1bf   : > { %v1130_v32 = vmul.f32 0.5, %v1129_v31 }
 0x1c1   : > { %v1131_v33 = vsub.f32 1.5, %v1130_v32 }
 0x1c2   : > { %v4715_v34 = vpop.eup %4714 }
 0x1c3   : > { %v1132_v35 = vmul.f32 %v4713_v28, %v1131_v33  ;;  %v1140_v36 = vmul.f32 %v4715_v34, %v1123_v29 }
 0x1c5   : > { %v1133_v37 = vmul.f32 %v1132_v35, %v1122_v26  ;;  %v1141_v38 = vmul.f32 %v4715_v34, %v1140_v36 }
 0x1c7   : > { %v1135_v40 = vsel %vm1134_vm3, %v1122_v26, %v1133_v37  ;;  %v1142_v41 = vmul.f32 0.5, %v1141_v38 }
 0x1c8   : > { %v1138_v42 = vsel %vm1136_vm4, %v1137_v39, %v1135_v40 }
 0x1c9   : > { %v1143_v43 = vsub.f32 1.5, %v1142_v41  ;;  %v1151_v44 = vadd.f32 1e-06, %v1138_v42 }
 0x1cb   : > { %v1144_v45 = vmul.f32 %v4715_v34, %v1143_v43  ;;  %4716 = vrcp.f32 %v1151_v44  ;;  %v1164_v58 = vand.u32 2147483648, %v1151_v44  ;;  %vm1158_vm8 = vweird.f32 %v1151_v44 }
 0x1cc   : > { %v1162_v59 = vand.u32 2147483647, %v1151_v44 }
 0x1cd   : > { %v1145_v46 = vmul.f32 %v1144_v45, %v1123_v29  ;;  %v1165_v0 = vor.u32 1.1754944e-38, %v1164_v58 }
 0x1ce   : > { %vm1163_vm10 = vcmp.eq.f32.partialorder %v1162_v59, 8.507059e+37 }
 0x1cf   : > { %v1147_v48 = vsel %vm1146_vm5, %v1123_v29, %v1145_v46 }
 0x1d0   : > { %v1150_v49 = vsel %vm1148_vm6, %v1149_v47, %v1147_v48 }
 0x1d1   : > { %v4717_v50 = vpop.eup %4716  ;;  %v1152_v51 = vadd.f32 1e-06, %v1150_v49 }
 0x1d2   : > { %v1154_v52 = vmul.f32 %v4717_v50, %v1151_v44  ;;  %vm1159_vm7 = vweird.f32 %v4717_v50 }
 0x1d3   : > { %4718 = vrcp.f32 %v1152_v51  ;;  %vm1160_vm9 = vmor %vm1158_vm8, %vm1159_vm7  ;;  %v1179_v1 = vand.u32 2147483648, %v1152_v51  ;;  %v1177_v5 = vand.u32 2147483647, %v1152_v51  ;;  %vm1173_vm12 = vweird.f32 %v1152_v51 }
 0x1d4   : > { %v1155_v53 = vsub.f32 1.0, %v1154_v52 }
 0x1d5   : > { %v1180_v11 = vor.u32 1.1754944e-38, %v1179_v1  ;;  %vm1178_vm14 = vcmp.eq.f32.partialorder %v1177_v5, 8.507059e+37 }
 0x1d6   : > { %v1156_v54 = vmul.f32 %v4717_v50, %v1155_v53 }
 0x1d8   : > { %v1157_v55 = vadd.f32 %v4717_v50, %v1156_v54 }
 0x1d9   : > { %v4719_v56 = vpop.eup %4718 }
 0x1da   : > { %v1169_v60 = vmul.f32 %v4719_v56, %v1152_v51  ;;  %v1161_v62 = vsel %vm1160_vm9, %v4717_v50, %v1157_v55  ;;  %vm1174_vm11 = vweird.f32 %v4719_v56 }
 0x1db   : > { %v1166_v7 = vsel %vm1163_vm10, %v1165_v0, %v1161_v62  ;;  %vm1175_vm13 = vmor %vm1173_vm12, %vm1174_vm11 }
 0x1dc   : > { %v1170_v63 = vsub.f32 1.0, %v1169_v60  ;;  %v1167_v13 = vmul.f32 %v1166_v7, %v1125_v8 }
 0x1de   : > { %v1171_v3 = vmul.f32 %v4719_v56, %v1170_v63  ;;  %v1184_v19 = vadd.f32 %v1183_v16, %v1167_v13 }
 0x1e0   : > { %v1172_v9 = vadd.f32 %v4719_v56, %v1171_v3 }
 0x1e2   : > { %v1176_v14 = vsel %vm1175_vm13, %v4719_v56, %v1172_v9 }
 0x1e3   : > { %v1181_v17 = vsel %vm1178_vm14, %v1180_v11, %v1176_v14  ;;  %vm3148_vm14 = vcmask 130048  }
 0x1e4   : > { %v1182_v18 = vmul.f32 %v1181_v17, %v1126_v10 }
 0x1e6   : > { %v1185_v21 = vadd.f32 %v1183_v16, %v1182_v18 }
 0x1e8   : > { %v1186_v22 = vpack.c.bf16 %v1185_v21, %v1184_v19 }
 0x1ea   : > { %4241 = vmatmul.msk.bf16.vlgmr.msra.gmra.mxu0 %vm1096_vm1, %v1186_v22 }
 0x267   : > { %v1219_v20 = vpop.f32.mrf.mxu0 }
 0x268   : > { %v1220_v23 = vadd.f32 %v4701_v15, %v1219_v20 }
 0x26a   : > { %1224 = vxpose.xlu2.b32.start [1/2] (short) (narrow) %v1220_v23, 96 }
 0x26f   : > { %v1221_v24 = vpop.f32.mrf.mxu0 }
 0x270   : > { %v1222_v25 = vadd.f32 %v4701_v15, %v1221_v24 }
 0x272   : > { %1225 = vxpose.xlu2.b32.end [2/2] (short) (narrow) %v1222_v25, 96 }
 0x303   : > { %v1240_v26 = vpop.trf.xlu2 }
 0x30b   : > { %v1241_v27 = vpop.trf.xlu2 }
 0x30c   : > { %v4493_v28 = vpack.i.bf16 %v1241_v27, %v1240_v26 }
 0x30e   : > { %4494 = vxpose.xlu1.b32.start.end [1/1] (short) (narrow) %v4493_v28, 16 }
 0x313   : > { %v1242_v29 = vpop.trf.xlu2 }
 0x31b   : > { %v1243_v30 = vpop.trf.xlu2 }
 0x31c   : > { %v4517_v36 = vpack.i.bf16 %v1243_v30, %v1242_v29 }
 0x323   : > { %v1244_v31 = vpop.trf.xlu2 }
 0x32b   : > { %v1245_v32 = vpop.trf.xlu2 }
 0x32c   : > { %v4481_v33 = vpack.i.bf16 %v1245_v32, %v1244_v31 }
 0x32e   : > { %4482 = vxpose.xlu0.b32.start.end [1/1] (short) (narrow) %v4481_v33, 16 }
 0x333   : > { %v1246_v34 = vpop.trf.xlu2 }
 0x33b   : > { %v1247_v35 = vpop.trf.xlu2 }
 0x33c   : > { %v4505_v37 = vpack.i.bf16 %v1247_v35, %v1246_v34  ;;  %v1090_v34 = vld [vmem:[#allocation7] sm:$0xff] }
 0x33e   : > { %4518 = vxpose.xlu0.b32.start.end [1/1] (short) (narrow) %v4517_v36, 16  ;;  %4506 = vxpose.xlu2.b32.start.end [1/1] (short) (narrow) %v4505_v37, 16 }
 0x343   : > { %v5595_v38 = vpop.trf.xlu2 }
 0x34b   : > { %v5597_v39 = vpop.trf.xlu2 }
 0x34c   : > { %v4529_v40 = vpack.i.bf16 %v5597_v39, %v5595_v38 }
 0x353   : > { %v5601_v41 = vpop.trf.xlu2 }
 0x35b   : > { %v5603_v42 = vpop.trf.xlu2 }
 0x35c   : > { %v4541_v43 = vpack.i.bf16 %v5603_v42, %v5601_v41 }
 0x3b2   : > { %v4495_v44 = vpop.trf.xlu1 }
 0x3b3   : > { %v4496_v51 = vunpack.i.l.bf16 %v4495_v44  ;;  %v4499_v52 = vunpack.i.h.bf16 %v4495_v44 }
 0x3b5   : > { %v1645_v60 = vpack.c.bf16 %v4496_v51, %v4496_v51  ;;  %v1647_v61 = vpack.c.bf16 %v4499_v52, %v4499_v52  ;;  %v1091_v51 = vld [vmem:[#allocation7 + $0x8] sm:$0xff] }
 0x3ba   : > { %v4500_v45 = vpop.trf.xlu1 }
 0x3bb   : > { %v4504_v11 = vunpack.i.h.bf16 %v4500_v45  ;;  %v4501_v13 = vunpack.i.l.bf16 %v4500_v45 }
 0x3bd   : > { %v1648_v22 = vpack.c.bf16 %v4504_v11, %v4504_v11  ;;  %v1646_v15 = vpack.c.bf16 %v4501_v13, %v4501_v13 }
 0x3d2   : > { %v4483_v46 = vpop.trf.xlu0 }
 0x3d3   : > { %v4484_v47 = vunpack.i.l.bf16 %v4483_v46  ;;  %v4487_v48 = vunpack.i.h.bf16 %v4483_v46 }
 0x3d5   : > { %v1653_v49 = vpack.c.bf16 %v4484_v47, %v4484_v47  ;;  %v1655_v50 = vpack.c.bf16 %v4487_v48, %v4487_v48 }
 0x3d7   : > { %v1666_v53 = vsel %vm1661_vm15, %v1653_v49, 0  ;;  %v1704_v54 = vsel %vm1661_vm15, %v1655_v50, 0  ;;  %v4507_v55 = vpop.trf.xlu2 }
 0x3d8   : > { %1675 = vmatpush.bf16.xpose.msra.mxu1 %v1666_v53  ;;  %1713 = vmatpush.bf16.xpose.msra.mxu3 %v1704_v54  ;;  %v4508_v56 = vunpack.i.l.bf16 %v4507_v55  ;;  %v4511_v58 = vunpack.i.h.bf16 %v4507_v55 }
 0x3da   : > { %v4488_v59 = vpop.trf.xlu0  ;;  %v1657_v62 = vpack.c.bf16 %v4508_v56, %v4508_v56  ;;  %v1659_v63 = vpack.c.bf16 %v4511_v58, %v4511_v58 }
 0x3db   : > { %v4489_v0 = vunpack.i.l.bf16 %v4488_v59  ;;  %v4492_v1 = vunpack.i.h.bf16 %v4488_v59 }
 0x3dc   : > { %v1742_v3 = vsel %vm1661_vm15, %v1657_v62, 0  ;;  %v1780_v5 = vsel %vm1661_vm15, %v1659_v63, 0 }
 0x3dd   : > { %v1654_v7 = vpack.c.bf16 %v4489_v0, %v4489_v0  ;;  %v1656_v8 = vpack.c.bf16 %v4492_v1, %v4492_v1 }
 0x3df   : > { %4242 = vmatmul.msk.bf16.vlgmr.msra.gmra.mxu1 %vm1661_vm15, %v1645_v60  ;;  %4244 = vmatmul.msk.bf16.vlgmr.msra.gmra.mxu3 %vm1661_vm15, %v1647_v61  ;;  %v1685_v9 = vsel %vm1661_vm15, %v1654_v7, 0  ;;  %v1723_v10 = vsel %vm1661_vm15, %v1656_v8, 0  ;;  %v4512_v14 = vpop.trf.xlu2 }
 0x3e0   : > { %1751 = vmatpush.bf16.xpose.msrb.mxu1 %v1742_v3  ;;  %1789 = vmatpush.bf16.xpose.msrb.mxu3 %v1780_v5  ;;  %v4516_v16 = vunpack.i.h.bf16 %v4512_v14  ;;  %v4513_v17 = vunpack.i.l.bf16 %v4512_v14 }
 0x3e1   : > { %1694 = vmatpush.bf16.xpose.msra.mxu2 %v1685_v9  ;;  %1732 = vmatpush.bf16.xpose.msrb.mxu0 %v1723_v10 }
 0x3e2   : > { %v4519_v18 = vpop.trf.xlu0  ;;  %v1658_v19 = vpack.c.bf16 %v4513_v17, %v4513_v17  ;;  %v1660_v21 = vpack.c.bf16 %v4516_v16, %v4516_v16 }
 0x3e3   : > { %v4523_v24 = vunpack.i.h.bf16 %v4519_v18  ;;  %v4520_v25 = vunpack.i.l.bf16 %v4519_v18 }
 0x3e4   : > { %v1761_v20 = vsel %vm1661_vm15, %v1658_v19, 0  ;;  %v1799_v23 = vsel %vm1661_vm15, %v1660_v21, 0 }
 0x3e5   : > { %v1651_v27 = vpack.c.bf16 %v4523_v24, %v4523_v24  ;;  %v1649_v28 = vpack.c.bf16 %v4520_v25, %v4520_v25 }
 0x3e8   : > { %4243 = vmatmul.msk.bf16.vlgmr.msra.gmra.mxu2 %vm1661_vm15, %v1646_v15  ;;  %4245 = vmatmul.msk.bf16.vlgmr.msrb.gmra.mxu0 %vm1661_vm15, %v1648_v22 }
 0x3e9   : > { %1770 = vmatpush.bf16.xpose.msrb.mxu2 %v1761_v20  ;;  %1808 = vmatpush.bf16.xpose.msra.mxu0 %v1799_v23 }
 0x3ea   : > { %v4524_v26 = vpop.trf.xlu0 }
 0x3eb   : > { %v4528_v29 = vunpack.i.h.bf16 %v4524_v26  ;;  %v4525_v30 = vunpack.i.l.bf16 %v4524_v26 }
 0x3ed   : > { %v1652_v31 = vpack.c.bf16 %v4528_v29, %v4528_v29  ;;  %v1650_v32 = vpack.c.bf16 %v4525_v30, %v4525_v30 }
 0x3ef   : > { %4246 = vmatmul.msk.bf16.vlgmr.msrb.gmra.mxu1 %vm1661_vm15, %v1649_v28  ;;  %4248 = vmatmul.msk.bf16.vlgmr.msrb.gmra.mxu3 %vm1661_vm15, %v1651_v27 }
 0x3f8   : > { %4247 = vmatmul.msk.bf16.vlgmr.msrb.gmra.mxu2 %vm1661_vm15, %v1650_v32  ;;  %4249 = vmatmul.msk.bf16.vlgmr.msra.gmra.mxu0 %vm1661_vm15, %v1652_v31 }
 0x45c   : > { %v1677_v33 = vpop.f32.mrf.mxu1 }
 0x45d   : > { %v1814_v35 = vmul.f32 0.35355338, %v1677_v33 }
 0x45f   : > { %v5623_v36 = vadd.f32 %v1814_v35, %v1090_v34 }
 0x461   : > { %v1830_v37 = vsel %vm1661_vm15, %v5623_v36, -inf }
 0x462   : > { %v1715_v44 = vpop.f32.mrf.mxu3  ;;  %1831 = vmax.xlane.f32.xlu2 %v1830_v37 }
 0x463   : > { %v1816_v45 = vmul.f32 0.35355338, %v1715_v44 }
 0x464   : > { %v1679_v46 = vpop.f32.mrf.mxu1 }
 0x465   : > { %v1734_v47 = vpop.f32.mrf.mxu0  ;;  %v1824_v48 = vadd.f32 %v1816_v45, %v1090_v34 }
 0x466   : > { %v1817_v49 = vmul.f32 0.35355338, %v1734_v47 }
 0x467   : > { %v1836_v50 = vsel %vm1661_vm15, %v1824_v48, -inf }
 0x468   : > { %1837 = vmax.xlane.f32.xlu1 %v1836_v50  ;;  %v1825_v55 = vadd.f32 %v1817_v49, %v1091_v51 }
 0x46a   : > { %v1717_v53 = vpop.f32.mrf.mxu3  ;;  %v1839_v61 = vsel %vm1661_vm15, %v1825_v55, -inf }
 0x46b   : > { %v1696_v52 = vpop.f32.mrf.mxu2 }
 0x46c   : > { %v1815_v54 = vmul.f32 0.35355338, %v1696_v52  ;;  %v1753_v58 = vpop.f32.mrf.mxu1 }
 0x46d   : > { %v1736_v56 = vpop.f32.mrf.mxu0  ;;  %v1818_v17 = vmul.f32 0.35355338, %v1753_v58 }
 0x46e   : > { %v1823_v59 = vadd.f32 %v1815_v54, %v1091_v51 }
 0x46f   : > { %v1826_v22 = vadd.f32 %v1818_v17, %v1090_v34 }
 0x470   : > { %v1833_v60 = vsel %vm1661_vm15, %v1823_v59, -inf  ;;  %1840 = vmax.xlane.f32.xlu1 %v1839_v61 }
 0x471   : > { %1834 = vmax.xlane.f32.xlu0 %v1833_v60  ;;  %v1842_v15 = vsel %vm1661_vm15, %v1826_v22, -inf }
 0x472   : > { %v1791_v63 = vpop.f32.mrf.mxu3 }
 0x473   : > { %v1698_v62 = vpop.f32.mrf.mxu2  ;;  %v1820_v0 = vmul.f32 0.35355338, %v1791_v63 }
 0x474   : > { %v1755_v1 = vpop.f32.mrf.mxu1 }
 0x475   : > { %v1810_v3 = vpop.f32.mrf.mxu0  ;;  %v1828_v5 = vadd.f32 %v1820_v0, %v1090_v34 }
 0x476   : > { %v1821_v7 = vmul.f32 0.35355338, %v1810_v3 }
 0x477   : > { %v1848_v8 = vsel %vm1661_vm15, %v1828_v5, -inf }
 0x478   : > { %v1829_v13 = vadd.f32 %v1821_v7, %v1091_v51 }
 0x479   : > { %1849 = vmax.xlane.f32.xlu0 %v1848_v8 }
 0x47a   : > { %v1793_v10 = vpop.f32.mrf.mxu3  ;;  %v1851_v19 = vsel %vm1661_vm15, %v1829_v13, -inf }
 0x47b   : > { %v1772_v9 = vpop.f32.mrf.mxu2 }
 0x47c   : > { %v1819_v11 = vmul.f32 0.35355338, %v1772_v9 }
 0x47d   : > { %v1812_v14 = vpop.f32.mrf.mxu0 }
 0x47e   : > { %v1827_v16 = vadd.f32 %v1819_v11, %v1091_v51 }
 0x480   : > { %v1845_v18 = vsel %vm1661_vm15, %v1827_v16, -inf }
 0x481   : > { %1846 = vmax.xlane.f32.xlu1 %v1845_v18  ;;  %1852 = vmax.xlane.f32.xlu0 %v1851_v19 }
 0x483   : > { %v1774_v21 = vpop.f32.mrf.mxu2 }
 0x489   : > { %1843 = vmax.xlane.f32.xlu1 %v1842_v15 }
 0x4d5   : > { %v1832_v25 = vpop.xlane.xlu2 %1831 }
 0x4d6   : > { %v1854_v31 = vsub.f32 %v5623_v36, %v1832_v25 }
 0x4d8   : > { %v1862_v35 = vmul.f32 1.442695, %v1854_v31 }
 0x4db   : > { %v1838_v20 = vpop.xlane.xlu1 %1837 }
 0x4dc   : > { %v1856_v23 = vsub.f32 %v1824_v48, %v1838_v20 }
 0x4de   : > { %v1866_v24 = vmul.f32 1.442695, %v1856_v23 }
 0x4e0   : > { %4720 = vpow2.f32 %v1866_v24 }
 0x4e3   : > { %v1841_v27 = vpop.xlane.xlu1 %1840 }
 0x4e4   : > { %v1835_v26 = vpop.xlane.xlu0 %1834  ;;  %v1857_v29 = vsub.f32 %v1825_v55, %v1841_v27 }
 0x4e5   : > { %v1855_v28 = vsub.f32 %v1823_v59, %v1835_v26 }
 0x4e6   : > { %v5634_v30 = vpop.eup %4720  ;;  %v1868_v33 = vmul.f32 1.442695, %v1857_v29 }
 0x4e7   : > { %v1864_v32 = vmul.f32 1.442695, %v1855_v28  ;;  %v1884_v34 = vsel %vm1661_vm15, %v5634_v30, 0.0 }
 0x4e8   : > { %1885 = vadd.xlane.f32.xlu0 %v1884_v34 }
 0x4e9   : > { %4722 = vpow2.f32 %v1864_v32 }
 0x4ea   : > { %4724 = vpow2.f32 %v1868_v33 }
 0x4eb   : > { %4726 = vpow2.f32 %v1862_v35 }
 0x4ec   : > { %v1850_v37 = vpop.xlane.xlu0 %1849 }
 0x4ed   : > { %v1860_v44 = vsub.f32 %v1828_v5, %v1850_v37 }
 0x4ef   : > { %v5639_v45 = vpop.eup %4722  ;;  %v1874_v46 = vmul.f32 1.442695, %v1860_v44 }
 0x4f0   : > { %v5641_v47 = vpop.eup %4724  ;;  %v1881_v36 = vsel %vm1661_vm15, %v5639_v45, 0.0 }
 0x4f1   : > { %4728 = vpow2.f32 %v1874_v46  ;;  %v1887_v48 = vsel %vm1661_vm15, %v5641_v47, 0.0  ;;  %1882 = vadd.xlane.f32.xlu1 %v1881_v36  ;;  %v4727_v51 = vpop.eup %4726 }
 0x4f2   : > { %1888 = vadd.xlane.f32.xlu0 %v1887_v48  ;;  %v1878_v58 = vsel %vm1661_vm15, %v4727_v51, 0.0 }
 0x4f4   : > { %v1847_v49 = vpop.xlane.xlu1 %1846  ;;  %v1853_v50 = vpop.xlane.xlu0 %1852 }
 0x4f5   : > { %v1859_v52 = vsub.f32 %v1827_v16, %v1847_v49  ;;  %v1861_v55 = vsub.f32 %v1829_v13, %v1853_v50 }
 0x4f7   : > { %v5647_v53 = vpop.eup %4728  ;;  %v1872_v54 = vmul.f32 1.442695, %v1859_v52  ;;  %v1876_v59 = vmul.f32 1.442695, %v1861_v55 }
 0x4f8   : > { %v1896_v56 = vsel %vm1661_vm15, %v5647_v53, 0.0 }
 0x4f9   : > { %4730 = vpow2.f32 %v1872_v54  ;;  %1897 = vadd.xlane.f32.xlu2 %v1896_v56  ;;  %1879 = vadd.xlane.f32.xlu1 %v1878_v58 }
 0x4fa   : > { %4732 = vpow2.f32 %v1876_v59 }
 0x4fc   : > { %v1844_v60 = vpop.xlane.xlu1 %1843 }
 0x4fd   : > { %v1858_v61 = vsub.f32 %v1826_v22, %v1844_v60 }
 0x4ff   : > { %v5652_v62 = vpop.eup %4730  ;;  %v1870_v63 = vmul.f32 1.442695, %v1858_v61 }
 0x500   : > { %v1893_v0 = vsel %vm1661_vm15, %v5652_v62, 0.0  ;;  %v5656_v1 = vpop.eup %4732 }
 0x501   : > { %4734 = vpow2.f32 %v1870_v63  ;;  %1894 = vadd.xlane.f32.xlu1 %v1893_v0  ;;  %v1899_v5 = vsel %vm1661_vm15, %v5656_v1, 0.0 }
 0x507   : > { %v5658_v3 = vpop.eup %4734 }
 0x508   : > { %v1890_v7 = vsel %vm1661_vm15, %v5658_v3, 0.0 }
 0x509   : > { %1900 = vadd.xlane.f32.xlu1 %v1899_v5  ;;  %1891 = vadd.xlane.f32.xlu0 %v1890_v7 }
 0x522   : > { %4530 = vxpose.xlu2.b32.start.end [1/1] (short) (narrow) %v4529_v40, 16 }
 0x532   : > { %4542 = vxpose.xlu0.b32.start.end [1/1] (short) (narrow) %v4541_v43, 16 }
 0x55b   : > { %v1886_v9 = vpop.xlane.xlu0 %1885 }
 0x55c   : > { %4736 = vrcp.f32 %v1886_v9 }
 0x562   : > { %v4737_v13 = vpop.eup %4736 }
 0x563   : > { %v1912_v38 = vmul.f32 %v4737_v13, %v5634_v30 }
 0x564   : > { %v1883_v8 = vpop.xlane.xlu1 %1882 }
 0x565   : > { %v1889_v14 = vpop.xlane.xlu0 %1888  ;;  %v1920_v22 = vpack.c.bf16 %v1912_v38, %v1912_v38 }
 0x56c   : > { %v1880_v10 = vpop.xlane.xlu1 %1879  ;;  %v1898_v11 = vpop.xlane.xlu2 %1897 }
 0x56d   : > { %4738 = vrcp.f32 %v1880_v10 }
 0x56e   : > { %4740 = vrcp.f32 %v1883_v8 }
 0x56f   : > { %4742 = vrcp.f32 %v1889_v14 }
 0x570   : > { %4744 = vrcp.f32 %v1898_v11 }
 0x573   : > { %v4739_v16 = vpop.eup %4738 }
 0x574   : > { %v1910_v39 = vmul.f32 %v4739_v16, %v4727_v51  ;;  %v4741_v21 = vpop.eup %4740  ;;  %v1895_v34 = vpop.xlane.xlu1 %1894 }
 0x575   : > { %v4743_v20 = vpop.eup %4742  ;;  %v1911_v27 = vmul.f32 %v4741_v21, %v5639_v45 }
 0x576   : > { %v1918_v15 = vpack.c.bf16 %v1910_v39, %v1910_v39  ;;  %v1913_v26 = vmul.f32 %v4743_v20, %v5641_v47  ;;  %v4745_v37 = vpop.eup %4744 }
 0x577   : > { %v1919_v33 = vpack.c.bf16 %v1911_v27, %v1911_v27  ;;  %v1916_v48 = vmul.f32 %v4745_v37, %v5647_v53 }
 0x578   : > { %v1921_v32 = vpack.c.bf16 %v1913_v26, %v1913_v26 }
 0x579   : > { %v1924_v56 = vpack.c.bf16 %v1916_v48, %v1916_v48 }
 0x57c   : > { %v1892_v35 = vpop.xlane.xlu0 %1891  ;;  %v1901_v44 = vpop.xlane.xlu1 %1900 }
 0x57d   : > { %4746 = vrcp.f32 %v1892_v35  ;;  %v4702_v35 = vld [vmem:[%s6028_s18] ss:$0 sm:$0xff] }
 0x57e   : > { %4748 = vrcp.f32 %v1895_v34 }
 0x57f   : > { %4750 = vrcp.f32 %v1901_v44 }
 0x583   : > { %v4747_v45 = vpop.eup %4746 }
 0x584   : > { %v1914_v49 = vmul.f32 %v4747_v45, %v5658_v3  ;;  %v4749_v55 = vpop.eup %4748 }
 0x585   : > { %v4751_v59 = vpop.eup %4750  ;;  %v1915_v53 = vmul.f32 %v4749_v55, %v5652_v62 }
 0x586   : > { %v1922_v58 = vpack.c.bf16 %v1914_v49, %v1914_v49  ;;  %v1917_v0 = vmul.f32 %v4751_v59, %v5656_v1 }
 0x587   : > { %v1923_v9 = vpack.c.bf16 %v1915_v53, %v1915_v53  ;;  %v4359_v53 = vld [vmem:[#allocation5 + $0x8] sm:$0xff] }
 0x588   : > { %v1925_v10 = vpack.c.bf16 %v1917_v0, %v1917_v0 }
 0x5bb   : > { %v4531_v17 = vpop.trf.xlu2 }
 0x5bc   : > { %v4535_v18 = vunpack.i.h.bf16 %v4531_v17  ;;  %v4532_v19 = vunpack.i.l.bf16 %v4531_v17 }
 0x5be   : > { %v1926_v40 = vpack.c.bf16 %v4532_v19, %v4532_v19  ;;  %v1928_v41 = vpack.c.bf16 %v4535_v18, %v4535_v18 }
 0x5c0   : > { %v1939_v42 = vsel %vm1937_vm0, %v1926_v40, 0  ;;  %v1977_v43 = vsel %vm1937_vm0, %v1928_v41, 0 }
 0x5c1   : > { %1948 = vmatpush.bf16.msra.mxu1 %v1939_v42  ;;  %1986 = vmatpush.bf16.msra.mxu3 %v1977_v43 }
 0x5c3   : > { %v4536_v23 = vpop.trf.xlu2 }
 0x5c4   : > { %v4540_v24 = vunpack.i.h.bf16 %v4536_v23  ;;  %v4537_v25 = vunpack.i.l.bf16 %v4536_v23  ;;  %4250 = vmatmul.msk.bf16.vlgmr.msra.gmra.mxu1 %vm1661_vm15, %v1918_v15  ;;  %4252 = vmatmul.msk.bf16.vlgmr.msra.gmra.mxu3 %vm1661_vm15, %v1920_v22 }
 0x5c6   : > { %v1927_v28 = vpack.c.bf16 %v4537_v25, %v4537_v25  ;;  %v1929_v29 = vpack.c.bf16 %v4540_v24, %v4540_v24 }
 0x5c8   : > { %v1958_v30 = vsel %vm1937_vm0, %v1927_v28, 0  ;;  %v1996_v31 = vsel %vm1937_vm0, %v1929_v29, 0 }
 0x5c9   : > { %1967 = vmatpush.bf16.msra.mxu2 %v1958_v30  ;;  %2005 = vmatpush.bf16.msrb.mxu0 %v1996_v31  ;;  %v4363_v30 = vld [vmem:[%s5518_s29 + $0x8] sm:$0xff]  ;;  %v4362_v31 = vld [vmem:[%s5518_s29] sm:$0xff]  ;;  %s6029_s29 = scalar_lea.vmem [#allocation8], %s5474_s6  ;;  %s6039_s6 = scalar_lea.vmem [#allocation13], %s5471_s3 }
 0x5ca   : > { %s6030_s11 = smov %s6029_s29 }
 0x5cc   : > { %4251 = vmatmul.msk.bf16.vlgmr.msra.gmra.mxu2 %vm1661_vm15, %v1919_v33  ;;  %4253 = vmatmul.msk.bf16.vlgmr.msrb.gmra.mxu0 %vm1661_vm15, %v1921_v32 }
 0x5d6   : > { %v4543_v46 = vpop.trf.xlu0 }
 0x5d7   : > { %v4547_v47 = vunpack.i.h.bf16 %v4543_v46  ;;  %v4544_v36 = vunpack.i.l.bf16 %v4543_v46 }
 0x5d9   : > { %v1930_v50 = vpack.c.bf16 %v4544_v36, %v4544_v36  ;;  %v1932_v51 = vpack.c.bf16 %v4547_v47, %v4547_v47 }
 0x5db   : > { %v2015_v52 = vsel %vm1937_vm0, %v1930_v50, 0  ;;  %v2053_v54 = vsel %vm1937_vm0, %v1932_v51, 0  ;;  %v4367_v50 = vld [vmem:[%s6029_s29 + $0x8] sm:$0xff]  ;;  %v4366_v51 = vld [vmem:[%s6030_s11] sm:$0xff] }
 0x5dc   : > { %2024 = vmatpush.bf16.msrb.mxu1 %v2015_v52  ;;  %2062 = vmatpush.bf16.msrb.mxu3 %v2053_v54 }
 0x5de   : > { %v4548_v60 = vpop.trf.xlu0 }
 0x5df   : > { %v4552_v61 = vunpack.i.h.bf16 %v4548_v60  ;;  %v4549_v63 = vunpack.i.l.bf16 %v4548_v60  ;;  %4254 = vmatmul.msk.bf16.vlgmr.msrb.gmra.mxu1 %vm1661_vm15, %v1922_v58  ;;  %4256 = vmatmul.msk.bf16.vlgmr.msrb.gmra.mxu3 %vm1661_vm15, %v1924_v56 }
 0x5e0   : > { %2272 = vmatpush.bf16.msra.mxu1 %v4363_v30  ;;  %2444 = vmatpush.bf16.msra.mxu3 %v4367_v50 }
 0x5e1   : > { %v1931_v3 = vpack.c.bf16 %v4549_v63, %v4549_v63  ;;  %v1933_v5 = vpack.c.bf16 %v4552_v61, %v4552_v61 }
 0x5e3   : > { %v2034_v7 = vsel %vm1937_vm0, %v1931_v3, 0  ;;  %v2072_v8 = vsel %vm1937_vm0, %v1933_v5, 0  ;;  %v4365_v5 = vld [vmem:[%s5531_s25 + $0x8] sm:$0xff] }
 0x5e4   : > { %2043 = vmatpush.bf16.msrb.mxu2 %v2034_v7  ;;  %2081 = vmatpush.bf16.msra.mxu0 %v2072_v8  ;;  %v4364_v7 = vld [vmem:[%s5531_s25] sm:$0xff] }
 0x5e5   : > { %2273 = vmatpush.bf16.msra.mxu1 %v4362_v31  ;;  %2445 = vmatpush.bf16.msra.mxu3 %v4366_v51 }
 0x5e7   : > { %4255 = vmatmul.msk.bf16.vlgmr.msrb.gmra.mxu2 %vm1661_vm15, %v1923_v9  ;;  %4257 = vmatmul.msk.bf16.vlgmr.msra.gmra.mxu0 %vm1661_vm15, %v1925_v10 }
 0x5e8   : > { %2394 = vmatpush.bf16.msra.mxu2 %v4365_v5 }
 0x5ec   : > { %2395 = vmatpush.bf16.msra.mxu2 %v4364_v7 }
 0x641   : > { %v1950_v11 = vpop.f32.mrf.mxu1 }
 0x647   : > { %v1988_v13 = vpop.f32.mrf.mxu3 }
 0x648   : > { %v4553_v14 = vpack.i.bf16 %v1988_v13, %v1950_v11 }
 0x649   : > { %v1952_v62 = vpop.f32.mrf.mxu1  ;;  %v2007_v16 = vpop.f32.mrf.mxu0 }
 0x64a   : > { %4554 = vxpose.xlu1.b32.start [1/2] (short) (narrow) %v4553_v14, 8 }
 0x64f   : > { %v1969_v1 = vpop.f32.mrf.mxu2  ;;  %v1990_v17 = vpop.f32.mrf.mxu3 }
 0x650   : > { %v4555_v18 = vpack.i.bf16 %v2007_v16, %v1969_v1 }
 0x651   : > { %v2009_v19 = vpop.f32.mrf.mxu0 }
 0x652   : > { %4556 = vxpose.xlu1.b32.end [2/2] (short) (narrow) %v4555_v18, 8 }
 0x657   : > { %v1971_v38 = vpop.f32.mrf.mxu2 }
 0x65c   : > { %v2026_v39 = vpop.f32.mrf.mxu1 }
 0x662   : > { %v2064_v40 = vpop.f32.mrf.mxu3 }
 0x663   : > { %v4562_v41 = vpack.i.bf16 %v2064_v40, %v2026_v39 }
 0x664   : > { %v2028_v42 = vpop.f32.mrf.mxu1  ;;  %v2083_v43 = vpop.f32.mrf.mxu0 }
 0x665   : > { %4563 = vxpose.xlu2.b32.start [1/2] (short) (narrow) %v4562_v41, 8 }
 0x66a   : > { %v2045_v21 = vpop.f32.mrf.mxu2  ;;  %v2066_v22 = vpop.f32.mrf.mxu3 }
 0x66b   : > { %v4564_v15 = vpack.i.bf16 %v2083_v43, %v2045_v21  ;;  %v4703_v21 = vld [vmem:[%s1065_s12] ss:$0 sm:$0xff] }
 0x66c   : > { %v2085_v20 = vpop.f32.mrf.mxu0 }
 0x66d   : > { %4565 = vxpose.xlu2.b32.end [2/2] (short) (narrow) %v4564_v15, 8 }
 0x672   : > { %v2047_v23 = vpop.f32.mrf.mxu2 }
 0x6ee   : > { %v4557_v24 = vpop.trf.xlu1 }
 0x6ef   : > { %v4558_v25 = vunpack.i.l.bf16 %v4557_v24  ;;  %v4561_v26 = vunpack.i.h.bf16 %v4557_v24 }
 0x6f1   : > { %2215 = vxpose.xlu0.b32.start [1/4] (short) (narrow) %v4558_v25, 16 }
 0x6f9   : > { %2216 = vxpose.xlu0.b32.cont [2/4] (short) (narrow) %v4561_v26, 16 }
 0x6fe   : > { %v4566_v27 = vpop.trf.xlu2 }
 0x6ff   : > { %v4567_v28 = vunpack.i.l.bf16 %v4566_v27  ;;  %v4570_v29 = vunpack.i.h.bf16 %v4566_v27 }
 0x701   : > { %2217 = vxpose.xlu0.b32.cont [3/4] (short) (narrow) %v4567_v28, 16 }
 0x709   : > { %2218 = vxpose.xlu0.b32.end [4/4] (short) (narrow) %v4570_v29, 16 }
 0x795   : > { %v2231_v32 = vpop.trf.xlu0 }
 0x79d   : > { %v2232_v33 = vpop.trf.xlu0 }
 0x79e   : > { %v2247_v34 = vpack.c.bf16 %v2232_v33, %v2231_v32 }
 0x7a0   : > { %4266 = vmatmul.msk.bf16.vlgmr.msra.gmra.mxu1 %vm1096_vm1, %v2247_v34  ;;  %v2302_v34 = vperm.slane %v5580_v57, 1 }
 0x81d   : > { %v2275_v37 = vpop.f32.mrf.mxu1 }
 0x81e   : > { %v2276_v44 = vadd.f32 %v4702_v35, %v2275_v37 }
 0x820   : > { %v5702_v45 = vadd.f32 %v2276_v44, %v5553_v2  ;;  %v4358_v2 = vld [vmem:[#allocation5] sm:$0xff] }
 0x821   : > { %4292 = vmatmul.msk.bf16.vlgmr.msra.gmra.mxu3 %vm1096_vm1, %v4358_v2 }
 0x822   : > { %v2282_v46 = vsel %vm1096_vm1, %v5702_v45, 0.0 }
 0x823   : > { %2283 = vadd.xlane.f32.xlu2 %v2282_v46 }
 0x825   : > { %v2277_v47 = vpop.f32.mrf.mxu1 }
 0x826   : > { %v2278_v36 = vadd.f32 %v4702_v35, %v2277_v47  ;;  %v2361_v47 = vperm.slane %v5584_v6, 1 }
 0x828   : > { %v5707_v48 = vadd.f32 %v2278_v36, %v5557_v4 }
 0x82a   : > { %v2285_v49 = vsel %vm1096_vm1, %v5707_v48, 0.0 }
 0x82b   : > { %2286 = vadd.xlane.f32.xlu1 %v2285_v49 }
 0x831   : > { %4293 = vmatmul.msk.bf16.gmra.mxu3 %vm1096_vm1, %v4359_v53 }
 0x896   : > { %v2284_v52 = vpop.xlane.xlu2 %2283 }
 0x897   : > { %v2288_v54 = vmul.f32 %v2284_v52, %v5561_v12 }
 0x899   : > { %v5718_v4 = vsub.f32 %v5702_v45, %v2288_v54 }
 0x89b   : > { %v2292_v55 = vmul.f32 %v5718_v4, %v5718_v4  ;;  %v2303_v49 = vmul.f32 %v2302_v34, %v5718_v4 }
 0x89d   : > { %v2294_v56 = vsel %vm1096_vm1, %v2292_v55, 0.0 }
 0x89e   : > { %v2287_v58 = vpop.xlane.xlu1 %2286  ;;  %2295 = vadd.xlane.f32.xlu0 %v2294_v56 }
 0x89f   : > { %v2289_v59 = vmul.f32 %v2287_v58, %v5561_v12 }
 0x8a1   : > { %v5725_v60 = vsub.f32 %v5707_v48, %v2289_v59 }
 0x8a3   : > { %v2293_v61 = vmul.f32 %v5725_v60, %v5725_v60 }
 0x8a4   : > { %v2447_v22 = vpop.f32.mrf.mxu3 }
 0x8a5   : > { %v2297_v63 = vsel %vm1096_vm1, %v2293_v61, 0.0  ;;  %v2448_v20 = vadd.f32 %v4703_v21, %v2447_v22  ;;  %v2304_v61 = vmul.f32 %v2302_v34, %v5725_v60 }
 0x8a6   : > { %2298 = vadd.xlane.f32.xlu1 %v2297_v63 }
 0x8ac   : > { %v2449_v30 = vpop.f32.mrf.mxu3 }
 0x8ad   : > { %v2450_v32 = vadd.f32 %v4703_v21, %v2449_v30 }
 0x8b4   : > { %v2452_v5 = vpop.f32.mrf.mxu3 }
 0x8b5   : > { %v2453_v7 = vadd.f32 %v4703_v21, %v2452_v5 }
 0x8e0   : > { %2617 = vxpose.xlu1.b32.start [1/4] (short) (narrow) %v2448_v20, 64 }
 0x8e8   : > { %2618 = vxpose.xlu1.b32.cont [2/4] (short) (narrow) %v2450_v32, 64 }
 0x8f0   : > { %2619 = vxpose.xlu1.b32.cont [3/4] (short) (narrow) %v2453_v7, 64 }
 0x911   : > { %v2296_v0 = vpop.xlane.xlu0 %2295 }
 0x912   : > { %v2300_v3 = vmul.f32 0.032258064, %v2296_v0 }
 0x914   : > { %4752 = vrsqrt.f32 %v2300_v3  ;;  %vm2312_vm2 = vcmp.eq.f32.partialorder %v2300_v3, inf  ;;  %v2315_v38 = vand.u32 2147483648, %v2300_v3  ;;  %vm2314_vm3 = vcmp.eq.f32.partialorder %v2300_v3, 0.0 }
 0x919   : > { %v2299_v8 = vpop.xlane.xlu1 %2298 }
 0x91a   : > { %v4753_v9 = vpop.eup %4752  ;;  %v2301_v10 = vmul.f32 0.032258064, %v2299_v8  ;;  %v2454_v8 = vpop.f32.mrf.mxu3 }
 0x91b   : > { %v2306_v11 = vmul.f32 %v4753_v9, %v2300_v3 }
 0x91c   : > { %4754 = vrsqrt.f32 %v2301_v10  ;;  %vm2324_vm4 = vcmp.eq.f32.partialorder %v2301_v10, inf  ;;  %v2327_v24 = vand.u32 2147483648, %v2301_v10  ;;  %vm2326_vm5 = vcmp.eq.f32.partialorder %v2301_v10, 0.0 }
 0x91d   : > { %v2307_v13 = vmul.f32 %v4753_v9, %v2306_v11 }
 0x91f   : > { %v2308_v14 = vmul.f32 0.5, %v2307_v13 }
 0x921   : > { %v2309_v62 = vsub.f32 1.5, %v2308_v14 }
 0x922   : > { %v4755_v16 = vpop.eup %4754 }
 0x923   : > { %v2310_v1 = vmul.f32 %v4753_v9, %v2309_v62  ;;  %v2318_v17 = vmul.f32 %v4755_v16, %v2301_v10  ;;  %v2455_v9 = vadd.f32 %v4703_v21, %v2454_v8 }
 0x925   : > { %v2311_v18 = vmul.f32 %v2310_v1, %v2300_v3  ;;  %v2319_v19 = vmul.f32 %v4755_v16, %v2318_v17  ;;  %2620 = vxpose.xlu1.b32.end [4/4] (short) (narrow) %v2455_v9, 64 }
 0x927   : > { %v2313_v39 = vsel %vm2312_vm2, %v2300_v3, %v2311_v18  ;;  %v2320_v40 = vmul.f32 0.5, %v2319_v19 }
 0x928   : > { %v2316_v41 = vsel %vm2314_vm3, %v2315_v38, %v2313_v39 }
 0x929   : > { %v2329_v42 = vadd.f32 1e-06, %v2316_v41  ;;  %v2321_v43 = vsub.f32 1.5, %v2320_v40 }
 0x92b   : > { %4756 = vrcp.f32 %v2329_v42  ;;  %v2322_v15 = vmul.f32 %v4755_v16, %v2321_v43  ;;  %v2342_v33 = vand.u32 2147483648, %v2329_v42  ;;  %v2340_v37 = vand.u32 2147483647, %v2329_v42 }
 0x92c   : > { %vm2336_vm7 = vweird.f32 %v2329_v42 }
 0x92d   : > { %v2323_v23 = vmul.f32 %v2322_v15, %v2301_v10  ;;  %v2343_v36 = vor.u32 1.1754944e-38, %v2342_v33  ;;  %vm2341_vm9 = vcmp.eq.f32.partialorder %v2340_v37, 8.507059e+37 }
 0x92f   : > { %v2325_v25 = vsel %vm2324_vm4, %v2301_v10, %v2323_v23  ;;  %v4704_v10 = vld [vmem:[%s1062_s15] ss:$0 sm:$0xff] }
 0x930   : > { %v2328_v26 = vsel %vm2326_vm5, %v2327_v24, %v2325_v25 }
 0x931   : > { %v4757_v27 = vpop.eup %4756  ;;  %v2330_v28 = vadd.f32 1e-06, %v2328_v26 }
 0x932   : > { %v2332_v29 = vmul.f32 %v4757_v27, %v2329_v42  ;;  %vm2337_vm6 = vweird.f32 %v4757_v27 }
 0x933   : > { %4758 = vrcp.f32 %v2330_v28  ;;  %vm2338_vm8 = vmor %vm2336_vm7, %vm2337_vm6  ;;  %v2357_v57 = vand.u32 2147483648, %v2330_v28  ;;  %v2355_v56 = vand.u32 2147483647, %v2330_v28  ;;  %vm2351_vm11 = vweird.f32 %v2330_v28 }
 0x934   : > { %v2333_v31 = vsub.f32 1.0, %v2332_v29 }
 0x935   : > { %v2358_v6 = vor.u32 1.1754944e-38, %v2357_v57  ;;  %vm2356_vm13 = vcmp.eq.f32.partialorder %v2355_v56, 8.507059e+37 }
 0x936   : > { %v2334_v35 = vmul.f32 %v4757_v27, %v2333_v31 }
 0x938   : > { %v2335_v44 = vadd.f32 %v4757_v27, %v2334_v35 }
 0x939   : > { %v4759_v46 = vpop.eup %4758 }
 0x93a   : > { %v2339_v50 = vsel %vm2338_vm8, %v4757_v27, %v2335_v44  ;;  %v2347_v51 = vmul.f32 %v4759_v46, %v2330_v28  ;;  %vm2352_vm10 = vweird.f32 %v4759_v46 }
 0x93b   : > { %v2344_v2 = vsel %vm2341_vm9, %v2343_v36, %v2339_v50  ;;  %vm2353_vm12 = vmor %vm2351_vm11, %vm2352_vm10 }
 0x93c   : > { %v2345_v52 = vmul.f32 %v2344_v2, %v2303_v49  ;;  %v2348_v54 = vsub.f32 1.0, %v2347_v51 }
 0x93e   : > { %v2349_v55 = vmul.f32 %v4759_v46, %v2348_v54  ;;  %v2362_v58 = vadd.f32 %v2361_v47, %v2345_v52 }
 0x940   : > { %v2350_v59 = vadd.f32 %v4759_v46, %v2349_v55 }
 0x942   : > { %v2354_v63 = vsel %vm2353_vm12, %v4759_v46, %v2350_v59  ;;  %vm3788_vm12 = vcmask 523264  }
 0x943   : > { %v2359_v4 = vsel %vm2356_vm13, %v2358_v6, %v2354_v63 }
 0x944   : > { %v2360_v53 = vmul.f32 %v2359_v4, %v2304_v61 }
 0x946   : > { %v2363_v0 = vadd.f32 %v2361_v47, %v2360_v53 }
 0x948   : > { %v2364_v3 = vpack.c.bf16 %v2363_v0, %v2362_v58 }
 0x94a   : > { %4275 = vmatmul.msk.bf16.vlgmr.msra.gmra.mxu2 %vm1096_vm1, %v2364_v3 }
 0x9b1   : > { %v2633_v62 = vpop.trf.xlu1 }
 0x9b9   : > { %v2634_v16 = vpop.trf.xlu1 }
 0x9ba   : > { %v4571_v1 = vpack.i.bf16 %v2634_v16, %v2633_v62 }
 0x9bc   : > { %4572 = vxpose.xlu0.b32.start.end [1/1] (short) (narrow) %v4571_v1, 32 }
 0x9c1   : > { %v2635_v17 = vpop.trf.xlu1 }
 0x9c9   : > { %v2636_v18 = vpop.trf.xlu1 }
 0x9ca   : > { %v4593_v19 = vpack.i.bf16 %v2636_v18, %v2635_v17 }
 0x9cd   : > { %v2397_v60 = vpop.f32.mrf.mxu2 }
 0x9ce   : > { %v2398_v11 = vadd.f32 %v4704_v10, %v2397_v60 }
 0x9d0   : > { %2457 = vxpose.xlu2.b32.start [1/2] (short) (narrow) %v2398_v11, 32 }
 0x9d5   : > { %v2399_v13 = vpop.f32.mrf.mxu2 }
 0x9d6   : > { %v2400_v14 = vadd.f32 %v4704_v10, %v2399_v13 }
 0x9d8   : > { %2458 = vxpose.xlu2.b32.end [2/2] (short) (narrow) %v2400_v14, 32 }
 0x9f0   : > { %4594 = vxpose.xlu2.b32.start.end [1/1] (short) (narrow) %v4593_v19, 32 }
 0xa60   : > { %v4573_v21 = vpop.trf.xlu0 }
 0xa61   : > { %v4577_v22 = vunpack.i.h.bf16 %v4573_v21  ;;  %v4574_v15 = vunpack.i.l.bf16 %v4573_v21 }
 0xa63   : > { %v2922_v23 = vpack.c.bf16 %v4577_v22, %v4577_v22  ;;  %v2918_v24 = vpack.c.bf16 %v4574_v15, %v4574_v15 }
 0xa65   : > { %v2984_v29 = vunpack.c.l.b16 %v2922_v23  ;;  %v2936_v30 = vunpack.c.l.b16 %v2918_v24 }
 0xa68   : > { %v4578_v25 = vpop.trf.xlu0 }
 0xa69   : > { %v2473_v38 = vpop.trf.xlu2  ;;  %v4582_v27 = vunpack.i.h.bf16 %v4578_v25  ;;  %v4579_v28 = vunpack.i.l.bf16 %v4578_v25 }
 0xa6b   : > { %v2923_v31 = vpack.c.bf16 %v4582_v27, %v4582_v27  ;;  %v2919_v32 = vpack.c.bf16 %v4579_v28, %v4579_v28 }
 0xa6d   : > { %v2985_v34 = vunpack.c.l.b16 %v2923_v31  ;;  %v2937_v35 = vunpack.c.l.b16 %v2919_v32 }
 0xa6f   : > { %v2938_v46 = vpack.c.b16 %v2937_v35, %v2936_v30  ;;  %v2986_v47 = vpack.c.b16 %v2985_v34, %v2984_v29 }
 0xa70   : > { %v4583_v36 = vpop.trf.xlu0 }
 0xa71   : > { %v2474_v39 = vpop.trf.xlu2  ;;  %v2943_v54 = vsel %vm1661_vm15, %v2938_v46, 0  ;;  %v2991_v57 = vsel %vm1661_vm15, %v2986_v47, 0  ;;  %v4587_v55 = vunpack.i.h.bf16 %v4583_v36  ;;  %v4584_v56 = vunpack.i.l.bf16 %v4583_v36 }
 0xa72   : > { %v4615_v40 = vpack.i.bf16 %v2474_v39, %v2473_v38  ;;  %2952 = vmatpush.bf16.xpose.msrb.mxu0 %v2943_v54  ;;  %3000 = vmatpush.bf16.xpose.msrb.mxu2 %v2991_v57 }
 0xa73   : > { %v2924_v63 = vpack.c.bf16 %v4587_v55, %v4587_v55  ;;  %v2920_v4 = vpack.c.bf16 %v4584_v56, %v4584_v56 }
 0xa74   : > { %4616 = vxpose.xlu0.b32.start.end [1/1] (short) (narrow) %v4615_v40, 16 }
 0xa75   : > { %v3008_v9 = vunpack.c.l.b16 %v2924_v63  ;;  %v2960_v10 = vunpack.c.l.b16 %v2920_v4 }
 0xa78   : > { %v4588_v3 = vpop.trf.xlu0 }
 0xa79   : > { %v2475_v41 = vpop.trf.xlu2  ;;  %v4592_v7 = vunpack.i.h.bf16 %v4588_v3  ;;  %v4589_v8 = vunpack.i.l.bf16 %v4588_v3 }
 0xa7b   : > { %v2925_v60 = vpack.c.bf16 %v4592_v7, %v4592_v7  ;;  %v2921_v11 = vpack.c.bf16 %v4589_v8, %v4589_v8 }
 0xa7d   : > { %v3009_v14 = vunpack.c.l.b16 %v2925_v60  ;;  %v2961_v62 = vunpack.c.l.b16 %v2921_v11 }
 0xa7f   : > { %v2962_v1 = vpack.c.b16 %v2961_v62, %v2960_v10  ;;  %v3010_v17 = vpack.c.b16 %v3009_v14, %v3008_v9  ;;  %v5771_v9 = vpop.trf.xlu1 }
 0xa81   : > { %v2476_v42 = vpop.trf.xlu2  ;;  %v2967_v19 = vsel %vm1661_vm15, %v2962_v1, 0  ;;  %v3015_v38 = vsel %vm1661_vm15, %v3010_v17, 0 }
 0xa82   : > { %v4627_v43 = vpack.i.bf16 %v2476_v42, %v2475_v41  ;;  %2976 = vmatpush.bf16.xpose.msrb.mxu1 %v2967_v19  ;;  %3024 = vmatpush.bf16.xpose.msra.mxu0 %v3015_v38 }
 0xa84   : > { %4628 = vxpose.xlu2.b32.start.end [1/1] (short) (narrow) %v4627_v43, 16 }
 0xa87   : > { %v5775_v17 = vpop.trf.xlu1 }
 0xa89   : > { %v4595_v20 = vpop.trf.xlu2 }
 0xa8a   : > { %v4599_v26 = vunpack.i.h.bf16 %v4595_v20  ;;  %v4596_v50 = vunpack.i.l.bf16 %v4595_v20 }
 0xa8c   : > { %v2930_v33 = vpack.c.bf16 %v4599_v26, %v4599_v26  ;;  %v2926_v58 = vpack.c.bf16 %v4596_v50, %v4596_v50 }
 0xa8e   : > { %v3080_v49 = vunpack.c.l.b16 %v2930_v33  ;;  %v3032_v0 = vunpack.c.l.b16 %v2926_v58  ;;  %v4705_v58 = vld [vmem:[%s6033_s16] ss:$0 sm:$0xff] }
 0xa91   : > { %v4600_v37 = vpop.trf.xlu2 }
 0xa92   : > { %v4604_v44 = vunpack.i.h.bf16 %v4600_v37  ;;  %v4601_v2 = vunpack.i.l.bf16 %v4600_v37 }
 0xa94   : > { %v2931_v51 = vpack.c.bf16 %v4604_v44, %v4604_v44  ;;  %v2927_v59 = vpack.c.bf16 %v4601_v2, %v4601_v2 }
 0xa96   : > { %v3081_v52 = vunpack.c.l.b16 %v2931_v51  ;;  %v3033_v5 = vunpack.c.l.b16 %v2927_v59 }
 0xa98   : > { %v3082_v6 = vpack.c.b16 %v3081_v52, %v3080_v49  ;;  %v3034_v13 = vpack.c.b16 %v3033_v5, %v3032_v0  ;;  %v4706_v0 = vld [vmem:[%s6033_s16 + $0x1] ss:$0 sm:$0xff] }
 0xa99   : > { %v4605_v61 = vpop.trf.xlu2 }
 0xa9a   : > { %v3087_v53 = vsel %vm1661_vm15, %v3082_v6, 0  ;;  %v3039_v18 = vsel %vm1661_vm15, %v3034_v13, 0  ;;  %v4606_v39 = vunpack.i.l.bf16 %v4605_v61  ;;  %v4609_v20 = vunpack.i.h.bf16 %v4605_v61 }
 0xa9b   : > { %3096 = vmatpush.bf16.xpose.msrb.mxu3 %v3087_v53  ;;  %3048 = vmatpush.bf16.xpose.msra.mxu1 %v3039_v18  ;;  %v4639_v18 = vpack.i.bf16 %v5775_v17, %v5771_v9 }
 0xa9c   : > { %v2928_v41 = vpack.c.bf16 %v4606_v39, %v4606_v39  ;;  %v2932_v24 = vpack.c.bf16 %v4609_v20, %v4609_v20 }
 0xa9e   : > { %v3056_v43 = vunpack.c.l.b16 %v2928_v41  ;;  %v3104_v26 = vunpack.c.l.b16 %v2932_v24 }
 0xaa1   : > { %v4610_v16 = vpop.trf.xlu2 }
 0xaa2   : > { %v4611_v40 = vunpack.i.l.bf16 %v4610_v16  ;;  %v4614_v23 = vunpack.i.h.bf16 %v4610_v16 }
 0xaa4   : > { %v2929_v42 = vpack.c.bf16 %v4611_v40, %v4611_v40  ;;  %v2933_v25 = vpack.c.bf16 %v4614_v23, %v4614_v23 }
 0xaa6   : > { %v3057_v21 = vunpack.c.l.b16 %v2929_v42  ;;  %v3105_v27 = vunpack.c.l.b16 %v2933_v25 }
 0xaa8   : > { %v3058_v22 = vpack.c.b16 %v3057_v21, %v3056_v43  ;;  %v3106_v28 = vpack.c.b16 %v3105_v27, %v3104_v26 }
 0xaaa   : > { %v3063_v15 = vsel %vm1661_vm15, %v3058_v22, 0  ;;  %v3111_v34 = vsel %vm1661_vm15, %v3106_v28, 0 }
 0xaab   : > { %3072 = vmatpush.bf16.xpose.msra.mxu2 %v3063_v15 }
 0xb18   : > { %v4617_v29 = vpop.trf.xlu0 }
 0xb19   : > { %v4621_v30 = vunpack.i.h.bf16 %v4617_v29  ;;  %v4618_v31 = vunpack.i.l.bf16 %v4617_v29 }
 0xb1b   : > { %v2912_v32 = vpack.c.bf16 %v4621_v30, %v4621_v30  ;;  %v2910_v33 = vpack.c.bf16 %v4618_v31, %v4618_v31 }
 0xb1d   : > { %v4629_v35 = vpop.trf.xlu2  ;;  %4294 = vmatmul.msk.bf16.vlgmr.msrb.gmra.mxu0 %vm1661_vm15, %v2910_v33  ;;  %4296 = vmatmul.msk.bf16.vlgmr.msrb.gmra.mxu2 %vm1661_vm15, %v2912_v32 }
 0xb1e   : > { %v4633_v37 = vunpack.i.h.bf16 %v4629_v35  ;;  %3120 = vmatpush.bf16.xpose.msrb.mxu0 %v3111_v34  ;;  %v4630_v54 = vunpack.i.l.bf16 %v4629_v35  ;;  %v2639_v34 = vpop.trf.xlu1 }
 0xb20   : > { %v2916_v44 = vpack.c.bf16 %v4633_v37, %v4633_v37  ;;  %v4622_v46 = vpop.trf.xlu0  ;;  %v2914_v57 = vpack.c.bf16 %v4630_v54, %v4630_v54 }
 0xb21   : > { %v4623_v47 = vunpack.i.l.bf16 %v4622_v46  ;;  %v4626_v51 = vunpack.i.h.bf16 %v4622_v46 }
 0xb22   : > { %4300 = vmatmul.msk.bf16.vlgmr.msrb.gmra.mxu3 %vm1661_vm15, %v2916_v44 }
 0xb23   : > { %v2911_v36 = vpack.c.bf16 %v4623_v47, %v4623_v47  ;;  %v2913_v52 = vpack.c.bf16 %v4626_v51, %v4626_v51 }
 0xb25   : > { %4295 = vmatmul.msk.bf16.vlgmr.msrb.gmra.mxu1 %vm1661_vm15, %v2911_v36  ;;  %v4634_v49 = vpop.trf.xlu2 }
 0xb26   : > { %v4635_v50 = vunpack.i.l.bf16 %v4634_v49  ;;  %v4638_v55 = vunpack.i.h.bf16 %v4634_v49  ;;  %v2640_v35 = vpop.trf.xlu1 }
 0xb28   : > { %v2915_v2 = vpack.c.bf16 %v4635_v50, %v4635_v50  ;;  %v2917_v56 = vpack.c.bf16 %v4638_v55, %v4638_v55 }
 0xb2d   : > { %4297 = vmatmul.msk.bf16.vlgmr.msra.gmra.mxu0 %vm1661_vm15, %v2913_v52  ;;  %4299 = vmatmul.msk.bf16.vlgmr.msra.gmra.mxu2 %vm1661_vm15, %v2915_v2 }
 0xb35   : > { %4298 = vmatmul.msk.bf16.vlgmr.msra.gmra.mxu1 %vm1661_vm15, %v2914_v57 }
 0xb3d   : > { %4301 = vmatmul.msk.bf16.vlgmr.msrb.gmra.mxu0 %vm1661_vm15, %v2917_v56 }
 0xb9a   : > { %v2954_v59 = vpop.f32.mrf.mxu0 }
 0xb9b   : > { %v3126_v6 = vmul.f32 0.35355338, %v2954_v59 }
 0xb9d   : > { %v3140_v61 = vadd.f32 %v4705_v58, %v3126_v6 }
 0xb9f   : > { %v3149_v63 = vsel %vm3148_vm14, %v3140_v61, -inf }
 0xba0   : > { %v3002_v4 = vpop.f32.mrf.mxu2  ;;  %3150 = vmax.xlane.f32.xlu2 %v3149_v63 }
 0xba1   : > { %v3128_v53 = vmul.f32 0.35355338, %v3002_v4 }
 0xba2   : > { %v2956_v3 = vpop.f32.mrf.mxu0  ;;  %v2978_v5 = vpop.f32.mrf.mxu1 }
 0xba3   : > { %v3127_v7 = vmul.f32 0.35355338, %v2978_v5  ;;  %v3142_v8 = vadd.f32 %v4705_v58, %v3128_v53 }
 0xba5   : > { %v3098_v10 = vpop.f32.mrf.mxu3  ;;  %v3155_v60 = vsel %vm3148_vm14, %v3142_v8, -inf  ;;  %v3141_v11 = vadd.f32 %v4706_v0, %v3127_v7 }
 0xba6   : > { %3156 = vmax.xlane.f32.xlu0 %v3155_v60  ;;  %v3132_v39 = vmul.f32 0.35355338, %v3098_v10 }
 0xba7   : > { %v3152_v13 = vsel %vm3148_vm14, %v3141_v11, -inf }
 0xba8   : > { %3153 = vmax.xlane.f32.xlu1 %v3152_v13  ;;  %v3004_v14 = vpop.f32.mrf.mxu2  ;;  %v3146_v15 = vadd.f32 %v4705_v58, %v3132_v39 }
 0xbaa   : > { %v2980_v62 = vpop.f32.mrf.mxu1  ;;  %v3026_v16 = vpop.f32.mrf.mxu0  ;;  %v3167_v24 = vsel %vm3148_vm14, %v3146_v15, -inf }
 0xbab   : > { %v3129_v1 = vmul.f32 0.35355338, %v3026_v16 }
 0xbad   : > { %v3100_v19 = vpop.f32.mrf.mxu3  ;;  %v3143_v38 = vadd.f32 %v4706_v0, %v3129_v1 }
 0xbaf   : > { %v3158_v40 = vsel %vm3148_vm14, %v3143_v38, -inf }
 0xbb0   : > { %v3074_v41 = vpop.f32.mrf.mxu2  ;;  %3159 = vmax.xlane.f32.xlu1 %v3158_v40 }
 0xbb1   : > { %v3131_v42 = vmul.f32 0.35355338, %v3074_v41 }
 0xbb2   : > { %v3028_v43 = vpop.f32.mrf.mxu0  ;;  %v3050_v21 = vpop.f32.mrf.mxu1 }
 0xbb3   : > { %v3145_v22 = vadd.f32 %v4706_v0, %v3131_v42  ;;  %v3130_v20 = vmul.f32 0.35355338, %v3050_v21  ;;  %v4661_v43 = vpack.i.bf16 %v2640_v35, %v2639_v34 }
 0xbb5   : > { %v3164_v23 = vsel %vm3148_vm14, %v3145_v22, -inf  ;;  %v3144_v26 = vadd.f32 %v4705_v58, %v3130_v20 }
 0xbb6   : > { %3165 = vmax.xlane.f32.xlu0 %v3164_v23 }
 0xbb7   : > { %v3161_v30 = vsel %vm3148_vm14, %v3144_v26, -inf }
 0xbb8   : > { %v3076_v25 = vpop.f32.mrf.mxu2  ;;  %3168 = vmax.xlane.f32.xlu1 %v3167_v24 }
 0xbba   : > { %v3052_v27 = vpop.f32.mrf.mxu1  ;;  %v3122_v28 = vpop.f32.mrf.mxu0 }
 0xbbb   : > { %v3133_v29 = vmul.f32 0.35355338, %v3122_v28 }
 0xbbd   : > { %v3147_v31 = vadd.f32 %v4706_v0, %v3133_v29 }
 0xbbe   : > { %3162 = vmax.xlane.f32.xlu0 %v3161_v30 }
 0xbbf   : > { %v3170_v32 = vsel %vm3148_vm14, %v3147_v31, -inf }
 0xbc0   : > { %3171 = vmax.xlane.f32.xlu1 %v3170_v32 }
 0xbc2   : > { %v3124_v33 = vpop.f32.mrf.mxu0 }
 0xc13   : > { %v3151_v37 = vpop.xlane.xlu2 %3150 }
 0xc14   : > { %v3173_v44 = vsub.f32 %v3140_v61, %v3151_v37 }
 0xc16   : > { %v3181_v46 = vmul.f32 1.442695, %v3173_v44 }
 0xc18   : > { %4760 = vpow2.f32 %v3181_v46 }
 0xc19   : > { %v3157_v47 = vpop.xlane.xlu0 %3156 }
 0xc1a   : > { %v3175_v36 = vsub.f32 %v3142_v8, %v3157_v47 }
 0xc1b   : > { %v3154_v49 = vpop.xlane.xlu1 %3153 }
 0xc1c   : > { %v3185_v50 = vmul.f32 1.442695, %v3175_v36  ;;  %v3174_v51 = vsub.f32 %v3141_v11, %v3154_v49 }
 0xc1e   : > { %v5784_v2 = vpop.eup %4760  ;;  %4762 = vpow2.f32 %v3185_v50  ;;  %v3183_v52 = vmul.f32 1.442695, %v3174_v51 }
 0xc1f   : > { %v3197_v54 = vsel %vm3148_vm14, %v5784_v2, 0.0 }
 0xc20   : > { %4764 = vpow2.f32 %v3183_v52  ;;  %3198 = vadd.xlane.f32.xlu1 %v3197_v54 }
 0xc23   : > { %v3160_v57 = vpop.xlane.xlu1 %3159 }
 0xc24   : > { %v5788_v55 = vpop.eup %4762  ;;  %v3176_v56 = vsub.f32 %v3143_v38, %v3160_v57 }
 0xc25   : > { %v3203_v58 = vsel %vm3148_vm14, %v5788_v55, 0.0 }
 0xc26   : > { %v5792_v59 = vpop.eup %4764  ;;  %v3187_v6 = vmul.f32 1.442695, %v3176_v56  ;;  %3204 = vadd.xlane.f32.xlu0 %v3203_v58 }
 0xc27   : > { %v3200_v61 = vsel %vm3148_vm14, %v5792_v59, 0.0 }
 0xc28   : > { %4766 = vpow2.f32 %v3187_v6  ;;  %3201 = vadd.xlane.f32.xlu2 %v3200_v61 }
 0xc29   : > { %v3166_v63 = vpop.xlane.xlu0 %3165 }
 0xc2a   : > { %v3178_v4 = vsub.f32 %v3145_v22, %v3166_v63 }
 0xc2b   : > { %v3169_v53 = vpop.xlane.xlu1 %3168 }
 0xc2c   : > { %v3191_v0 = vmul.f32 1.442695, %v3178_v4  ;;  %v3179_v3 = vsub.f32 %v3146_v15, %v3169_v53 }
 0xc2e   : > { %v5796_v5 = vpop.eup %4766  ;;  %4768 = vpow2.f32 %v3191_v0  ;;  %v3193_v7 = vmul.f32 1.442695, %v3179_v3 }
 0xc2f   : > { %v3206_v8 = vsel %vm3148_vm14, %v5796_v5, 0.0 }
 0xc30   : > { %4770 = vpow2.f32 %v3193_v7  ;;  %3207 = vadd.xlane.f32.xlu2 %v3206_v8 }
 0xc31   : > { %v3163_v10 = vpop.xlane.xlu0 %3162 }
 0xc32   : > { %v3177_v60 = vsub.f32 %v3144_v26, %v3163_v10 }
 0xc33   : > { %v3172_v11 = vpop.xlane.xlu1 %3171 }
 0xc34   : > { %v5800_v13 = vpop.eup %4768  ;;  %v3189_v14 = vmul.f32 1.442695, %v3177_v60  ;;  %v3180_v62 = vsub.f32 %v3147_v31, %v3172_v11 }
 0xc35   : > { %v3212_v16 = vsel %vm3148_vm14, %v5800_v13, 0.0 }
 0xc36   : > { %v5804_v1 = vpop.eup %4770  ;;  %4772 = vpow2.f32 %v3189_v14  ;;  %v3195_v19 = vmul.f32 1.442695, %v3180_v62  ;;  %3213 = vadd.xlane.f32.xlu0 %v3212_v16 }
 0xc37   : > { %v3215_v38 = vsel %vm3148_vm14, %v5804_v1, 0.0 }
 0xc38   : > { %4774 = vpow2.f32 %v3195_v19  ;;  %3216 = vadd.xlane.f32.xlu1 %v3215_v38 }
 0xc3c   : > { %v5808_v39 = vpop.eup %4772 }
 0xc3d   : > { %v3209_v40 = vsel %vm3148_vm14, %v5808_v39, 0.0 }
 0xc3e   : > { %v5812_v41 = vpop.eup %4774  ;;  %3210 = vadd.xlane.f32.xlu0 %v3209_v40 }
 0xc3f   : > { %v3218_v42 = vsel %vm3148_vm14, %v5812_v41, 0.0 }
 0xc40   : > { %3219 = vadd.xlane.f32.xlu1 %v3218_v42 }
 0xc59   : > { %4640 = vxpose.xlu2.b32.start.end [1/1] (short) (narrow) %v4639_v18, 32 }
 0xc67   : > { %4662 = vxpose.xlu0.b32.start.end [1/1] (short) (narrow) %v4661_v43, 32 }
 0xc93   : > { %v3199_v23 = vpop.xlane.xlu1 %3198 }
 0xc94   : > { %4776 = vrcp.f32 %v3199_v23 }
 0xc99   : > { %v3205_v15 = vpop.xlane.xlu0 %3204 }
 0xc9a   : > { %4778 = vrcp.f32 %v3205_v15  ;;  %v4777_v9 = vpop.eup %4776 }
 0xc9b   : > { %v3202_v21 = vpop.xlane.xlu2 %3201  ;;  %v3229_v44 = vmul.f32 %v4777_v9, %v5784_v2 }
 0xc9c   : > { %4780 = vrcp.f32 %v3202_v21 }
 0xc9d   : > { %v3237_v51 = vpack.c.bf16 %v3229_v44, %v3229_v44 }
 0xca0   : > { %v4779_v17 = vpop.eup %4778 }
 0xca1   : > { %v3231_v46 = vmul.f32 %v4779_v17, %v5788_v55 }
 0xca2   : > { %v4781_v56 = vpop.eup %4780 }
 0xca3   : > { %v3208_v22 = vpop.xlane.xlu2 %3207  ;;  %v3239_v52 = vpack.c.bf16 %v3231_v46, %v3231_v46  ;;  %v3230_v0 = vmul.f32 %v4781_v56, %v5792_v59 }
 0xca4   : > { %4782 = vrcp.f32 %v3208_v22 }
 0xca5   : > { %v3238_v40 = vpack.c.bf16 %v3230_v0, %v3230_v0 }
 0xca9   : > { %v5819_v26 = vpop.xlane.xlu0 %3213 }
 0xcaa   : > { %v4783_v6 = vpop.eup %4782 }
 0xcab   : > { %v3217_v61 = vpop.xlane.xlu1 %3216  ;;  %v3232_v8 = vmul.f32 %v4783_v6, %v5796_v5 }
 0xcac   : > { %4784 = vrcp.f32 %v3217_v61 }
 0xcad   : > { %v3240_v42 = vpack.c.bf16 %v3232_v8, %v3232_v8 }
 0xcb1   : > { %v3211_v50 = vpop.xlane.xlu0 %3210 }
 0xcb2   : > { %4786 = vrcp.f32 %v3211_v50  ;;  %v4785_v59 = vpop.eup %4784 }
 0xcb3   : > { %4788 = vrcp.f32 %v5819_v26 }
 0xcf2   : > { %v4641_v20 = vpop.trf.xlu2 }
 0xcf3   : > { %v4645_v24 = vunpack.i.h.bf16 %v4641_v20  ;;  %v4642_v25 = vunpack.i.l.bf16 %v4641_v20  ;;  %v4787_v20 = vpop.eup %4786 }
 0xcf5   : > { %v3249_v27 = vpack.c.bf16 %v4645_v24, %v4645_v24  ;;  %v3245_v28 = vpack.c.bf16 %v4642_v25, %v4642_v25 }
 0xcf7   : > { %v3307_v33 = vunpack.c.l.b16 %v3249_v27  ;;  %v3263_v34 = vunpack.c.l.b16 %v3245_v28 }
 0xcfa   : > { %v4646_v29 = vpop.trf.xlu2 }
 0xcfb   : > { %v4650_v30 = vunpack.i.h.bf16 %v4646_v29  ;;  %v4647_v31 = vunpack.i.l.bf16 %v4646_v29 }
 0xcfd   : > { %v3250_v18 = vpack.c.bf16 %v4650_v30, %v4650_v30  ;;  %v3246_v32 = vpack.c.bf16 %v4647_v31, %v4647_v31  ;;  %v3235_v30 = vmul.f32 %v4785_v59, %v5804_v1  ;;  %v3233_v31 = vmul.f32 %v4787_v20, %v5808_v39 }
 0xcff   : > { %v3308_v35 = vunpack.c.l.b16 %v3250_v18  ;;  %v3264_v37 = vunpack.c.l.b16 %v3246_v32  ;;  %v3243_v32 = vpack.c.bf16 %v3235_v30, %v3235_v30 }
 0xd01   : > { %v3265_v47 = vpack.c.b16 %v3264_v37, %v3263_v34  ;;  %v3309_v36 = vpack.c.b16 %v3308_v35, %v3307_v33  ;;  %v3241_v33 = vpack.c.bf16 %v3233_v31, %v3233_v31  ;;  %v3220_v34 = vpop.xlane.xlu1 %3219 }
 0xd02   : > { %v4651_v49 = vpop.trf.xlu2  ;;  %4790 = vrcp.f32 %v3220_v34 }
 0xd03   : > { %3277 = vmatpush.bf16.msrb.mxu1 %v3265_v47  ;;  %3321 = vmatpush.bf16.msra.mxu3 %v3309_v36  ;;  %v4655_v54 = vunpack.i.h.bf16 %v4651_v49  ;;  %v4652_v57 = vunpack.i.l.bf16 %v4651_v49  ;;  %v4789_v36 = vpop.eup %4788 }
 0xd04   : > { %v3234_v56 = vmul.f32 %v4789_v36, %v5800_v13 }
 0xd05   : > { %v3251_v2 = vpack.c.bf16 %v4655_v54, %v4655_v54  ;;  %v3247_v58 = vpack.c.bf16 %v4652_v57, %v4652_v57 }
 0xd06   : > { %4302 = vmatmul.msk.bf16.vlgmr.msrb.gmra.mxu1 %vm3148_vm14, %v3237_v51  ;;  %4304 = vmatmul.msk.bf16.vlgmr.msra.gmra.mxu3 %vm3148_vm14, %v3239_v52  ;;  %v3242_v6 = vpack.c.bf16 %v3234_v56, %v3234_v56 }
 0xd07   : > { %v3329_v10 = vunpack.c.l.b16 %v3251_v2  ;;  %v3285_v60 = vunpack.c.l.b16 %v3247_v58 }
 0xd08   : > { %v4791_v49 = vpop.eup %4790 }
 0xd09   : > { %v3236_v2 = vmul.f32 %v4791_v49, %v5812_v41 }
 0xd0a   : > { %v4656_v55 = vpop.trf.xlu2 }
 0xd0b   : > { %v4660_v63 = vunpack.i.h.bf16 %v4656_v55  ;;  %v4657_v4 = vunpack.i.l.bf16 %v4656_v55  ;;  %v4663_v53 = vpop.trf.xlu0  ;;  %v3244_v61 = vpack.c.bf16 %v3236_v2, %v3236_v2 }
 0xd0c   : > { %v4667_v62 = vunpack.i.h.bf16 %v4663_v53  ;;  %v4664_v16 = vunpack.i.l.bf16 %v4663_v53 }
 0xd0d   : > { %v3252_v3 = vpack.c.bf16 %v4660_v63, %v4660_v63  ;;  %v3248_v7 = vpack.c.bf16 %v4657_v4, %v4657_v4 }
 0xd0e   : > { %v3257_v43 = vpack.c.bf16 %v4667_v62, %v4667_v62  ;;  %v3253_v21 = vpack.c.bf16 %v4664_v16, %v4664_v16 }
 0xd0f   : > { %v3330_v11 = vunpack.c.l.b16 %v3252_v3  ;;  %v3286_v14 = vunpack.c.l.b16 %v3248_v7 }
 0xd10   : > { %v3395_v25 = vunpack.c.l.b16 %v3257_v43  ;;  %v3351_v27 = vunpack.c.l.b16 %v3253_v21 }
 0xd11   : > { %v3287_v19 = vpack.c.b16 %v3286_v14, %v3285_v60  ;;  %v3331_v38 = vpack.c.b16 %v3330_v11, %v3329_v10 }
 0xd13   : > { %v4668_v22 = vpop.trf.xlu0  ;;  %3299 = vmatpush.bf16.msrb.mxu2 %v3287_v19  ;;  %3343 = vmatpush.bf16.msra.mxu0 %v3331_v38 }
 0xd14   : > { %v4672_v15 = vunpack.i.h.bf16 %v4668_v22  ;;  %v4669_v5 = vunpack.i.l.bf16 %v4668_v22 }
 0xd16   : > { %v3258_v23 = vpack.c.bf16 %v4672_v15, %v4672_v15  ;;  %v3254_v24 = vpack.c.bf16 %v4669_v5, %v4669_v5  ;;  %4303 = vmatmul.msk.bf16.vlgmr.msrb.gmra.mxu2 %vm3148_vm14, %v3238_v40  ;;  %4305 = vmatmul.msk.bf16.vlgmr.msra.gmra.mxu0 %vm3148_vm14, %v3240_v42 }
 0xd18   : > { %v3396_v28 = vunpack.c.l.b16 %v3258_v23  ;;  %v3352_v29 = vunpack.c.l.b16 %v3254_v24  ;;  %v4369_v23 = vld [vmem:[%s6034_s0 + $0x8] sm:$0xff]  ;;  %v4368_v24 = vld [vmem:[%s6035_s1] sm:$0xff] }
 0xd1a   : > { %v3353_v9 = vpack.c.b16 %v3352_v29, %v3351_v27  ;;  %v3397_v17 = vpack.c.b16 %v3396_v28, %v3395_v25  ;;  %v4707_v29 = vld [vmem:[%s1068_s13] ss:$0 sm:$0xff]  ;;  %s6038_s13 = smov %s6037_s4 }
 0xd1b   : > { %v4673_v18 = vpop.trf.xlu0 }
 0xd1c   : > { %3365 = vmatpush.bf16.msra.mxu1 %v3353_v9  ;;  %3409 = vmatpush.bf16.msrb.mxu3 %v3397_v17  ;;  %v4677_v35 = vunpack.i.h.bf16 %v4673_v18  ;;  %v4674_v37 = vunpack.i.l.bf16 %v4673_v18 }
 0xd1e   : > { %v3259_v1 = vpack.c.bf16 %v4677_v35, %v4677_v35  ;;  %v3255_v44 = vpack.c.bf16 %v4674_v37, %v4674_v37 }
 0xd1f   : > { %4306 = vmatmul.msk.bf16.vlgmr.msra.gmra.mxu1 %vm3148_vm14, %v3241_v33  ;;  %4308 = vmatmul.msk.bf16.vlgmr.msrb.gmra.mxu3 %vm3148_vm14, %v3243_v32 }
 0xd20   : > { %v3417_v52 = vunpack.c.l.b16 %v3259_v1  ;;  %v3373_v54 = vunpack.c.l.b16 %v3255_v44  ;;  %3622 = vmatpush.bf16.msrb.mxu1 %v4369_v23 }
 0xd23   : > { %v4678_v39 = vpop.trf.xlu0 }
 0xd24   : > { %v4682_v46 = vunpack.i.h.bf16 %v4678_v39  ;;  %v4679_v47 = vunpack.i.l.bf16 %v4678_v39  ;;  %3623 = vmatpush.bf16.msrb.mxu1 %v4368_v24 }
 0xd26   : > { %v3260_v50 = vpack.c.bf16 %v4682_v46, %v4682_v46  ;;  %v3256_v51 = vpack.c.bf16 %v4679_v47, %v4679_v47 }
 0xd28   : > { %v3418_v57 = vunpack.c.l.b16 %v3260_v50  ;;  %v3374_v26 = vunpack.c.l.b16 %v3256_v51  ;;  %v4371_v51 = vld [vmem:[%s6037_s4 + $0x8] sm:$0xff] }
 0xd2a   : > { %v3375_v58 = vpack.c.b16 %v3374_v26, %v3373_v54  ;;  %v3419_v55 = vpack.c.b16 %v3418_v57, %v3417_v52  ;;  %v4370_v52 = vld [vmem:[%s6038_s13] sm:$0xff] }
 0xd2c   : > { %3387 = vmatpush.bf16.msra.mxu2 %v3375_v58  ;;  %3431 = vmatpush.bf16.msrb.mxu0 %v3419_v55 }
 0xd2f   : > { %4307 = vmatmul.msk.bf16.vlgmr.msra.gmra.mxu2 %vm3148_vm14, %v3242_v6  ;;  %4309 = vmatmul.msk.bf16.vlgmr.msrb.gmra.mxu0 %vm3148_vm14, %v3244_v61 }
 0xd30   : > { %3753 = vmatpush.bf16.msrb.mxu2 %v4371_v51  ;;  %v4372_v51 = vld [vmem:[%s5549_s8] sm:$0xff] }
 0xd34   : > { %3754 = vmatpush.bf16.msrb.mxu2 %v4370_v52 }
 0xd83   : > { %v3279_v63 = vpop.f32.mrf.mxu1 }
 0xd89   : > { %v3323_v4 = vpop.f32.mrf.mxu3 }
 0xd8a   : > { %v4683_v53 = vpack.i.bf16 %v3323_v4, %v3279_v63 }
 0xd8b   : > { %v3281_v0 = vpop.f32.mrf.mxu1 }
 0xd8c   : > { %4684 = vxpose.xlu1.b32.start [1/2] (short) (narrow) %v4683_v53, 8 }
 0xd91   : > { %v3325_v3 = vpop.f32.mrf.mxu3 }
 0xd93   : > { %v3345_v7 = vpop.f32.mrf.mxu0 }
 0xd99   : > { %v3301_v13 = vpop.f32.mrf.mxu2 }
 0xd9a   : > { %v4685_v8 = vpack.i.bf16 %v3345_v7, %v3301_v13 }
 0xd9b   : > { %v3347_v41 = vpop.f32.mrf.mxu0 }
 0xd9c   : > { %v3367_v10 = vpop.f32.mrf.mxu1  ;;  %4686 = vxpose.xlu1.b32.end [2/2] (short) (narrow) %v4685_v8, 8 }
 0xda1   : > { %v3303_v60 = vpop.f32.mrf.mxu2 }
 0xda2   : > { %v3411_v11 = vpop.f32.mrf.mxu3 }
 0xda3   : > { %v4692_v14 = vpack.i.bf16 %v3411_v11, %v3367_v10 }
 0xda4   : > { %v3369_v62 = vpop.f32.mrf.mxu1 }
 0xda5   : > { %4693 = vxpose.xlu2.b32.start [1/2] (short) (narrow) %v4692_v14, 8 }
 0xdaa   : > { %v3413_v16 = vpop.f32.mrf.mxu3 }
 0xdac   : > { %v3433_v19 = vpop.f32.mrf.mxu0 }
 0xdb2   : > { %v3389_v38 = vpop.f32.mrf.mxu2 }
 0xdb3   : > { %v4694_v40 = vpack.i.bf16 %v3433_v19, %v3389_v38 }
 0xdb4   : > { %v3435_v42 = vpop.f32.mrf.mxu0 }
 0xdb5   : > { %4695 = vxpose.xlu2.b32.end [2/2] (short) (narrow) %v4694_v40, 8 }
 0xdba   : > { %v3391_v43 = vpop.f32.mrf.mxu2 }
 0xdbb   : > { %v4800_v43 = vld [vmem:[%s5503_s2] sm:$0x7]  ;;  %s6040_s2 = scalar_lea.vmem [#allocation14], %s5471_s3 }
 0xe38   : > { %v4687_v21 = vpop.trf.xlu1 }
 0xe39   : > { %v4688_v22 = vunpack.i.l.bf16 %v4687_v21  ;;  %v4691_v59 = vunpack.i.h.bf16 %v4687_v21  ;;  %v3652_v21 = vperm.slane %v4800_v43, 2 }
 0xe3b   : > { %3565 = vxpose.xlu0.b32.start [1/4] (short) (narrow) %v4688_v22, 16 }
 0xe43   : > { %3566 = vxpose.xlu0.b32.cont [2/4] (short) (narrow) %v4691_v59, 16 }
 0xe46   : > { %v4696_v15 = vpop.trf.xlu2 }
 0xe47   : > { %v4697_v5 = vunpack.i.l.bf16 %v4696_v15  ;;  %v4700_v20 = vunpack.i.h.bf16 %v4696_v15 }
 0xe4b   : > { %3567 = vxpose.xlu0.b32.cont [3/4] (short) (narrow) %v4697_v5, 16 }
 0xe53   : > { %3568 = vxpose.xlu0.b32.end [4/4] (short) (narrow) %v4700_v20, 16  ;;  %v4801_v20 = vld [vmem:[%s5508_s20] sm:$0x7]  ;;  %s6041_s20 = sld [smem:[#allocation25_spill]] }
 0xe54   : > { %v3711_v23 = vperm.slane %v4801_v20, 2 }
 0xe59   : > { %p4345_p4 = scmp.ge.s32.totalorder %s6041_s20, 1 }
 0xedf   : > { %v3581_v25 = vpop.trf.xlu0 }
 0xee7   : > { %v3582_v27 = vpop.trf.xlu0 }
 0xee8   : > { %v3597_v28 = vpack.c.bf16 %v3582_v27, %v3581_v25 }
 0xeea   : > { %4318 = vmatmul.msk.bf16.vlgmr.msrb.gmra.mxu1 %vm1096_vm1, %v3597_v28 }
 0xf67   : > { %v3625_v30 = vpop.f32.mrf.mxu1 }
 0xf68   : > { %v3626_v31 = vadd.f32 %v4707_v29, %v3625_v30 }
 0xf6a   : > { %v5849_v9 = vadd.f32 %v3626_v31, %v5702_v45 }
 0xf6c   : > { %v3632_v17 = vsel %vm1096_vm1, %v5849_v9, 0.0 }
 0xf6d   : > { %3633 = vadd.xlane.f32.xlu1 %v3632_v17 }
 0xf6f   : > { %v3627_v18 = vpop.f32.mrf.mxu1 }
 0xf70   : > { %v3628_v32 = vadd.f32 %v4707_v29, %v3627_v18 }
 0xf72   : > { %v5854_v33 = vadd.f32 %v3628_v32, %v5707_v48 }
 0xf74   : > { %v3635_v34 = vsel %vm1096_vm1, %v5854_v33, 0.0 }
 0xf75   : > { %3636 = vadd.xlane.f32.xlu2 %v3635_v34 }
 0xfe0   : > { %v3634_v35 = vpop.xlane.xlu1 %3633 }
 0xfe1   : > { %v3638_v37 = vmul.f32 %v3634_v35, %v5561_v12 }
 0xfe3   : > { %v5860_v45 = vsub.f32 %v5849_v9, %v3638_v37 }
 0xfe5   : > { %v3642_v1 = vmul.f32 %v5860_v45, %v5860_v45  ;;  %v3653_v25 = vmul.f32 %v3652_v21, %v5860_v45 }
 0xfe7   : > { %v3644_v44 = vsel %vm1096_vm1, %v3642_v1, 0.0 }
 0xfe8   : > { %v3637_v39 = vpop.xlane.xlu2 %3636  ;;  %3645 = vadd.xlane.f32.xlu0 %v3644_v44 }
 0xfe9   : > { %v3639_v48 = vmul.f32 %v3637_v39, %v5561_v12 }
 0xfeb   : > { %v5867_v46 = vsub.f32 %v5854_v33, %v3639_v48 }
 0xfed   : > { %v3643_v47 = vmul.f32 %v5867_v46, %v5867_v46  ;;  %v3654_v45 = vmul.f32 %v3652_v21, %v5867_v46  ;;  %v4708_v46 = vld [vmem:[%s6039_s6] ss:$0 sm:$0xff] }
 0xfef   : > { %v3647_v36 = vsel %vm1096_vm1, %v3643_v47, 0.0 }
 0xff0   : > { %3648 = vadd.xlane.f32.xlu1 %v3647_v36  ;;  %v4375_v36 = vld [vmem:[%s5549_s8 + $0x18] sm:$0xff] }
 0xff1   : > { %3796 = vmatpush.bf16.msra.mxu3 %v4375_v36 }
0x105b   : > { %v3646_v49 = vpop.xlane.xlu0 %3645 }
0x105c   : > { %v3650_v50 = vmul.f32 0.032258064, %v3646_v49  ;;  %v4374_v49 = vld [vmem:[%s5549_s8 + $0x10] sm:$0xff] }
0x105d   : > { %3797 = vmatpush.bf16.msra.mxu3 %v4374_v49 }
0x105e   : > { %4792 = vrsqrt.f32 %v3650_v50  ;;  %vm3662_vm15 = vcmp.eq.f32.partialorder %v3650_v50, inf  ;;  %v3665_v0 = vand.u32 2147483648, %v3650_v50  ;;  %vm3664_vm0 = vcmp.eq.f32.partialorder %v3650_v50, 0.0 }
0x1063   : > { %v3649_v54 = vpop.xlane.xlu1 %3648 }
0x1064   : > { %v4793_v57 = vpop.eup %4792  ;;  %v3651_v26 = vmul.f32 0.032258064, %v3649_v54 }
0x1065   : > { %v3656_v56 = vmul.f32 %v4793_v57, %v3650_v50 }
0x1066   : > { %4794 = vrsqrt.f32 %v3651_v26  ;;  %vm3674_vm2 = vcmp.eq.f32.partialorder %v3651_v26, inf  ;;  %v3677_v11 = vand.u32 2147483648, %v3651_v26  ;;  %vm3676_vm3 = vcmp.eq.f32.partialorder %v3651_v26, 0.0 }
0x1067   : > { %v3657_v2 = vmul.f32 %v4793_v57, %v3656_v56 }
0x1069   : > { %v3658_v58 = vmul.f32 0.5, %v3657_v2 }
0x106b   : > { %v3659_v55 = vsub.f32 1.5, %v3658_v58 }
0x106c   : > { %v4795_v6 = vpop.eup %4794 }
0x106d   : > { %v3660_v61 = vmul.f32 %v4793_v57, %v3659_v55  ;;  %v3668_v63 = vmul.f32 %v4795_v6, %v3651_v26  ;;  %v4709_v55 = vld [vmem:[%s6040_s2] ss:$0 sm:$0xff] }
0x106f   : > { %v3661_v4 = vmul.f32 %v3660_v61, %v3650_v50  ;;  %v3669_v53 = vmul.f32 %v4795_v6, %v3668_v63 }
0x1071   : > { %v3663_v3 = vsel %vm3662_vm15, %v3650_v50, %v3661_v4  ;;  %v3670_v7 = vmul.f32 0.5, %v3669_v53  ;;  %v4373_v50 = vld [vmem:[%s5549_s8 + $0x8] sm:$0xff] }
0x1072   : > { %v3666_v13 = vsel %vm3664_vm0, %v3665_v0, %v3663_v3  ;;  %3798 = vmatpush.bf16.msra.mxu3 %v4373_v50 }
0x1073   : > { %v3679_v8 = vadd.f32 1e-06, %v3666_v13  ;;  %v3671_v41 = vsub.f32 1.5, %v3670_v7 }
0x1075   : > { %4796 = vrcp.f32 %v3679_v8  ;;  %v3672_v10 = vmul.f32 %v4795_v6, %v3671_v41  ;;  %v3692_v42 = vand.u32 2147483648, %v3679_v8  ;;  %v3690_v59 = vand.u32 2147483647, %v3679_v8 }
0x1076   : > { %vm3686_vm5 = vweird.f32 %v3679_v8  ;;  %3799 = vmatpush.bf16.msra.mxu3 %v4372_v51 }
0x1077   : > { %v3673_v60 = vmul.f32 %v3672_v10, %v3651_v26  ;;  %v3693_v24 = vor.u32 1.1754944e-38, %v3692_v42  ;;  %vm3691_vm7 = vcmp.eq.f32.partialorder %v3690_v59, 8.507059e+37 }
0x1079   : > { %v3675_v14 = vsel %vm3674_vm2, %v3651_v26, %v3673_v60 }
0x107a   : > { %v3678_v62 = vsel %vm3676_vm3, %v3677_v11, %v3675_v14 }
0x107b   : > { %v4797_v16 = vpop.eup %4796  ;;  %v3680_v19 = vadd.f32 1e-06, %v3678_v62 }
0x107c   : > { %v3682_v38 = vmul.f32 %v4797_v16, %v3679_v8  ;;  %vm3687_vm4 = vweird.f32 %v4797_v16 }
0x107d   : > { %4798 = vrcp.f32 %v3680_v19  ;;  %vm3688_vm6 = vmor %vm3686_vm5, %vm3687_vm4  ;;  %v3707_v17 = vand.u32 2147483648, %v3680_v19  ;;  %v3705_v32 = vand.u32 2147483647, %v3680_v19  ;;  %vm3701_vm9 = vweird.f32 %v3680_v19 }
0x107e   : > { %v3683_v40 = vsub.f32 1.0, %v3682_v38 }
0x107f   : > { %v3708_v37 = vor.u32 1.1754944e-38, %v3707_v17  ;;  %vm3706_vm11 = vcmp.eq.f32.partialorder %v3705_v32, 8.507059e+37 }
0x1080   : > { %v3684_v22 = vmul.f32 %v4797_v16, %v3683_v40 }
0x1082   : > { %v3685_v15 = vadd.f32 %v4797_v16, %v3684_v22 }
0x1083   : > { %v4799_v5 = vpop.eup %4798 }
0x1084   : > { %v3689_v27 = vsel %vm3688_vm6, %v4797_v16, %v3685_v15  ;;  %v3697_v28 = vmul.f32 %v4799_v5, %v3680_v19  ;;  %vm3702_vm8 = vweird.f32 %v4799_v5 }
0x1085   : > { %v3694_v29 = vsel %vm3691_vm7, %v3693_v24, %v3689_v27  ;;  %vm3703_vm10 = vmor %vm3701_vm9, %vm3702_vm8 }
0x1086   : > { %v3695_v30 = vmul.f32 %v3694_v29, %v3653_v25  ;;  %v3698_v31 = vsub.f32 1.0, %v3697_v28 }
0x1088   : > { %v3699_v18 = vmul.f32 %v4799_v5, %v3698_v31  ;;  %v3712_v34 = vadd.f32 %v3711_v23, %v3695_v30 }
0x108a   : > { %v3700_v35 = vadd.f32 %v4799_v5, %v3699_v18 }
0x108c   : > { %v3704_v1 = vsel %vm3703_vm10, %v4799_v5, %v3700_v35 }
0x108d   : > { %v3709_v44 = vsel %vm3706_vm11, %v3708_v37, %v3704_v1 }
0x108e   : > { %v3710_v39 = vmul.f32 %v3709_v44, %v3654_v45 }
0x1090   : > { %v3713_v48 = vadd.f32 %v3711_v23, %v3710_v39 }
0x1092   : > { %v3714_v47 = vpack.c.bf16 %v3713_v48, %v3712_v34 }
0x1094   : > { %4327 = vmatmul.msk.bf16.vlgmr.msrb.gmra.mxu2 %vm1096_vm1, %v3714_v47 }
0x1117   : > { %v3756_v52 = vpop.f32.mrf.mxu2 }
0x1118   : > { %v3757_v54 = vadd.f32 %v4708_v46, %v3756_v52 }
0x111a   : > { %v3761_v56 = vmax.f32 %v3757_v54, 0.0 }
0x111f   : > { %v3758_v57 = vpop.f32.mrf.mxu2 }
0x1120   : > { %v3759_v26 = vadd.f32 %v4708_v46, %v3758_v57 }
0x1122   : > { %v3762_v2 = vmax.f32 %v3759_v26, 0.0 }
0x1124   : > { %v3763_v58 = vpack.c.bf16 %v3762_v2, %v3761_v56 }
0x1126   : > { %4344 = vmatmul.msk.bf16.vlgmr.msra.gmra.mxu3 %vm3788_vm12, %v3763_v58 }
0x11a9   : > { %v3801_v6 = vpop.f32.mrf.mxu3 }
0x11aa   : > { %v3806_v61 = vadd.f32 %v3801_v6, %v5849_v9 }
0x11ac   : > { %v3811_v63 = vadd.f32 %v4709_v55, %v3806_v61 }
0x11b0   : > { %3816 = sbr.rel (%p4345_p4) target bundleno = 4535 (0x11b7), region = 148 }
0x11b1   : > { %v3803_v4 = vpop.f32.mrf.mxu3 }
0x11b2   : > { %v3807_v53 = vadd.f32 %v3803_v4, %v5854_v33 }
0x11b4   : > { %v3812_v0 = vadd.f32 %v4709_v55, %v3807_v53 }
0x11b5   : > { %3817 = vst.msk [vmem:[#allocation16] sm:$0xff] %vm1096_vm1, %v3811_v63 }
0x11b6   : > { %3818 = vst.msk [vmem:[#allocation16 + $0x8] sm:$0xff] %vm1096_vm1, %v3812_v0 }
0x11b7 PF: > { %s6042_s8 = sld [smem:[#allocation25_spill]] }
0x11bd   : > { %p4346_p5 = scmp.ne.s32.totalorder %s6042_s8, 1 }
0x11be   : > { %s6043_s28 = sld [smem:[#allocation48_spill]] (!%p4346_p5) }
0x11bf   : > { %3822 = sbr.rel (%p4346_p5) target bundleno = 4843 (0x12eb), region = 152  ;;  %s6044_s18 = sld [smem:[#allocation49_spill]] (!%p4346_p5) }
0x11c4   : > { %v3825_v3 = vsel %vm1096_vm1, %v3811_v63, 0.0  ;;  %v3828_v9 = vsel %vm1096_vm1, %v3812_v0, 0.0  ;;  %v4802_v39 = vld [vmem:[%s6043_s28] ss:$0 sm:$0xff] }
0x11c5   : > { %3826 = vadd.xlane.f32.xlu0 %v3825_v3  ;;  %v4803_v46 = vld [vmem:[%s6044_s18] ss:$0 sm:$0xff] }
0x11cd   : > { %3829 = vadd.xlane.f32.xlu0 %v3828_v9 }
0x1238   : > { %v3827_v7 = vpop.xlane.xlu0 %3826 }
0x1239   : > { %v3831_v33 = vmul.f32 %v3827_v7, %v5561_v12 }
0x123b   : > { %v3833_v13 = vsub.f32 %v3811_v63, %v3831_v33 }
0x123d   : > { %v3835_v8 = vmul.f32 %v3833_v13, %v3833_v13  ;;  %v3848_v51 = vmul.f32 %v4802_v39, %v3833_v13 }
0x123f   : > { %v3837_v41 = vsel %vm1096_vm1, %v3835_v8, 0.0 }
0x1240   : > { %3838 = vadd.xlane.f32.xlu1 %v3837_v41  ;;  %v3830_v10 = vpop.xlane.xlu0 %3829 }
0x1241   : > { %v3832_v60 = vmul.f32 %v3830_v10, %v5561_v12 }
0x1243   : > { %v5900_v11 = vsub.f32 %v3812_v0, %v3832_v60 }
0x1245   : > { %v3836_v14 = vmul.f32 %v5900_v11, %v5900_v11  ;;  %v3849_v4 = vmul.f32 %v4802_v39, %v5900_v11 }
0x1247   : > { %v3840_v62 = vsel %vm1096_vm1, %v3836_v14, 0.0 }
0x1248   : > { %3841 = vadd.xlane.f32.xlu1 %v3840_v62 }
0x12b3   : > { %v3839_v16 = vpop.xlane.xlu1 %3838 }
0x12b4   : > { %v3843_v19 = vmul.f32 0.032258064, %v3839_v16 }
0x12b6   : > { %4804 = vrsqrt.f32 %v3843_v19  ;;  %vm3857_vm13 = vcmp.eq.f32.partialorder %v3843_v19, inf  ;;  %v3860_v24 = vand.u32 2147483648, %v3843_v19  ;;  %vm3859_vm14 = vcmp.eq.f32.partialorder %v3843_v19, 0.0 }
0x12bb   : > { %v3842_v38 = vpop.xlane.xlu1 %3841 }
0x12bc   : > { %v4805_v40 = vpop.eup %4804  ;;  %v3844_v42 = vmul.f32 0.032258064, %v3842_v38 }
0x12bd   : > { %v3851_v43 = vmul.f32 %v4805_v40, %v3843_v19 }
0x12be   : > { %4806 = vrsqrt.f32 %v3844_v42  ;;  %vm3869_vm15 = vcmp.eq.f32.partialorder %v3844_v42, inf  ;;  %v3872_v18 = vand.u32 2147483648, %v3844_v42  ;;  %vm3871_vm0 = vcmp.eq.f32.partialorder %v3844_v42, 0.0 }
0x12bf   : > { %v3852_v21 = vmul.f32 %v4805_v40, %v3851_v43 }
0x12c1   : > { %v3853_v22 = vmul.f32 0.5, %v3852_v21 }
0x12c3   : > { %v3854_v59 = vsub.f32 1.5, %v3853_v22 }
0x12c4   : > { %v4807_v12 = vpop.eup %4806 }
0x12c5   : > { %v3855_v15 = vmul.f32 %v4805_v40, %v3854_v59  ;;  %v3863_v5 = vmul.f32 %v4807_v12, %v3844_v42 }
0x12c7   : > { %v3856_v20 = vmul.f32 %v3855_v15, %v3843_v19  ;;  %v3864_v23 = vmul.f32 %v4807_v12, %v3863_v5 }
0x12c9   : > { %v3858_v25 = vsel %vm3857_vm13, %v3843_v19, %v3856_v20  ;;  %v3865_v27 = vmul.f32 0.5, %v3864_v23 }
0x12ca   : > { %v3861_v28 = vsel %vm3859_vm14, %v3860_v24, %v3858_v25 }
0x12cb   : > { %v3874_v29 = vadd.f32 1e-06, %v3861_v28  ;;  %v3866_v30 = vsub.f32 1.5, %v3865_v27 }
0x12cd   : > { %4808 = vrcp.f32 %v3874_v29  ;;  %v3867_v31 = vmul.f32 %v4807_v12, %v3866_v30  ;;  %v3887_v44 = vand.u32 2147483648, %v3874_v29  ;;  %v3885_v47 = vand.u32 2147483647, %v3874_v29 }
0x12ce   : > { %vm3881_vm3 = vweird.f32 %v3874_v29 }
0x12cf   : > { %v3868_v17 = vmul.f32 %v3867_v31, %v3844_v42  ;;  %v3888_v49 = vor.u32 1.1754944e-38, %v3887_v44  ;;  %vm3886_vm5 = vcmp.eq.f32.partialorder %v3885_v47, 8.507059e+37 }
0x12d1   : > { %v3870_v32 = vsel %vm3869_vm15, %v3844_v42, %v3868_v17 }
0x12d2   : > { %v3873_v35 = vsel %vm3871_vm0, %v3872_v18, %v3870_v32 }
0x12d3   : > { %v4809_v34 = vpop.eup %4808  ;;  %v3875_v45 = vadd.f32 1e-06, %v3873_v35 }
0x12d4   : > { %v3877_v37 = vmul.f32 %v4809_v34, %v3874_v29  ;;  %vm3882_vm2 = vweird.f32 %v4809_v34 }
0x12d5   : > { %4810 = vrcp.f32 %v3875_v45  ;;  %vm3883_vm4 = vmor %vm3881_vm3, %vm3882_vm2  ;;  %v3902_v58 = vand.u32 2147483648, %v3875_v45  ;;  %v3900_v6 = vand.u32 2147483647, %v3875_v45  ;;  %vm3896_vm7 = vweird.f32 %v3875_v45 }
0x12d6   : > { %v3878_v1 = vsub.f32 1.0, %v3877_v37 }
0x12d7   : > { %v3903_v63 = vor.u32 1.1754944e-38, %v3902_v58  ;;  %vm3901_vm9 = vcmp.eq.f32.partialorder %v3900_v6, 8.507059e+37 }
0x12d8   : > { %v3879_v48 = vmul.f32 %v4809_v34, %v3878_v1 }
0x12da   : > { %v3880_v36 = vadd.f32 %v4809_v34, %v3879_v48 }
0x12db   : > { %v4811_v50 = vpop.eup %4810 }
0x12dc   : > { %v3884_v52 = vsel %vm3883_vm4, %v4809_v34, %v3880_v36  ;;  %v3892_v57 = vmul.f32 %v4811_v50, %v3875_v45  ;;  %vm3897_vm6 = vweird.f32 %v4811_v50 }
0x12dd   : > { %v3889_v54 = vsel %vm3886_vm5, %v3888_v49, %v3884_v52  ;;  %vm3898_vm8 = vmor %vm3896_vm7, %vm3897_vm6 }
0x12de   : > { %v3890_v26 = vmul.f32 %v3889_v54, %v3848_v51  ;;  %v3893_v56 = vsub.f32 1.0, %v3892_v57 }
0x12e0   : > { %v3909_v2 = vadd.f32 %v4803_v46, %v3890_v26  ;;  %v3894_v55 = vmul.f32 %v4811_v50, %v3893_v56 }
0x12e2   : > { %3911 = vst.msk [vmem:[#allocation16] sm:$0xff] %vm1096_vm1, %v3909_v2  ;;  %v3895_v61 = vadd.f32 %v4811_v50, %v3894_v55 }
0x12e4   : > { %v3899_v53 = vsel %vm3898_vm8, %v4811_v50, %v3895_v61 }
0x12e5   : > { %v3904_v0 = vsel %vm3901_vm9, %v3903_v63, %v3899_v53 }
0x12e6   : > { %v3905_v3 = vmul.f32 %v3904_v0, %v3849_v4 }
0x12e8   : > { %v3910_v9 = vadd.f32 %v4803_v46, %v3905_v3 }
0x12ea   : > { %3912 = vst.msk [vmem:[#allocation16 + $0x8] sm:$0xff] %vm1096_vm1, %v3910_v9 }
0x12eb PF: > { %s6045_s29 = sld [smem:[#allocation25_spill]]  ;;  %s5144_s11 = smov [#allocation16]  }
0x12ec   : > { %s3918_s25 = sshll.u32 %s5144_s11, 4  ;;  %s6046_s12 = sld [smem:[#allocation50_spill]]  ;;  %s3919_s25 = int_to_ptr.vmem [resolvable:$true] %s3918_s25 }
0x12ed   : > { %s5145_s22 = smov 128   ;;  %s5146_s15 = smov 8  }
0x12f1   : > { %p4435_p6 = scmp.eq.s32.totalorder %s6045_s29, 1 }
0x12f2   : > { %s3920_s30 = sshll.u32 %s6046_s12, 4  ;;  %s3921_s30 = int_to_ptr.hbm [resolvable:$true] %s3920_s30 }
0x12f3   : > { %4399 = dma.vmem_to_hbm [thread:$0]  (%p4435_p6), %s3919_s25, 256, %s3921_s30, [#allocation4], %s5145_s22, %s5145_s22, %s5146_s15  }
0x12f4   : > { %5117 = dma.done.wait (%p4435_p6), [#allocation4], 256  }
0x12f5   : > { %5119 = vsyncadd (%p4435_p6), [#allocation4], 4294967040 }
0x12f6 PF: > { %s6047_s30 = sld [smem:[#allocation27_spill]] }
0x12f7   : > { %s6048_s3 = sld [smem:[#allocation23_spill]] }
0x12f8   : > { %s6049_s28 = sld [smem:[#allocation24_spill]] }
0x12f9   : > { %s6050_s29 = sld [smem:[#allocation28_spill]] }
0x12fc   : > { %p41_p0 = scmp.ge.s32.totalorder %s6047_s30, 4  }
0x12fe   :  { %43 = sbr.rel (!%p41_p0) target bundleno = 33 (0x21), region = 251 }
0x1303   :  { %3937 = vsyncpa [#allocation3], 1 }
0x1304   :  { %3939 = vsyncpa [#allocation3 + $0x1], 1 }
0x1305   :  { %3940 = vsyncpa [#allocation6], 1 }
0x1306   :  { %3941 = vsyncpa [#allocation9], 1 }
0x1307   :  { %3943 = vsyncpa [#allocation9 + $0x1], 1 }
0x1308   :  { %3944 = vsyncpa [#allocation12], 1 }
0x1309   :  { %3946 = vsyncpa [#allocation12 + $0x1], 1 }
0x130a   :  { %3947 = vsyncpa [#allocation15], 1 }
0x130b   :  { %3949 = vsyncpa [#allocation15 + $0x1], 1 }
0x130c   :  { %3950 = vsyncpa [#allocation4], 1 }
0x130d   :  { %3952 = vsyncpa [#allocation4 + $0x1], 1 }

</bundles_post_ra>
